<compile_context>
chip_gen: v7x
topology: tpu7x:2x2x1
jax: 0.10.0
libtpu: 0.0.40
codegen_flags: <defaults>
</compile_context>

<pallas_src>
import jax
import jax.numpy as jnp
from jax import lax
from jax.experimental import pallas as pl
from jax.experimental.pallas import tpu as pltpu


_LPAD = 128   # left halo pad (lane-aligned so interior stores are aligned)
_RPAD = 128   # right halo pad (only needs >= W+1; 128 keeps the scratch tidy)
_TAPS = tuple((kh, kw) for kh in range(3) for kw in range(3))


def _conv3x3_all_images(xp_ref, w_ref, b_ref, layer, left_m, right_m,
                        *, n_imgs, cin, cout, H, W):
    """3x3 'same' conv for every image held in the padded scratch.

    xp_ref : VMEM ref (n_imgs*cin, _LPAD + H*W + _RPAD) f32; row r holds one
             image-channel's flattened HxW map at lane offset _LPAD, halos = 0.
    w_ref  : ref (3, 9, cout, cin) f32, taps ordered (kh, kw).
    b_ref  : ref (3, cout, 1) f32.
    left_m / right_m : (n_imgs*cin, H*W) bool masks for the kw = 0 / 2 taps.
    Returns n_imgs f32 values of shape (cout, H*W) (lane-dense).
    """
    S = H * W
    accs = [None] * n_imgs
    for t, (kh, kw) in enumerate(_TAPS):
        off = _LPAD + (kh - 1) * W + (kw - 1)
        tap = xp_ref[:, off:off + S]                  # (n_imgs*cin, S), one load
        if kw == 0:
            tap = jnp.where(left_m, tap, 0.0)
        elif kw == 2:
            tap = jnp.where(right_m, tap, 0.0)
        w_t = w_ref[layer, t]                         # (cout, cin)
        for n in range(n_imgs):
            part = jnp.dot(w_t, tap[n * cin:(n + 1) * cin, :],
                           preferred_element_type=jnp.float32)
            accs[n] = part if accs[n] is None else accs[n] + part
    b_col = b_ref[layer]                              # (cout, 1)
    return [acc + b_col for acc in accs]


def _make_parallel_kernel(n_imgs, cin, cout, H, W, out_dtype):
    """Single-invocation kernel for the 3 independent conv branches."""
    S = H * W

    def kernel(x_ref, y_ref, z_ref, w_ref, b_ref, u_ref, v_ref, wo_ref, xp_ref):
        nrows = n_imgs * cin
        # Zero only the halo bands; the interior is overwritten per branch.
        xp_ref[:, 0:_LPAD] = jnp.zeros((nrows, _LPAD), jnp.float32)
        xp_ref[:, _LPAD + S:_LPAD + S + _RPAD] = jnp.zeros((nrows, _RPAD),
                                                           jnp.float32)
        # Border masks, built once at full shape (only kw wrap needs masking;
        # the kh wrap lands in the zero halos).
        wcol = lax.broadcasted_iota(jnp.int32, (nrows, S), 1) % W
        left_m = wcol >= 1
        right_m = wcol <= W - 2

        branches = ((x_ref, u_ref), (y_ref, v_ref), (z_ref, wo_ref))
        for layer, (in_ref, out_ref) in enumerate(branches):
            xp_ref[:, _LPAD:_LPAD + S] = in_ref[...].astype(jnp.float32)
            outs = _conv3x3_all_images(xp_ref, w_ref, b_ref, layer,
                                       left_m, right_m,
                                       n_imgs=n_imgs, cin=cin, cout=cout,
                                       H=H, W=W)
            for n in range(n_imgs):
                out_ref[n * cout:(n + 1) * cout, :] = outs[n].astype(out_dtype)

    return kernel


def _make_chain_kernel(n_imgs, cin, cout, H, W, out_dtype):
    """Kernel fusing conv1 -> conv2 -> conv3; intermediates stay in VMEM."""
    S = H * W

    def kernel(x_ref, w_ref, b_ref, u_ref, v_ref, wo_ref, xp_ref):
        nrows = n_imgs * cin
        xp_ref[:, 0:_LPAD] = jnp.zeros((nrows, _LPAD), jnp.float32)
        xp_ref[:, _LPAD + S:_LPAD + S + _RPAD] = jnp.zeros((nrows, _RPAD),
                                                           jnp.float32)
        wcol = lax.broadcasted_iota(jnp.int32, (nrows, S), 1) % W
        left_m = wcol >= 1
        right_m = wcol <= W - 2

        xp_ref[:, _LPAD:_LPAD + S] = x_ref[...].astype(jnp.float32)
        out_refs = (u_ref, v_ref, wo_ref)
        for layer in range(3):
            outs = _conv3x3_all_images(xp_ref, w_ref, b_ref, layer,
                                       left_m, right_m,
                                       n_imgs=n_imgs, cin=cin, cout=cout,
                                       H=H, W=W)
            for n in range(n_imgs):
                out_refs[layer][n * cout:(n + 1) * cout, :] = \
                    outs[n].astype(out_dtype)
            if layer < 2:
                # Feed this layer's activations straight back into the padded
                # scratch interior (halos stay zero).
                for n in range(n_imgs):
                    xp_ref[n * cout:(n + 1) * cout, _LPAD:_LPAD + S] = outs[n]

    return kernel


def prepare_toy_model_params(params):
    """PyTorch Conv2d params -> per-tap weights / column biases (done once,
    OUTSIDE the jitted forward)."""
    ws, bs = [], []
    for i in (1, 2, 3):
        wt = params[f"model{i}"]["weight"]            # (Cout, Cin, 3, 3)
        co, ci, kh, kw = wt.shape
        ws.append(jnp.transpose(wt, (2, 3, 0, 1)).reshape(kh * kw, co, ci))
        bs.append(params[f"model{i}"]["bias"].reshape(co, 1))
    # (3, 9, Cout, Cin), (3, Cout, 1)
    return jnp.stack(ws), jnp.stack(bs)


@jax.jit
def _forward_parallel(w_taps, b_cols, x, y, z):
    N, C, H, W = x.shape
    S = H * W
    assert W + 1 <= _LPAD and W + 1 <= _RPAD
    kernel = _make_parallel_kernel(N, C, C, H, W, x.dtype)
    u, v, w = pl.pallas_call(
        kernel,
        out_shape=[jax.ShapeDtypeStruct((N * C, S), x.dtype)] * 3,
        grid=(1,),
        in_specs=[
            pl.BlockSpec((N * C, S), lambda i: (0, 0)),
            pl.BlockSpec((N * C, S), lambda i: (0, 0)),
            pl.BlockSpec((N * C, S), lambda i: (0, 0)),
            pl.BlockSpec((3, 9, C, C), lambda i: (0, 0, 0, 0)),
            pl.BlockSpec((3, C, 1), lambda i: (0, 0, 0)),
        ],
        out_specs=[pl.BlockSpec((N * C, S), lambda i: (0, 0))] * 3,
        scratch_shapes=[pltpu.VMEM((N * C, _LPAD + S + _RPAD), jnp.float32)],
        compiler_params=pltpu.CompilerParams(
            dimension_semantics=("arbitrary",)),
    )(x.reshape(N * C, S), y.reshape(N * C, S), z.reshape(N * C, S),
      w_taps, b_cols)
    return (u.reshape(N, C, H, W),
            v.reshape(N, C, H, W),
            w.reshape(N, C, H, W))


@jax.jit
def _forward_sequential(w_taps, b_cols, x):
    N, C, H, W = x.shape
    S = H * W
    assert W + 1 <= _LPAD and W + 1 <= _RPAD
    kernel = _make_chain_kernel(N, C, C, H, W, x.dtype)
    u2, v2, w2 = pl.pallas_call(
        kernel,
        out_shape=[jax.ShapeDtypeStruct((N * C, S), x.dtype)] * 3,
        grid=(1,),
        in_specs=[
            pl.BlockSpec((N * C, S), lambda i: (0, 0)),
            pl.BlockSpec((3, 9, C, C), lambda i: (0, 0, 0, 0)),
            pl.BlockSpec((3, C, 1), lambda i: (0, 0, 0)),
        ],
        out_specs=[pl.BlockSpec((N * C, S), lambda i: (0, 0))] * 3,
        scratch_shapes=[pltpu.VMEM((N * C, _LPAD + S + _RPAD), jnp.float32)],
        compiler_params=pltpu.CompilerParams(
            dimension_semantics=("arbitrary",)),
    )(x.reshape(N * C, S), w_taps, b_cols)
    return (u2.reshape(N, C, H, W),
            v2.reshape(N, C, H, W),
            w2.reshape(N, C, H, W))


def toy_model_forward(prepared_params, x, y, z, sequence=False):
    """Mirrors ToyModel.forward compute (device/stream glue omitted)."""
    w_taps, b_cols = prepared_params
    if sequence:
        return _forward_sequential(w_taps, b_cols, x)
    return _forward_parallel(w_taps, b_cols, x, y, z)


def init_toy_model_params(key, cin=16, cout=16, k=3):
    """Deterministic parameters for the three Conv2d(16,16,3,3) layers."""
    params = {}
    for i in range(1, 4):
        key, kw_, kb = jax.random.split(key, 3)
        fan_in = cin * k * k
        bound = 1.0 / jnp.sqrt(fan_in)
        params[f"model{i}"] = {
            "weight": jax.random.uniform(
                kw_, (cout, cin, k, k), jnp.float32, -bound, bound),
            "bias": jax.random.uniform(
                kb, (cout,), jnp.float32, -bound, bound),
        }
    return params


if __name__ == "__main__":
    key = jax.random.PRNGKey(0)
    kp, kx, ky, kz = jax.random.split(key, 4)

    params = init_toy_model_params(kp)
    prepared = prepare_toy_model_params(params)   # hoisted out of the forwards

    # Channels fixed at 16 by the module; small batch / spatial dims.
    N, C, H, W = 2, 16, 16, 16
    x = jax.random.normal(kx, (N, C, H, W), jnp.float32)
    y = jax.random.normal(ky, (N, C, H, W), jnp.float32)
    z = jax.random.normal(kz, (N, C, H, W), jnp.float32)

    # Parallel branches: one collapsed grid=(1,) pallas_call, no XLA stack.
    u, v, w = toy_model_forward(prepared, x, y, z, sequence=False)
    # Sequential branch: one fused pallas_call (conv3(conv2(conv1(x)))).
    us, vs, ws = toy_model_forward(prepared, x, y, z, sequence=True)
    jax.block_until_ready((u, v, w, us, vs, ws))

    # Correctness check against XLA's conv (same math, different impl).
    def ref_conv(xn, wt, b):
        o = lax.conv_general_dilated(
            xn, wt, window_strides=(1, 1), padding="SAME",
            dimension_numbers=("NCHW", "OIHW", "NCHW"))
        return o + b[None, :, None, None]

    w1, b1 = params["model1"]["weight"], params["model1"]["bias"]
    w2, b2 = params["model2"]["weight"], params["model2"]["bias"]
    w3, b3 = params["model3"]["weight"], params["model3"]["bias"]

    ru = ref_conv(x, w1, b1)
    rv = ref_conv(y, w2, b2)
    rw = ref_conv(z, w3, b3)
    rus = ref_conv(x, w1, b1)
    rvs = ref_conv(rus, w2, b2)
    rws = ref_conv(rvs, w3, b3)

    assert jnp.max(jnp.abs(u - ru)) < 1e-4
    assert jnp.max(jnp.abs(v - rv)) < 1e-4
    assert jnp.max(jnp.abs(w - rw)) < 1e-4
    assert jnp.max(jnp.abs(us - rus)) < 1e-4
    assert jnp.max(jnp.abs(vs - rvs)) < 5e-4
    assert jnp.max(jnp.abs(ws - rws)) < 1e-3

    print("KERNEL_OK")
</pallas_src>

<mosaic_0001>
module attributes {stable_mosaic.version = 11 : i64} {
  func.func @kernel(%arg0: i32, %arg1: memref<32x256xf32, #tpu.memory_space<vmem>>, %arg2: memref<32x256xf32, #tpu.memory_space<vmem>>, %arg3: memref<32x256xf32, #tpu.memory_space<vmem>>, %arg4: memref<3x9x16x16xf32, #tpu.memory_space<vmem>>, %arg5: memref<3x16x1xf32, #tpu.memory_space<vmem>>, %arg6: memref<32x256xf32, #tpu.memory_space<vmem>>, %arg7: memref<32x256xf32, #tpu.memory_space<vmem>>, %arg8: memref<32x256xf32, #tpu.memory_space<vmem>>, %arg9: memref<32x512xf32, #tpu.memory_space<vmem>>) attributes {dimension_semantics = [#tpu.dimension_semantics<arbitrary>], iteration_bounds = array<i64: 1>, scalar_prefetch = 0 : i64, scratch_operands = 1 : i64, tpu.core_type = #tpu.core_type<tc>, window_params = [{pipeline_mode = #tpu.pipeline_mode<synchronous>, transform_indices = @transform_0, window_bounds = array<i64: 32, 256>}, {pipeline_mode = #tpu.pipeline_mode<synchronous>, transform_indices = @transform_1, window_bounds = array<i64: 32, 256>}, {pipeline_mode = #tpu.pipeline_mode<synchronous>, transform_indices = @transform_2, window_bounds = array<i64: 32, 256>}, {pipeline_mode = #tpu.pipeline_mode<synchronous>, transform_indices = @transform_3, window_bounds = array<i64: 3, 9, 16, 16>}, {pipeline_mode = #tpu.pipeline_mode<synchronous>, transform_indices = @transform_4, window_bounds = array<i64: 3, 16, 1>}, {pipeline_mode = #tpu.pipeline_mode<synchronous>, transform_indices = @transform_5, window_bounds = array<i64: 32, 256>}, {pipeline_mode = #tpu.pipeline_mode<synchronous>, transform_indices = @transform_6, window_bounds = array<i64: 32, 256>}, {pipeline_mode = #tpu.pipeline_mode<synchronous>, transform_indices = @transform_7, window_bounds = array<i64: 32, 256>}]} {
    %cst = arith.constant 0.000000e+00 : f32
    %0 = vector.broadcast %cst : f32 to vector<32x128xf32>
    %c0 = arith.constant 0 : index
    %c0_0 = arith.constant 0 : index
    %1 = vector.load %arg9[%c0, %c0_0] : memref<32x512xf32, #tpu.memory_space<vmem>>, vector<32x128xf32>
    tpu.vector_store %arg9[%c0, %c0_0], %0 {strides = array<i32>} : memref<32x512xf32, #tpu.memory_space<vmem>>, vector<32x128xf32>,
    %cst_1 = arith.constant 0.000000e+00 : f32
    %2 = vector.broadcast %cst_1 : f32 to vector<32x128xf32>
    %c0_2 = arith.constant 0 : index
    %c384 = arith.constant 384 : index
    %3 = vector.load %arg9[%c0_2, %c384] : memref<32x512xf32, #tpu.memory_space<vmem>>, vector<32x128xf32>
    tpu.vector_store %arg9[%c0_2, %c384], %2 {strides = array<i32>} : memref<32x512xf32, #tpu.memory_space<vmem>>, vector<32x128xf32>,
    %4 = tpu.iota {dimensions = array<i32: 1>} : vector<32x256xi32>
    %c16_i32 = arith.constant 16 : i32
    %c0_i32 = arith.constant 0 : i32
    %5 = arith.cmpi eq, %c16_i32, %c0_i32 : i32
    %c1_i32 = arith.constant 1 : i32
    %6 = arith.select %5, %c1_i32, %c16_i32 : i32
    %7 = vector.broadcast %6 : i32 to vector<32x256xi32>
    %8 = arith.remsi %4, %7 : vector<32x256xi32>
    %c0_i32_3 = arith.constant 0 : i32
    %9 = vector.broadcast %c0_i32_3 : i32 to vector<32x256xi32>
    %10 = arith.cmpi ne, %8, %9 : vector<32x256xi32>
    %c0_i32_4 = arith.constant 0 : i32
    %11 = vector.broadcast %c0_i32_4 : i32 to vector<32x256xi32>
    %12 = arith.cmpi slt, %8, %11 : vector<32x256xi32>
    %c0_i32_5 = arith.constant 0 : i32
    %13 = arith.cmpi slt, %6, %c0_i32_5 : i32
    %14 = vector.broadcast %13 : i1 to vector<32x256xi1>
    %15 = vector.broadcast %14 : vector<32x256xi1> to vector<32x256xi1>
    %16 = arith.xori %12, %15 : vector<32x256xi1>
    %17 = arith.andi %16, %10 : vector<32x256xi1>
    %18 = vector.broadcast %6 : i32 to vector<32x256xi32>
    %19 = arith.addi %8, %18 : vector<32x256xi32>
    %20 = arith.select %17, %19, %8 : vector<32x256xi1>, vector<32x256xi32>
    %c1_i32_6 = arith.constant 1 : i32
    %21 = vector.broadcast %c1_i32_6 : i32 to vector<32x256xi32>
    %22 = arith.cmpi sge, %20, %21 : vector<32x256xi32>
    %c14_i32 = arith.constant 14 : i32
    %23 = vector.broadcast %c14_i32 : i32 to vector<32x256xi32>
    %24 = arith.cmpi sle, %20, %23 : vector<32x256xi32>
    %c0_7 = arith.constant 0 : index
    %c0_8 = arith.constant 0 : index
    %25 = vector.load %arg1[%c0_7, %c0_8] : memref<32x256xf32, #tpu.memory_space<vmem>>, vector<32x256xf32>
    %c0_9 = arith.constant 0 : index
    %c128 = arith.constant 128 : index
    %26 = vector.load %arg9[%c0_9, %c128] : memref<32x512xf32, #tpu.memory_space<vmem>>, vector<32x256xf32>
    tpu.vector_store %arg9[%c0_9, %c128], %25 {strides = array<i32>} : memref<32x512xf32, #tpu.memory_space<vmem>>, vector<32x256xf32>,
    %c0_10 = arith.constant 0 : index
    %c111 = arith.constant 111 : index
    %27 = vector.load %arg9[%c0_10, %c111] : memref<32x512xf32, #tpu.memory_space<vmem>>, vector<32x256xf32>
    %cst_11 = arith.constant 0.000000e+00 : f32
    %28 = vector.broadcast %cst_11 : f32 to vector<32x256xf32>
    %29 = arith.select %22, %27, %28 : vector<32x256xi1>, vector<32x256xf32>
    %c0_12 = arith.constant 0 : index
    %c0_13 = arith.constant 0 : index
    %c0_14 = arith.constant 0 : index
    %c0_15 = arith.constant 0 : index
    %30 = vector.load %arg4[%c0_12, %c0_13, %c0_14, %c0_15] : memref<3x9x16x16xf32, #tpu.memory_space<vmem>>, vector<1x1x16x16xf32>
    %31 = vector.shape_cast %30 : vector<1x1x16x16xf32> to vector<16x16xf32>
    %32 = vector.extract_strided_slice %29 {offsets = [0, 0], sizes = [16, 256], strides = [1, 1]} : vector<32x256xf32> to vector<16x256xf32>
    %cst_16 = arith.constant dense<0.000000e+00> : vector<16x256xf32>
    %33 = tpu.matmul %31, %32, %cst_16 {dimension_numbers = #tpu.dot_dimension_numbers<[1], [0], [0], [1], [0, 0, 1, 1], [], []>} : vector<16x16xf32>, vector<16x256xf32>, vector<16x256xf32> -> vector<16x256xf32>
    %34 = vector.extract_strided_slice %29 {offsets = [16, 0], sizes = [16, 256], strides = [1, 1]} : vector<32x256xf32> to vector<16x256xf32>
    %cst_17 = arith.constant dense<0.000000e+00> : vector<16x256xf32>
    %35 = tpu.matmul %31, %34, %cst_17 {dimension_numbers = #tpu.dot_dimension_numbers<[1], [0], [0], [1], [0, 0, 1, 1], [], []>} : vector<16x16xf32>, vector<16x256xf32>, vector<16x256xf32> -> vector<16x256xf32>
    %c0_18 = arith.constant 0 : index
    %c112 = arith.constant 112 : index
    %36 = vector.load %arg9[%c0_18, %c112] : memref<32x512xf32, #tpu.memory_space<vmem>>, vector<32x256xf32>
    %c0_19 = arith.constant 0 : index
    %c1 = arith.constant 1 : index
    %c0_20 = arith.constant 0 : index
    %c0_21 = arith.constant 0 : index
    %37 = vector.load %arg4[%c0_19, %c1, %c0_20, %c0_21] : memref<3x9x16x16xf32, #tpu.memory_space<vmem>>, vector<1x1x16x16xf32>
    %38 = vector.shape_cast %37 : vector<1x1x16x16xf32> to vector<16x16xf32>
    %39 = vector.extract_strided_slice %36 {offsets = [0, 0], sizes = [16, 256], strides = [1, 1]} : vector<32x256xf32> to vector<16x256xf32>
    %cst_22 = arith.constant dense<0.000000e+00> : vector<16x256xf32>
    %40 = tpu.matmul %38, %39, %cst_22 {dimension_numbers = #tpu.dot_dimension_numbers<[1], [0], [0], [1], [0, 0, 1, 1], [], []>} : vector<16x16xf32>, vector<16x256xf32>, vector<16x256xf32> -> vector<16x256xf32>
    %41 = arith.addf %33, %40 : vector<16x256xf32>
    %42 = vector.extract_strided_slice %36 {offsets = [16, 0], sizes = [16, 256], strides = [1, 1]} : vector<32x256xf32> to vector<16x256xf32>
    %cst_23 = arith.constant dense<0.000000e+00> : vector<16x256xf32>
    %43 = tpu.matmul %38, %42, %cst_23 {dimension_numbers = #tpu.dot_dimension_numbers<[1], [0], [0], [1], [0, 0, 1, 1], [], []>} : vector<16x16xf32>, vector<16x256xf32>, vector<16x256xf32> -> vector<16x256xf32>
    %44 = arith.addf %35, %43 : vector<16x256xf32>
    %c0_24 = arith.constant 0 : index
    %c113 = arith.constant 113 : index
    %45 = vector.load %arg9[%c0_24, %c113] : memref<32x512xf32, #tpu.memory_space<vmem>>, vector<32x256xf32>
    %cst_25 = arith.constant 0.000000e+00 : f32
    %46 = vector.broadcast %cst_25 : f32 to vector<32x256xf32>
    %47 = arith.select %24, %45, %46 : vector<32x256xi1>, vector<32x256xf32>
    %c0_26 = arith.constant 0 : index
    %c2 = arith.constant 2 : index
    %c0_27 = arith.constant 0 : index
    %c0_28 = arith.constant 0 : index
    %48 = vector.load %arg4[%c0_26, %c2, %c0_27, %c0_28] : memref<3x9x16x16xf32, #tpu.memory_space<vmem>>, vector<1x1x16x16xf32>
    %49 = vector.shape_cast %48 : vector<1x1x16x16xf32> to vector<16x16xf32>
    %50 = vector.extract_strided_slice %47 {offsets = [0, 0], sizes = [16, 256], strides = [1, 1]} : vector<32x256xf32> to vector<16x256xf32>
    %cst_29 = arith.constant dense<0.000000e+00> : vector<16x256xf32>
    %51 = tpu.matmul %49, %50, %cst_29 {dimension_numbers = #tpu.dot_dimension_numbers<[1], [0], [0], [1], [0, 0, 1, 1], [], []>} : vector<16x16xf32>, vector<16x256xf32>, vector<16x256xf32> -> vector<16x256xf32>
    %52 = arith.addf %41, %51 : vector<16x256xf32>
    %53 = vector.extract_strided_slice %47 {offsets = [16, 0], sizes = [16, 256], strides = [1, 1]} : vector<32x256xf32> to vector<16x256xf32>
    %cst_30 = arith.constant dense<0.000000e+00> : vector<16x256xf32>
    %54 = tpu.matmul %49, %53, %cst_30 {dimension_numbers = #tpu.dot_dimension_numbers<[1], [0], [0], [1], [0, 0, 1, 1], [], []>} : vector<16x16xf32>, vector<16x256xf32>, vector<16x256xf32> -> vector<16x256xf32>
    %55 = arith.addf %44, %54 : vector<16x256xf32>
    %c0_31 = arith.constant 0 : index
    %c127 = arith.constant 127 : index
    %56 = vector.load %arg9[%c0_31, %c127] : memref<32x512xf32, #tpu.memory_space<vmem>>, vector<32x256xf32>
    %cst_32 = arith.constant 0.000000e+00 : f32
    %57 = vector.broadcast %cst_32 : f32 to vector<32x256xf32>
    %58 = arith.select %22, %56, %57 : vector<32x256xi1>, vector<32x256xf32>
    %c0_33 = arith.constant 0 : index
    %c3 = arith.constant 3 : index
    %c0_34 = arith.constant 0 : index
    %c0_35 = arith.constant 0 : index
    %59 = vector.load %arg4[%c0_33, %c3, %c0_34, %c0_35] : memref<3x9x16x16xf32, #tpu.memory_space<vmem>>, vector<1x1x16x16xf32>
    %60 = vector.shape_cast %59 : vector<1x1x16x16xf32> to vector<16x16xf32>
    %61 = vector.extract_strided_slice %58 {offsets = [0, 0], sizes = [16, 256], strides = [1, 1]} : vector<32x256xf32> to vector<16x256xf32>
    %cst_36 = arith.constant dense<0.000000e+00> : vector<16x256xf32>
    %62 = tpu.matmul %60, %61, %cst_36 {dimension_numbers = #tpu.dot_dimension_numbers<[1], [0], [0], [1], [0, 0, 1, 1], [], []>} : vector<16x16xf32>, vector<16x256xf32>, vector<16x256xf32> -> vector<16x256xf32>
    %63 = arith.addf %52, %62 : vector<16x256xf32>
    %64 = vector.extract_strided_slice %58 {offsets = [16, 0], sizes = [16, 256], strides = [1, 1]} : vector<32x256xf32> to vector<16x256xf32>
    %cst_37 = arith.constant dense<0.000000e+00> : vector<16x256xf32>
    %65 = tpu.matmul %60, %64, %cst_37 {dimension_numbers = #tpu.dot_dimension_numbers<[1], [0], [0], [1], [0, 0, 1, 1], [], []>} : vector<16x16xf32>, vector<16x256xf32>, vector<16x256xf32> -> vector<16x256xf32>
    %66 = arith.addf %55, %65 : vector<16x256xf32>
    %c0_38 = arith.constant 0 : index
    %c128_39 = arith.constant 128 : index
    %67 = vector.load %arg9[%c0_38, %c128_39] : memref<32x512xf32, #tpu.memory_space<vmem>>, vector<32x256xf32>
    %c0_40 = arith.constant 0 : index
    %c4 = arith.constant 4 : index
    %c0_41 = arith.constant 0 : index
    %c0_42 = arith.constant 0 : index
    %68 = vector.load %arg4[%c0_40, %c4, %c0_41, %c0_42] : memref<3x9x16x16xf32, #tpu.memory_space<vmem>>, vector<1x1x16x16xf32>
    %69 = vector.shape_cast %68 : vector<1x1x16x16xf32> to vector<16x16xf32>
    %70 = vector.extract_strided_slice %67 {offsets = [0, 0], sizes = [16, 256], strides = [1, 1]} : vector<32x256xf32> to vector<16x256xf32>
    %cst_43 = arith.constant dense<0.000000e+00> : vector<16x256xf32>
    %71 = tpu.matmul %69, %70, %cst_43 {dimension_numbers = #tpu.dot_dimension_numbers<[1], [0], [0], [1], [0, 0, 1, 1], [], []>} : vector<16x16xf32>, vector<16x256xf32>, vector<16x256xf32> -> vector<16x256xf32>
    %72 = arith.addf %63, %71 : vector<16x256xf32>
    %73 = vector.extract_strided_slice %67 {offsets = [16, 0], sizes = [16, 256], strides = [1, 1]} : vector<32x256xf32> to vector<16x256xf32>
    %cst_44 = arith.constant dense<0.000000e+00> : vector<16x256xf32>
    %74 = tpu.matmul %69, %73, %cst_44 {dimension_numbers = #tpu.dot_dimension_numbers<[1], [0], [0], [1], [0, 0, 1, 1], [], []>} : vector<16x16xf32>, vector<16x256xf32>, vector<16x256xf32> -> vector<16x256xf32>
    %75 = arith.addf %66, %74 : vector<16x256xf32>
    %c0_45 = arith.constant 0 : index
    %c129 = arith.constant 129 : index
    %76 = vector.load %arg9[%c0_45, %c129] : memref<32x512xf32, #tpu.memory_space<vmem>>, vector<32x256xf32>
    %cst_46 = arith.constant 0.000000e+00 : f32
    %77 = vector.broadcast %cst_46 : f32 to vector<32x256xf32>
    %78 = arith.select %24, %76, %77 : vector<32x256xi1>, vector<32x256xf32>
    %c0_47 = arith.constant 0 : index
    %c5 = arith.constant 5 : index
    %c0_48 = arith.constant 0 : index
    %c0_49 = arith.constant 0 : index
    %79 = vector.load %arg4[%c0_47, %c5, %c0_48, %c0_49] : memref<3x9x16x16xf32, #tpu.memory_space<vmem>>, vector<1x1x16x16xf32>
    %80 = vector.shape_cast %79 : vector<1x1x16x16xf32> to vector<16x16xf32>
    %81 = vector.extract_strided_slice %78 {offsets = [0, 0], sizes = [16, 256], strides = [1, 1]} : vector<32x256xf32> to vector<16x256xf32>
    %cst_50 = arith.constant dense<0.000000e+00> : vector<16x256xf32>
    %82 = tpu.matmul %80, %81, %cst_50 {dimension_numbers = #tpu.dot_dimension_numbers<[1], [0], [0], [1], [0, 0, 1, 1], [], []>} : vector<16x16xf32>, vector<16x256xf32>, vector<16x256xf32> -> vector<16x256xf32>
    %83 = arith.addf %72, %82 : vector<16x256xf32>
    %84 = vector.extract_strided_slice %78 {offsets = [16, 0], sizes = [16, 256], strides = [1, 1]} : vector<32x256xf32> to vector<16x256xf32>
    %cst_51 = arith.constant dense<0.000000e+00> : vector<16x256xf32>
    %85 = tpu.matmul %80, %84, %cst_51 {dimension_numbers = #tpu.dot_dimension_numbers<[1], [0], [0], [1], [0, 0, 1, 1], [], []>} : vector<16x16xf32>, vector<16x256xf32>, vector<16x256xf32> -> vector<16x256xf32>
    %86 = arith.addf %75, %85 : vector<16x256xf32>
    %c0_52 = arith.constant 0 : index
    %c143 = arith.constant 143 : index
    %87 = vector.load %arg9[%c0_52, %c143] : memref<32x512xf32, #tpu.memory_space<vmem>>, vector<32x256xf32>
    %cst_53 = arith.constant 0.000000e+00 : f32
    %88 = vector.broadcast %cst_53 : f32 to vector<32x256xf32>
    %89 = arith.select %22, %87, %88 : vector<32x256xi1>, vector<32x256xf32>
    %c0_54 = arith.constant 0 : index
    %c6 = arith.constant 6 : index
    %c0_55 = arith.constant 0 : index
    %c0_56 = arith.constant 0 : index
    %90 = vector.load %arg4[%c0_54, %c6, %c0_55, %c0_56] : memref<3x9x16x16xf32, #tpu.memory_space<vmem>>, vector<1x1x16x16xf32>
    %91 = vector.shape_cast %90 : vector<1x1x16x16xf32> to vector<16x16xf32>
    %92 = vector.extract_strided_slice %89 {offsets = [0, 0], sizes = [16, 256], strides = [1, 1]} : vector<32x256xf32> to vector<16x256xf32>
    %cst_57 = arith.constant dense<0.000000e+00> : vector<16x256xf32>
    %93 = tpu.matmul %91, %92, %cst_57 {dimension_numbers = #tpu.dot_dimension_numbers<[1], [0], [0], [1], [0, 0, 1, 1], [], []>} : vector<16x16xf32>, vector<16x256xf32>, vector<16x256xf32> -> vector<16x256xf32>
    %94 = arith.addf %83, %93 : vector<16x256xf32>
    %95 = vector.extract_strided_slice %89 {offsets = [16, 0], sizes = [16, 256], strides = [1, 1]} : vector<32x256xf32> to vector<16x256xf32>
    %cst_58 = arith.constant dense<0.000000e+00> : vector<16x256xf32>
    %96 = tpu.matmul %91, %95, %cst_58 {dimension_numbers = #tpu.dot_dimension_numbers<[1], [0], [0], [1], [0, 0, 1, 1], [], []>} : vector<16x16xf32>, vector<16x256xf32>, vector<16x256xf32> -> vector<16x256xf32>
    %97 = arith.addf %86, %96 : vector<16x256xf32>
    %c0_59 = arith.constant 0 : index
    %c144 = arith.constant 144 : index
    %98 = vector.load %arg9[%c0_59, %c144] : memref<32x512xf32, #tpu.memory_space<vmem>>, vector<32x256xf32>
    %c0_60 = arith.constant 0 : index
    %c7 = arith.constant 7 : index
    %c0_61 = arith.constant 0 : index
    %c0_62 = arith.constant 0 : index
    %99 = vector.load %arg4[%c0_60, %c7, %c0_61, %c0_62] : memref<3x9x16x16xf32, #tpu.memory_space<vmem>>, vector<1x1x16x16xf32>
    %100 = vector.shape_cast %99 : vector<1x1x16x16xf32> to vector<16x16xf32>
    %101 = vector.extract_strided_slice %98 {offsets = [0, 0], sizes = [16, 256], strides = [1, 1]} : vector<32x256xf32> to vector<16x256xf32>
    %cst_63 = arith.constant dense<0.000000e+00> : vector<16x256xf32>
    %102 = tpu.matmul %100, %101, %cst_63 {dimension_numbers = #tpu.dot_dimension_numbers<[1], [0], [0], [1], [0, 0, 1, 1], [], []>} : vector<16x16xf32>, vector<16x256xf32>, vector<16x256xf32> -> vector<16x256xf32>
    %103 = arith.addf %94, %102 : vector<16x256xf32>
    %104 = vector.extract_strided_slice %98 {offsets = [16, 0], sizes = [16, 256], strides = [1, 1]} : vector<32x256xf32> to vector<16x256xf32>
    %cst_64 = arith.constant dense<0.000000e+00> : vector<16x256xf32>
    %105 = tpu.matmul %100, %104, %cst_64 {dimension_numbers = #tpu.dot_dimension_numbers<[1], [0], [0], [1], [0, 0, 1, 1], [], []>} : vector<16x16xf32>, vector<16x256xf32>, vector<16x256xf32> -> vector<16x256xf32>
    %106 = arith.addf %97, %105 : vector<16x256xf32>
    %c0_65 = arith.constant 0 : index
    %c145 = arith.constant 145 : index
    %107 = vector.load %arg9[%c0_65, %c145] : memref<32x512xf32, #tpu.memory_space<vmem>>, vector<32x256xf32>
    %cst_66 = arith.constant 0.000000e+00 : f32
    %108 = vector.broadcast %cst_66 : f32 to vector<32x256xf32>
    %109 = arith.select %24, %107, %108 : vector<32x256xi1>, vector<32x256xf32>
    %c0_67 = arith.constant 0 : index
    %c8 = arith.constant 8 : index
    %c0_68 = arith.constant 0 : index
    %c0_69 = arith.constant 0 : index
    %110 = vector.load %arg4[%c0_67, %c8, %c0_68, %c0_69] : memref<3x9x16x16xf32, #tpu.memory_space<vmem>>, vector<1x1x16x16xf32>
    %111 = vector.shape_cast %110 : vector<1x1x16x16xf32> to vector<16x16xf32>
    %112 = vector.extract_strided_slice %109 {offsets = [0, 0], sizes = [16, 256], strides = [1, 1]} : vector<32x256xf32> to vector<16x256xf32>
    %cst_70 = arith.constant dense<0.000000e+00> : vector<16x256xf32>
    %113 = tpu.matmul %111, %112, %cst_70 {dimension_numbers = #tpu.dot_dimension_numbers<[1], [0], [0], [1], [0, 0, 1, 1], [], []>} : vector<16x16xf32>, vector<16x256xf32>, vector<16x256xf32> -> vector<16x256xf32>
    %114 = arith.addf %103, %113 : vector<16x256xf32>
    %115 = vector.extract_strided_slice %109 {offsets = [16, 0], sizes = [16, 256], strides = [1, 1]} : vector<32x256xf32> to vector<16x256xf32>
    %cst_71 = arith.constant dense<0.000000e+00> : vector<16x256xf32>
    %116 = tpu.matmul %111, %115, %cst_71 {dimension_numbers = #tpu.dot_dimension_numbers<[1], [0], [0], [1], [0, 0, 1, 1], [], []>} : vector<16x16xf32>, vector<16x256xf32>, vector<16x256xf32> -> vector<16x256xf32>
    %117 = arith.addf %106, %116 : vector<16x256xf32>
    %c0_72 = arith.constant 0 : index
    %c0_73 = arith.constant 0 : index
    %c0_74 = arith.constant 0 : index
    %118 = vector.load %arg5[%c0_72, %c0_73, %c0_74] : memref<3x16x1xf32, #tpu.memory_space<vmem>>, vector<1x16x1xf32>
    %119 = vector.shape_cast %118 : vector<1x16x1xf32> to vector<16x1xf32>
    %120 = vector.broadcast %119 : vector<16x1xf32> to vector<16x256xf32>
    %121 = arith.addf %114, %120 : vector<16x256xf32>
    %122 = vector.broadcast %119 : vector<16x1xf32> to vector<16x256xf32>
    %123 = arith.addf %117, %122 : vector<16x256xf32>
    %c0_75 = arith.constant 0 : index
    %c0_76 = arith.constant 0 : index
    %124 = vector.load %arg6[%c0_75, %c0_76] : memref<32x256xf32, #tpu.memory_space<vmem>>, vector<16x256xf32>
    tpu.vector_store %arg6[%c0_75, %c0_76], %121 {strides = array<i32>} : memref<32x256xf32, #tpu.memory_space<vmem>>, vector<16x256xf32>,
    %c16 = arith.constant 16 : index
    %c0_77 = arith.constant 0 : index
    %125 = vector.load %arg6[%c16, %c0_77] : memref<32x256xf32, #tpu.memory_space<vmem>>, vector<16x256xf32>
    tpu.vector_store %arg6[%c16, %c0_77], %123 {strides = array<i32>} : memref<32x256xf32, #tpu.memory_space<vmem>>, vector<16x256xf32>,
    %c0_78 = arith.constant 0 : index
    %c0_79 = arith.constant 0 : index
    %126 = vector.load %arg2[%c0_78, %c0_79] : memref<32x256xf32, #tpu.memory_space<vmem>>, vector<32x256xf32>
    %c0_80 = arith.constant 0 : index
    %c128_81 = arith.constant 128 : index
    %127 = vector.load %arg9[%c0_80, %c128_81] : memref<32x512xf32, #tpu.memory_space<vmem>>, vector<32x256xf32>
    tpu.vector_store %arg9[%c0_80, %c128_81], %126 {strides = array<i32>} : memref<32x512xf32, #tpu.memory_space<vmem>>, vector<32x256xf32>,
    %c0_82 = arith.constant 0 : index
    %c111_83 = arith.constant 111 : index
    %128 = vector.load %arg9[%c0_82, %c111_83] : memref<32x512xf32, #tpu.memory_space<vmem>>, vector<32x256xf32>
    %cst_84 = arith.constant 0.000000e+00 : f32
    %129 = vector.broadcast %cst_84 : f32 to vector<32x256xf32>
    %130 = arith.select %22, %128, %129 : vector<32x256xi1>, vector<32x256xf32>
    %c1_85 = arith.constant 1 : index
    %c0_86 = arith.constant 0 : index
    %c0_87 = arith.constant 0 : index
    %c0_88 = arith.constant 0 : index
    %131 = vector.load %arg4[%c1_85, %c0_86, %c0_87, %c0_88] : memref<3x9x16x16xf32, #tpu.memory_space<vmem>>, vector<1x1x16x16xf32>
    %132 = vector.shape_cast %131 : vector<1x1x16x16xf32> to vector<16x16xf32>
    %133 = vector.extract_strided_slice %130 {offsets = [0, 0], sizes = [16, 256], strides = [1, 1]} : vector<32x256xf32> to vector<16x256xf32>
    %cst_89 = arith.constant dense<0.000000e+00> : vector<16x256xf32>
    %134 = tpu.matmul %132, %133, %cst_89 {dimension_numbers = #tpu.dot_dimension_numbers<[1], [0], [0], [1], [0, 0, 1, 1], [], []>} : vector<16x16xf32>, vector<16x256xf32>, vector<16x256xf32> -> vector<16x256xf32>
    %135 = vector.extract_strided_slice %130 {offsets = [16, 0], sizes = [16, 256], strides = [1, 1]} : vector<32x256xf32> to vector<16x256xf32>
    %cst_90 = arith.constant dense<0.000000e+00> : vector<16x256xf32>
    %136 = tpu.matmul %132, %135, %cst_90 {dimension_numbers = #tpu.dot_dimension_numbers<[1], [0], [0], [1], [0, 0, 1, 1], [], []>} : vector<16x16xf32>, vector<16x256xf32>, vector<16x256xf32> -> vector<16x256xf32>
    %c0_91 = arith.constant 0 : index
    %c112_92 = arith.constant 112 : index
    %137 = vector.load %arg9[%c0_91, %c112_92] : memref<32x512xf32, #tpu.memory_space<vmem>>, vector<32x256xf32>
    %c1_93 = arith.constant 1 : index
    %c1_94 = arith.constant 1 : index
    %c0_95 = arith.constant 0 : index
    %c0_96 = arith.constant 0 : index
    %138 = vector.load %arg4[%c1_93, %c1_94, %c0_95, %c0_96] : memref<3x9x16x16xf32, #tpu.memory_space<vmem>>, vector<1x1x16x16xf32>
    %139 = vector.shape_cast %138 : vector<1x1x16x16xf32> to vector<16x16xf32>
    %140 = vector.extract_strided_slice %137 {offsets = [0, 0], sizes = [16, 256], strides = [1, 1]} : vector<32x256xf32> to vector<16x256xf32>
    %cst_97 = arith.constant dense<0.000000e+00> : vector<16x256xf32>
    %141 = tpu.matmul %139, %140, %cst_97 {dimension_numbers = #tpu.dot_dimension_numbers<[1], [0], [0], [1], [0, 0, 1, 1], [], []>} : vector<16x16xf32>, vector<16x256xf32>, vector<16x256xf32> -> vector<16x256xf32>
    %142 = arith.addf %134, %141 : vector<16x256xf32>
    %143 = vector.extract_strided_slice %137 {offsets = [16, 0], sizes = [16, 256], strides = [1, 1]} : vector<32x256xf32> to vector<16x256xf32>
    %cst_98 = arith.constant dense<0.000000e+00> : vector<16x256xf32>
    %144 = tpu.matmul %139, %143, %cst_98 {dimension_numbers = #tpu.dot_dimension_numbers<[1], [0], [0], [1], [0, 0, 1, 1], [], []>} : vector<16x16xf32>, vector<16x256xf32>, vector<16x256xf32> -> vector<16x256xf32>
    %145 = arith.addf %136, %144 : vector<16x256xf32>
    %c0_99 = arith.constant 0 : index
    %c113_100 = arith.constant 113 : index
    %146 = vector.load %arg9[%c0_99, %c113_100] : memref<32x512xf32, #tpu.memory_space<vmem>>, vector<32x256xf32>
    %cst_101 = arith.constant 0.000000e+00 : f32
    %147 = vector.broadcast %cst_101 : f32 to vector<32x256xf32>
    %148 = arith.select %24, %146, %147 : vector<32x256xi1>, vector<32x256xf32>
    %c1_102 = arith.constant 1 : index
    %c2_103 = arith.constant 2 : index
    %c0_104 = arith.constant 0 : index
    %c0_105 = arith.constant 0 : index
    %149 = vector.load %arg4[%c1_102, %c2_103, %c0_104, %c0_105] : memref<3x9x16x16xf32, #tpu.memory_space<vmem>>, vector<1x1x16x16xf32>
    %150 = vector.shape_cast %149 : vector<1x1x16x16xf32> to vector<16x16xf32>
    %151 = vector.extract_strided_slice %148 {offsets = [0, 0], sizes = [16, 256], strides = [1, 1]} : vector<32x256xf32> to vector<16x256xf32>
    %cst_106 = arith.constant dense<0.000000e+00> : vector<16x256xf32>
    %152 = tpu.matmul %150, %151, %cst_106 {dimension_numbers = #tpu.dot_dimension_numbers<[1], [0], [0], [1], [0, 0, 1, 1], [], []>} : vector<16x16xf32>, vector<16x256xf32>, vector<16x256xf32> -> vector<16x256xf32>
    %153 = arith.addf %142, %152 : vector<16x256xf32>
    %154 = vector.extract_strided_slice %148 {offsets = [16, 0], sizes = [16, 256], strides = [1, 1]} : vector<32x256xf32> to vector<16x256xf32>
    %cst_107 = arith.constant dense<0.000000e+00> : vector<16x256xf32>
    %155 = tpu.matmul %150, %154, %cst_107 {dimension_numbers = #tpu.dot_dimension_numbers<[1], [0], [0], [1], [0, 0, 1, 1], [], []>} : vector<16x16xf32>, vector<16x256xf32>, vector<16x256xf32> -> vector<16x256xf32>
    %156 = arith.addf %145, %155 : vector<16x256xf32>
    %c0_108 = arith.constant 0 : index
    %c127_109 = arith.constant 127 : index
    %157 = vector.load %arg9[%c0_108, %c127_109] : memref<32x512xf32, #tpu.memory_space<vmem>>, vector<32x256xf32>
    %cst_110 = arith.constant 0.000000e+00 : f32
    %158 = vector.broadcast %cst_110 : f32 to vector<32x256xf32>
    %159 = arith.select %22, %157, %158 : vector<32x256xi1>, vector<32x256xf32>
    %c1_111 = arith.constant 1 : index
    %c3_112 = arith.constant 3 : index
    %c0_113 = arith.constant 0 : index
    %c0_114 = arith.constant 0 : index
    %160 = vector.load %arg4[%c1_111, %c3_112, %c0_113, %c0_114] : memref<3x9x16x16xf32, #tpu.memory_space<vmem>>, vector<1x1x16x16xf32>
    %161 = vector.shape_cast %160 : vector<1x1x16x16xf32> to vector<16x16xf32>
    %162 = vector.extract_strided_slice %159 {offsets = [0, 0], sizes = [16, 256], strides = [1, 1]} : vector<32x256xf32> to vector<16x256xf32>
    %cst_115 = arith.constant dense<0.000000e+00> : vector<16x256xf32>
    %163 = tpu.matmul %161, %162, %cst_115 {dimension_numbers = #tpu.dot_dimension_numbers<[1], [0], [0], [1], [0, 0, 1, 1], [], []>} : vector<16x16xf32>, vector<16x256xf32>, vector<16x256xf32> -> vector<16x256xf32>
    %164 = arith.addf %153, %163 : vector<16x256xf32>
    %165 = vector.extract_strided_slice %159 {offsets = [16, 0], sizes = [16, 256], strides = [1, 1]} : vector<32x256xf32> to vector<16x256xf32>
    %cst_116 = arith.constant dense<0.000000e+00> : vector<16x256xf32>
    %166 = tpu.matmul %161, %165, %cst_116 {dimension_numbers = #tpu.dot_dimension_numbers<[1], [0], [0], [1], [0, 0, 1, 1], [], []>} : vector<16x16xf32>, vector<16x256xf32>, vector<16x256xf32> -> vector<16x256xf32>
    %167 = arith.addf %156, %166 : vector<16x256xf32>
    %c0_117 = arith.constant 0 : index
    %c128_118 = arith.constant 128 : index
    %168 = vector.load %arg9[%c0_117, %c128_118] : memref<32x512xf32, #tpu.memory_space<vmem>>, vector<32x256xf32>
    %c1_119 = arith.constant 1 : index
    %c4_120 = arith.constant 4 : index
    %c0_121 = arith.constant 0 : index
    %c0_122 = arith.constant 0 : index
    %169 = vector.load %arg4[%c1_119, %c4_120, %c0_121, %c0_122] : memref<3x9x16x16xf32, #tpu.memory_space<vmem>>, vector<1x1x16x16xf32>
    %170 = vector.shape_cast %169 : vector<1x1x16x16xf32> to vector<16x16xf32>
    %171 = vector.extract_strided_slice %168 {offsets = [0, 0], sizes = [16, 256], strides = [1, 1]} : vector<32x256xf32> to vector<16x256xf32>
    %cst_123 = arith.constant dense<0.000000e+00> : vector<16x256xf32>
    %172 = tpu.matmul %170, %171, %cst_123 {dimension_numbers = #tpu.dot_dimension_numbers<[1], [0], [0], [1], [0, 0, 1, 1], [], []>} : vector<16x16xf32>, vector<16x256xf32>, vector<16x256xf32> -> vector<16x256xf32>
    %173 = arith.addf %164, %172 : vector<16x256xf32>
    %174 = vector.extract_strided_slice %168 {offsets = [16, 0], sizes = [16, 256], strides = [1, 1]} : vector<32x256xf32> to vector<16x256xf32>
    %cst_124 = arith.constant dense<0.000000e+00> : vector<16x256xf32>
    %175 = tpu.matmul %170, %174, %cst_124 {dimension_numbers = #tpu.dot_dimension_numbers<[1], [0], [0], [1], [0, 0, 1, 1], [], []>} : vector<16x16xf32>, vector<16x256xf32>, vector<16x256xf32> -> vector<16x256xf32>
    %176 = arith.addf %167, %175 : vector<16x256xf32>
    %c0_125 = arith.constant 0 : index
    %c129_126 = arith.constant 129 : index
    %177 = vector.load %arg9[%c0_125, %c129_126] : memref<32x512xf32, #tpu.memory_space<vmem>>, vector<32x256xf32>
    %cst_127 = arith.constant 0.000000e+00 : f32
    %178 = vector.broadcast %cst_127 : f32 to vector<32x256xf32>
    %179 = arith.select %24, %177, %178 : vector<32x256xi1>, vector<32x256xf32>
    %c1_128 = arith.constant 1 : index
    %c5_129 = arith.constant 5 : index
    %c0_130 = arith.constant 0 : index
    %c0_131 = arith.constant 0 : index
    %180 = vector.load %arg4[%c1_128, %c5_129, %c0_130, %c0_131] : memref<3x9x16x16xf32, #tpu.memory_space<vmem>>, vector<1x1x16x16xf32>
    %181 = vector.shape_cast %180 : vector<1x1x16x16xf32> to vector<16x16xf32>
    %182 = vector.extract_strided_slice %179 {offsets = [0, 0], sizes = [16, 256], strides = [1, 1]} : vector<32x256xf32> to vector<16x256xf32>
    %cst_132 = arith.constant dense<0.000000e+00> : vector<16x256xf32>
    %183 = tpu.matmul %181, %182, %cst_132 {dimension_numbers = #tpu.dot_dimension_numbers<[1], [0], [0], [1], [0, 0, 1, 1], [], []>} : vector<16x16xf32>, vector<16x256xf32>, vector<16x256xf32> -> vector<16x256xf32>
    %184 = arith.addf %173, %183 : vector<16x256xf32>
    %185 = vector.extract_strided_slice %179 {offsets = [16, 0], sizes = [16, 256], strides = [1, 1]} : vector<32x256xf32> to vector<16x256xf32>
    %cst_133 = arith.constant dense<0.000000e+00> : vector<16x256xf32>
    %186 = tpu.matmul %181, %185, %cst_133 {dimension_numbers = #tpu.dot_dimension_numbers<[1], [0], [0], [1], [0, 0, 1, 1], [], []>} : vector<16x16xf32>, vector<16x256xf32>, vector<16x256xf32> -> vector<16x256xf32>
    %187 = arith.addf %176, %186 : vector<16x256xf32>
    %c0_134 = arith.constant 0 : index
    %c143_135 = arith.constant 143 : index
    %188 = vector.load %arg9[%c0_134, %c143_135] : memref<32x512xf32, #tpu.memory_space<vmem>>, vector<32x256xf32>
    %cst_136 = arith.constant 0.000000e+00 : f32
    %189 = vector.broadcast %cst_136 : f32 to vector<32x256xf32>
    %190 = arith.select %22, %188, %189 : vector<32x256xi1>, vector<32x256xf32>
    %c1_137 = arith.constant 1 : index
    %c6_138 = arith.constant 6 : index
    %c0_139 = arith.constant 0 : index
    %c0_140 = arith.constant 0 : index
    %191 = vector.load %arg4[%c1_137, %c6_138, %c0_139, %c0_140] : memref<3x9x16x16xf32, #tpu.memory_space<vmem>>, vector<1x1x16x16xf32>
    %192 = vector.shape_cast %191 : vector<1x1x16x16xf32> to vector<16x16xf32>
    %193 = vector.extract_strided_slice %190 {offsets = [0, 0], sizes = [16, 256], strides = [1, 1]} : vector<32x256xf32> to vector<16x256xf32>
    %cst_141 = arith.constant dense<0.000000e+00> : vector<16x256xf32>
    %194 = tpu.matmul %192, %193, %cst_141 {dimension_numbers = #tpu.dot_dimension_numbers<[1], [0], [0], [1], [0, 0, 1, 1], [], []>} : vector<16x16xf32>, vector<16x256xf32>, vector<16x256xf32> -> vector<16x256xf32>
    %195 = arith.addf %184, %194 : vector<16x256xf32>
    %196 = vector.extract_strided_slice %190 {offsets = [16, 0], sizes = [16, 256], strides = [1, 1]} : vector<32x256xf32> to vector<16x256xf32>
    %cst_142 = arith.constant dense<0.000000e+00> : vector<16x256xf32>
    %197 = tpu.matmul %192, %196, %cst_142 {dimension_numbers = #tpu.dot_dimension_numbers<[1], [0], [0], [1], [0, 0, 1, 1], [], []>} : vector<16x16xf32>, vector<16x256xf32>, vector<16x256xf32> -> vector<16x256xf32>
    %198 = arith.addf %187, %197 : vector<16x256xf32>
    %c0_143 = arith.constant 0 : index
    %c144_144 = arith.constant 144 : index
    %199 = vector.load %arg9[%c0_143, %c144_144] : memref<32x512xf32, #tpu.memory_space<vmem>>, vector<32x256xf32>
    %c1_145 = arith.constant 1 : index
    %c7_146 = arith.constant 7 : index
    %c0_147 = arith.constant 0 : index
    %c0_148 = arith.constant 0 : index
    %200 = vector.load %arg4[%c1_145, %c7_146, %c0_147, %c0_148] : memref<3x9x16x16xf32, #tpu.memory_space<vmem>>, vector<1x1x16x16xf32>
    %201 = vector.shape_cast %200 : vector<1x1x16x16xf32> to vector<16x16xf32>
    %202 = vector.extract_strided_slice %199 {offsets = [0, 0], sizes = [16, 256], strides = [1, 1]} : vector<32x256xf32> to vector<16x256xf32>
    %cst_149 = arith.constant dense<0.000000e+00> : vector<16x256xf32>
    %203 = tpu.matmul %201, %202, %cst_149 {dimension_numbers = #tpu.dot_dimension_numbers<[1], [0], [0], [1], [0, 0, 1, 1], [], []>} : vector<16x16xf32>, vector<16x256xf32>, vector<16x256xf32> -> vector<16x256xf32>
    %204 = arith.addf %195, %203 : vector<16x256xf32>
    %205 = vector.extract_strided_slice %199 {offsets = [16, 0], sizes = [16, 256], strides = [1, 1]} : vector<32x256xf32> to vector<16x256xf32>
    %cst_150 = arith.constant dense<0.000000e+00> : vector<16x256xf32>
    %206 = tpu.matmul %201, %205, %cst_150 {dimension_numbers = #tpu.dot_dimension_numbers<[1], [0], [0], [1], [0, 0, 1, 1], [], []>} : vector<16x16xf32>, vector<16x256xf32>, vector<16x256xf32> -> vector<16x256xf32>
    %207 = arith.addf %198, %206 : vector<16x256xf32>
    %c0_151 = arith.constant 0 : index
    %c145_152 = arith.constant 145 : index
    %208 = vector.load %arg9[%c0_151, %c145_152] : memref<32x512xf32, #tpu.memory_space<vmem>>, vector<32x256xf32>
    %cst_153 = arith.constant 0.000000e+00 : f32
    %209 = vector.broadcast %cst_153 : f32 to vector<32x256xf32>
    %210 = arith.select %24, %208, %209 : vector<32x256xi1>, vector<32x256xf32>
    %c1_154 = arith.constant 1 : index
    %c8_155 = arith.constant 8 : index
    %c0_156 = arith.constant 0 : index
    %c0_157 = arith.constant 0 : index
    %211 = vector.load %arg4[%c1_154, %c8_155, %c0_156, %c0_157] : memref<3x9x16x16xf32, #tpu.memory_space<vmem>>, vector<1x1x16x16xf32>
    %212 = vector.shape_cast %211 : vector<1x1x16x16xf32> to vector<16x16xf32>
    %213 = vector.extract_strided_slice %210 {offsets = [0, 0], sizes = [16, 256], strides = [1, 1]} : vector<32x256xf32> to vector<16x256xf32>
    %cst_158 = arith.constant dense<0.000000e+00> : vector<16x256xf32>
    %214 = tpu.matmul %212, %213, %cst_158 {dimension_numbers = #tpu.dot_dimension_numbers<[1], [0], [0], [1], [0, 0, 1, 1], [], []>} : vector<16x16xf32>, vector<16x256xf32>, vector<16x256xf32> -> vector<16x256xf32>
    %215 = arith.addf %204, %214 : vector<16x256xf32>
    %216 = vector.extract_strided_slice %210 {offsets = [16, 0], sizes = [16, 256], strides = [1, 1]} : vector<32x256xf32> to vector<16x256xf32>
    %cst_159 = arith.constant dense<0.000000e+00> : vector<16x256xf32>
    %217 = tpu.matmul %212, %216, %cst_159 {dimension_numbers = #tpu.dot_dimension_numbers<[1], [0], [0], [1], [0, 0, 1, 1], [], []>} : vector<16x16xf32>, vector<16x256xf32>, vector<16x256xf32> -> vector<16x256xf32>
    %218 = arith.addf %207, %217 : vector<16x256xf32>
    %c1_160 = arith.constant 1 : index
    %c0_161 = arith.constant 0 : index
    %c0_162 = arith.constant 0 : index
    %219 = vector.load %arg5[%c1_160, %c0_161, %c0_162] : memref<3x16x1xf32, #tpu.memory_space<vmem>>, vector<1x16x1xf32>
    %220 = vector.shape_cast %219 : vector<1x16x1xf32> to vector<16x1xf32>
    %221 = vector.broadcast %220 : vector<16x1xf32> to vector<16x256xf32>
    %222 = arith.addf %215, %221 : vector<16x256xf32>
    %223 = vector.broadcast %220 : vector<16x1xf32> to vector<16x256xf32>
    %224 = arith.addf %218, %223 : vector<16x256xf32>
    %c0_163 = arith.constant 0 : index
    %c0_164 = arith.constant 0 : index
    %225 = vector.load %arg7[%c0_163, %c0_164] : memref<32x256xf32, #tpu.memory_space<vmem>>, vector<16x256xf32>
    tpu.vector_store %arg7[%c0_163, %c0_164], %222 {strides = array<i32>} : memref<32x256xf32, #tpu.memory_space<vmem>>, vector<16x256xf32>,
    %c16_165 = arith.constant 16 : index
    %c0_166 = arith.constant 0 : index
    %226 = vector.load %arg7[%c16_165, %c0_166] : memref<32x256xf32, #tpu.memory_space<vmem>>, vector<16x256xf32>
    tpu.vector_store %arg7[%c16_165, %c0_166], %224 {strides = array<i32>} : memref<32x256xf32, #tpu.memory_space<vmem>>, vector<16x256xf32>,
    %c0_167 = arith.constant 0 : index
    %c0_168 = arith.constant 0 : index
    %227 = vector.load %arg3[%c0_167, %c0_168] : memref<32x256xf32, #tpu.memory_space<vmem>>, vector<32x256xf32>
    %c0_169 = arith.constant 0 : index
    %c128_170 = arith.constant 128 : index
    %228 = vector.load %arg9[%c0_169, %c128_170] : memref<32x512xf32, #tpu.memory_space<vmem>>, vector<32x256xf32>
    tpu.vector_store %arg9[%c0_169, %c128_170], %227 {strides = array<i32>} : memref<32x512xf32, #tpu.memory_space<vmem>>, vector<32x256xf32>,
    %c0_171 = arith.constant 0 : index
    %c111_172 = arith.constant 111 : index
    %229 = vector.load %arg9[%c0_171, %c111_172] : memref<32x512xf32, #tpu.memory_space<vmem>>, vector<32x256xf32>
    %cst_173 = arith.constant 0.000000e+00 : f32
    %230 = vector.broadcast %cst_173 : f32 to vector<32x256xf32>
    %231 = arith.select %22, %229, %230 : vector<32x256xi1>, vector<32x256xf32>
    %c2_174 = arith.constant 2 : index
    %c0_175 = arith.constant 0 : index
    %c0_176 = arith.constant 0 : index
    %c0_177 = arith.constant 0 : index
    %232 = vector.load %arg4[%c2_174, %c0_175, %c0_176, %c0_177] : memref<3x9x16x16xf32, #tpu.memory_space<vmem>>, vector<1x1x16x16xf32>
    %233 = vector.shape_cast %232 : vector<1x1x16x16xf32> to vector<16x16xf32>
    %234 = vector.extract_strided_slice %231 {offsets = [0, 0], sizes = [16, 256], strides = [1, 1]} : vector<32x256xf32> to vector<16x256xf32>
    %cst_178 = arith.constant dense<0.000000e+00> : vector<16x256xf32>
    %235 = tpu.matmul %233, %234, %cst_178 {dimension_numbers = #tpu.dot_dimension_numbers<[1], [0], [0], [1], [0, 0, 1, 1], [], []>} : vector<16x16xf32>, vector<16x256xf32>, vector<16x256xf32> -> vector<16x256xf32>
    %236 = vector.extract_strided_slice %231 {offsets = [16, 0], sizes = [16, 256], strides = [1, 1]} : vector<32x256xf32> to vector<16x256xf32>
    %cst_179 = arith.constant dense<0.000000e+00> : vector<16x256xf32>
    %237 = tpu.matmul %233, %236, %cst_179 {dimension_numbers = #tpu.dot_dimension_numbers<[1], [0], [0], [1], [0, 0, 1, 1], [], []>} : vector<16x16xf32>, vector<16x256xf32>, vector<16x256xf32> -> vector<16x256xf32>
    %c0_180 = arith.constant 0 : index
    %c112_181 = arith.constant 112 : index
    %238 = vector.load %arg9[%c0_180, %c112_181] : memref<32x512xf32, #tpu.memory_space<vmem>>, vector<32x256xf32>
    %c2_182 = arith.constant 2 : index
    %c1_183 = arith.constant 1 : index
    %c0_184 = arith.constant 0 : index
    %c0_185 = arith.constant 0 : index
    %239 = vector.load %arg4[%c2_182, %c1_183, %c0_184, %c0_185] : memref<3x9x16x16xf32, #tpu.memory_space<vmem>>, vector<1x1x16x16xf32>
    %240 = vector.shape_cast %239 : vector<1x1x16x16xf32> to vector<16x16xf32>
    %241 = vector.extract_strided_slice %238 {offsets = [0, 0], sizes = [16, 256], strides = [1, 1]} : vector<32x256xf32> to vector<16x256xf32>
    %cst_186 = arith.constant dense<0.000000e+00> : vector<16x256xf32>
    %242 = tpu.matmul %240, %241, %cst_186 {dimension_numbers = #tpu.dot_dimension_numbers<[1], [0], [0], [1], [0, 0, 1, 1], [], []>} : vector<16x16xf32>, vector<16x256xf32>, vector<16x256xf32> -> vector<16x256xf32>
    %243 = arith.addf %235, %242 : vector<16x256xf32>
    %244 = vector.extract_strided_slice %238 {offsets = [16, 0], sizes = [16, 256], strides = [1, 1]} : vector<32x256xf32> to vector<16x256xf32>
    %cst_187 = arith.constant dense<0.000000e+00> : vector<16x256xf32>
    %245 = tpu.matmul %240, %244, %cst_187 {dimension_numbers = #tpu.dot_dimension_numbers<[1], [0], [0], [1], [0, 0, 1, 1], [], []>} : vector<16x16xf32>, vector<16x256xf32>, vector<16x256xf32> -> vector<16x256xf32>
    %246 = arith.addf %237, %245 : vector<16x256xf32>
    %c0_188 = arith.constant 0 : index
    %c113_189 = arith.constant 113 : index
    %247 = vector.load %arg9[%c0_188, %c113_189] : memref<32x512xf32, #tpu.memory_space<vmem>>, vector<32x256xf32>
    %cst_190 = arith.constant 0.000000e+00 : f32
    %248 = vector.broadcast %cst_190 : f32 to vector<32x256xf32>
    %249 = arith.select %24, %247, %248 : vector<32x256xi1>, vector<32x256xf32>
    %c2_191 = arith.constant 2 : index
    %c2_192 = arith.constant 2 : index
    %c0_193 = arith.constant 0 : index
    %c0_194 = arith.constant 0 : index
    %250 = vector.load %arg4[%c2_191, %c2_192, %c0_193, %c0_194] : memref<3x9x16x16xf32, #tpu.memory_space<vmem>>, vector<1x1x16x16xf32>
    %251 = vector.shape_cast %250 : vector<1x1x16x16xf32> to vector<16x16xf32>
    %252 = vector.extract_strided_slice %249 {offsets = [0, 0], sizes = [16, 256], strides = [1, 1]} : vector<32x256xf32> to vector<16x256xf32>
    %cst_195 = arith.constant dense<0.000000e+00> : vector<16x256xf32>
    %253 = tpu.matmul %251, %252, %cst_195 {dimension_numbers = #tpu.dot_dimension_numbers<[1], [0], [0], [1], [0, 0, 1, 1], [], []>} : vector<16x16xf32>, vector<16x256xf32>, vector<16x256xf32> -> vector<16x256xf32>
    %254 = arith.addf %243, %253 : vector<16x256xf32>
    %255 = vector.extract_strided_slice %249 {offsets = [16, 0], sizes = [16, 256], strides = [1, 1]} : vector<32x256xf32> to vector<16x256xf32>
    %cst_196 = arith.constant dense<0.000000e+00> : vector<16x256xf32>
    %256 = tpu.matmul %251, %255, %cst_196 {dimension_numbers = #tpu.dot_dimension_numbers<[1], [0], [0], [1], [0, 0, 1, 1], [], []>} : vector<16x16xf32>, vector<16x256xf32>, vector<16x256xf32> -> vector<16x256xf32>
    %257 = arith.addf %246, %256 : vector<16x256xf32>
    %c0_197 = arith.constant 0 : index
    %c127_198 = arith.constant 127 : index
    %258 = vector.load %arg9[%c0_197, %c127_198] : memref<32x512xf32, #tpu.memory_space<vmem>>, vector<32x256xf32>
    %cst_199 = arith.constant 0.000000e+00 : f32
    %259 = vector.broadcast %cst_199 : f32 to vector<32x256xf32>
    %260 = arith.select %22, %258, %259 : vector<32x256xi1>, vector<32x256xf32>
    %c2_200 = arith.constant 2 : index
    %c3_201 = arith.constant 3 : index
    %c0_202 = arith.constant 0 : index
    %c0_203 = arith.constant 0 : index
    %261 = vector.load %arg4[%c2_200, %c3_201, %c0_202, %c0_203] : memref<3x9x16x16xf32, #tpu.memory_space<vmem>>, vector<1x1x16x16xf32>
    %262 = vector.shape_cast %261 : vector<1x1x16x16xf32> to vector<16x16xf32>
    %263 = vector.extract_strided_slice %260 {offsets = [0, 0], sizes = [16, 256], strides = [1, 1]} : vector<32x256xf32> to vector<16x256xf32>
    %cst_204 = arith.constant dense<0.000000e+00> : vector<16x256xf32>
    %264 = tpu.matmul %262, %263, %cst_204 {dimension_numbers = #tpu.dot_dimension_numbers<[1], [0], [0], [1], [0, 0, 1, 1], [], []>} : vector<16x16xf32>, vector<16x256xf32>, vector<16x256xf32> -> vector<16x256xf32>
    %265 = arith.addf %254, %264 : vector<16x256xf32>
    %266 = vector.extract_strided_slice %260 {offsets = [16, 0], sizes = [16, 256], strides = [1, 1]} : vector<32x256xf32> to vector<16x256xf32>
    %cst_205 = arith.constant dense<0.000000e+00> : vector<16x256xf32>
    %267 = tpu.matmul %262, %266, %cst_205 {dimension_numbers = #tpu.dot_dimension_numbers<[1], [0], [0], [1], [0, 0, 1, 1], [], []>} : vector<16x16xf32>, vector<16x256xf32>, vector<16x256xf32> -> vector<16x256xf32>
    %268 = arith.addf %257, %267 : vector<16x256xf32>
    %c0_206 = arith.constant 0 : index
    %c128_207 = arith.constant 128 : index
    %269 = vector.load %arg9[%c0_206, %c128_207] : memref<32x512xf32, #tpu.memory_space<vmem>>, vector<32x256xf32>
    %c2_208 = arith.constant 2 : index
    %c4_209 = arith.constant 4 : index
    %c0_210 = arith.constant 0 : index
    %c0_211 = arith.constant 0 : index
    %270 = vector.load %arg4[%c2_208, %c4_209, %c0_210, %c0_211] : memref<3x9x16x16xf32, #tpu.memory_space<vmem>>, vector<1x1x16x16xf32>
    %271 = vector.shape_cast %270 : vector<1x1x16x16xf32> to vector<16x16xf32>
    %272 = vector.extract_strided_slice %269 {offsets = [0, 0], sizes = [16, 256], strides = [1, 1]} : vector<32x256xf32> to vector<16x256xf32>
    %cst_212 = arith.constant dense<0.000000e+00> : vector<16x256xf32>
    %273 = tpu.matmul %271, %272, %cst_212 {dimension_numbers = #tpu.dot_dimension_numbers<[1], [0], [0], [1], [0, 0, 1, 1], [], []>} : vector<16x16xf32>, vector<16x256xf32>, vector<16x256xf32> -> vector<16x256xf32>
    %274 = arith.addf %265, %273 : vector<16x256xf32>
    %275 = vector.extract_strided_slice %269 {offsets = [16, 0], sizes = [16, 256], strides = [1, 1]} : vector<32x256xf32> to vector<16x256xf32>
    %cst_213 = arith.constant dense<0.000000e+00> : vector<16x256xf32>
    %276 = tpu.matmul %271, %275, %cst_213 {dimension_numbers = #tpu.dot_dimension_numbers<[1], [0], [0], [1], [0, 0, 1, 1], [], []>} : vector<16x16xf32>, vector<16x256xf32>, vector<16x256xf32> -> vector<16x256xf32>
    %277 = arith.addf %268, %276 : vector<16x256xf32>
    %c0_214 = arith.constant 0 : index
    %c129_215 = arith.constant 129 : index
    %278 = vector.load %arg9[%c0_214, %c129_215] : memref<32x512xf32, #tpu.memory_space<vmem>>, vector<32x256xf32>
    %cst_216 = arith.constant 0.000000e+00 : f32
    %279 = vector.broadcast %cst_216 : f32 to vector<32x256xf32>
    %280 = arith.select %24, %278, %279 : vector<32x256xi1>, vector<32x256xf32>
    %c2_217 = arith.constant 2 : index
    %c5_218 = arith.constant 5 : index
    %c0_219 = arith.constant 0 : index
    %c0_220 = arith.constant 0 : index
    %281 = vector.load %arg4[%c2_217, %c5_218, %c0_219, %c0_220] : memref<3x9x16x16xf32, #tpu.memory_space<vmem>>, vector<1x1x16x16xf32>
    %282 = vector.shape_cast %281 : vector<1x1x16x16xf32> to vector<16x16xf32>
    %283 = vector.extract_strided_slice %280 {offsets = [0, 0], sizes = [16, 256], strides = [1, 1]} : vector<32x256xf32> to vector<16x256xf32>
    %cst_221 = arith.constant dense<0.000000e+00> : vector<16x256xf32>
    %284 = tpu.matmul %282, %283, %cst_221 {dimension_numbers = #tpu.dot_dimension_numbers<[1], [0], [0], [1], [0, 0, 1, 1], [], []>} : vector<16x16xf32>, vector<16x256xf32>, vector<16x256xf32> -> vector<16x256xf32>
    %285 = arith.addf %274, %284 : vector<16x256xf32>
    %286 = vector.extract_strided_slice %280 {offsets = [16, 0], sizes = [16, 256], strides = [1, 1]} : vector<32x256xf32> to vector<16x256xf32>
    %cst_222 = arith.constant dense<0.000000e+00> : vector<16x256xf32>
    %287 = tpu.matmul %282, %286, %cst_222 {dimension_numbers = #tpu.dot_dimension_numbers<[1], [0], [0], [1], [0, 0, 1, 1], [], []>} : vector<16x16xf32>, vector<16x256xf32>, vector<16x256xf32> -> vector<16x256xf32>
    %288 = arith.addf %277, %287 : vector<16x256xf32>
    %c0_223 = arith.constant 0 : index
    %c143_224 = arith.constant 143 : index
    %289 = vector.load %arg9[%c0_223, %c143_224] : memref<32x512xf32, #tpu.memory_space<vmem>>, vector<32x256xf32>
    %cst_225 = arith.constant 0.000000e+00 : f32
    %290 = vector.broadcast %cst_225 : f32 to vector<32x256xf32>
    %291 = arith.select %22, %289, %290 : vector<32x256xi1>, vector<32x256xf32>
    %c2_226 = arith.constant 2 : index
    %c6_227 = arith.constant 6 : index
    %c0_228 = arith.constant 0 : index
    %c0_229 = arith.constant 0 : index
    %292 = vector.load %arg4[%c2_226, %c6_227, %c0_228, %c0_229] : memref<3x9x16x16xf32, #tpu.memory_space<vmem>>, vector<1x1x16x16xf32>
    %293 = vector.shape_cast %292 : vector<1x1x16x16xf32> to vector<16x16xf32>
    %294 = vector.extract_strided_slice %291 {offsets = [0, 0], sizes = [16, 256], strides = [1, 1]} : vector<32x256xf32> to vector<16x256xf32>
    %cst_230 = arith.constant dense<0.000000e+00> : vector<16x256xf32>
    %295 = tpu.matmul %293, %294, %cst_230 {dimension_numbers = #tpu.dot_dimension_numbers<[1], [0], [0], [1], [0, 0, 1, 1], [], []>} : vector<16x16xf32>, vector<16x256xf32>, vector<16x256xf32> -> vector<16x256xf32>
    %296 = arith.addf %285, %295 : vector<16x256xf32>
    %297 = vector.extract_strided_slice %291 {offsets = [16, 0], sizes = [16, 256], strides = [1, 1]} : vector<32x256xf32> to vector<16x256xf32>
    %cst_231 = arith.constant dense<0.000000e+00> : vector<16x256xf32>
    %298 = tpu.matmul %293, %297, %cst_231 {dimension_numbers = #tpu.dot_dimension_numbers<[1], [0], [0], [1], [0, 0, 1, 1], [], []>} : vector<16x16xf32>, vector<16x256xf32>, vector<16x256xf32> -> vector<16x256xf32>
    %299 = arith.addf %288, %298 : vector<16x256xf32>
    %c0_232 = arith.constant 0 : index
    %c144_233 = arith.constant 144 : index
    %300 = vector.load %arg9[%c0_232, %c144_233] : memref<32x512xf32, #tpu.memory_space<vmem>>, vector<32x256xf32>
    %c2_234 = arith.constant 2 : index
    %c7_235 = arith.constant 7 : index
    %c0_236 = arith.constant 0 : index
    %c0_237 = arith.constant 0 : index
    %301 = vector.load %arg4[%c2_234, %c7_235, %c0_236, %c0_237] : memref<3x9x16x16xf32, #tpu.memory_space<vmem>>, vector<1x1x16x16xf32>
    %302 = vector.shape_cast %301 : vector<1x1x16x16xf32> to vector<16x16xf32>
    %303 = vector.extract_strided_slice %300 {offsets = [0, 0], sizes = [16, 256], strides = [1, 1]} : vector<32x256xf32> to vector<16x256xf32>
    %cst_238 = arith.constant dense<0.000000e+00> : vector<16x256xf32>
    %304 = tpu.matmul %302, %303, %cst_238 {dimension_numbers = #tpu.dot_dimension_numbers<[1], [0], [0], [1], [0, 0, 1, 1], [], []>} : vector<16x16xf32>, vector<16x256xf32>, vector<16x256xf32> -> vector<16x256xf32>
    %305 = arith.addf %296, %304 : vector<16x256xf32>
    %306 = vector.extract_strided_slice %300 {offsets = [16, 0], sizes = [16, 256], strides = [1, 1]} : vector<32x256xf32> to vector<16x256xf32>
    %cst_239 = arith.constant dense<0.000000e+00> : vector<16x256xf32>
    %307 = tpu.matmul %302, %306, %cst_239 {dimension_numbers = #tpu.dot_dimension_numbers<[1], [0], [0], [1], [0, 0, 1, 1], [], []>} : vector<16x16xf32>, vector<16x256xf32>, vector<16x256xf32> -> vector<16x256xf32>
    %308 = arith.addf %299, %307 : vector<16x256xf32>
    %c0_240 = arith.constant 0 : index
    %c145_241 = arith.constant 145 : index
    %309 = vector.load %arg9[%c0_240, %c145_241] : memref<32x512xf32, #tpu.memory_space<vmem>>, vector<32x256xf32>
    %cst_242 = arith.constant 0.000000e+00 : f32
    %310 = vector.broadcast %cst_242 : f32 to vector<32x256xf32>
    %311 = arith.select %24, %309, %310 : vector<32x256xi1>, vector<32x256xf32>
    %c2_243 = arith.constant 2 : index
    %c8_244 = arith.constant 8 : index
    %c0_245 = arith.constant 0 : index
    %c0_246 = arith.constant 0 : index
    %312 = vector.load %arg4[%c2_243, %c8_244, %c0_245, %c0_246] : memref<3x9x16x16xf32, #tpu.memory_space<vmem>>, vector<1x1x16x16xf32>
    %313 = vector.shape_cast %312 : vector<1x1x16x16xf32> to vector<16x16xf32>
    %314 = vector.extract_strided_slice %311 {offsets = [0, 0], sizes = [16, 256], strides = [1, 1]} : vector<32x256xf32> to vector<16x256xf32>
    %cst_247 = arith.constant dense<0.000000e+00> : vector<16x256xf32>
    %315 = tpu.matmul %313, %314, %cst_247 {dimension_numbers = #tpu.dot_dimension_numbers<[1], [0], [0], [1], [0, 0, 1, 1], [], []>} : vector<16x16xf32>, vector<16x256xf32>, vector<16x256xf32> -> vector<16x256xf32>
    %316 = arith.addf %305, %315 : vector<16x256xf32>
    %317 = vector.extract_strided_slice %311 {offsets = [16, 0], sizes = [16, 256], strides = [1, 1]} : vector<32x256xf32> to vector<16x256xf32>
    %cst_248 = arith.constant dense<0.000000e+00> : vector<16x256xf32>
    %318 = tpu.matmul %313, %317, %cst_248 {dimension_numbers = #tpu.dot_dimension_numbers<[1], [0], [0], [1], [0, 0, 1, 1], [], []>} : vector<16x16xf32>, vector<16x256xf32>, vector<16x256xf32> -> vector<16x256xf32>
    %319 = arith.addf %308, %318 : vector<16x256xf32>
    %c2_249 = arith.constant 2 : index
    %c0_250 = arith.constant 0 : index
    %c0_251 = arith.constant 0 : index
    %320 = vector.load %arg5[%c2_249, %c0_250, %c0_251] : memref<3x16x1xf32, #tpu.memory_space<vmem>>, vector<1x16x1xf32>
    %321 = vector.shape_cast %320 : vector<1x16x1xf32> to vector<16x1xf32>
    %322 = vector.broadcast %321 : vector<16x1xf32> to vector<16x256xf32>
    %323 = arith.addf %316, %322 : vector<16x256xf32>
    %324 = vector.broadcast %321 : vector<16x1xf32> to vector<16x256xf32>
    %325 = arith.addf %319, %324 : vector<16x256xf32>
    %c0_252 = arith.constant 0 : index
    %c0_253 = arith.constant 0 : index
    %326 = vector.load %arg8[%c0_252, %c0_253] : memref<32x256xf32, #tpu.memory_space<vmem>>, vector<16x256xf32>
    tpu.vector_store %arg8[%c0_252, %c0_253], %323 {strides = array<i32>} : memref<32x256xf32, #tpu.memory_space<vmem>>, vector<16x256xf32>,
    %c16_254 = arith.constant 16 : index
    %c0_255 = arith.constant 0 : index
    %327 = vector.load %arg8[%c16_254, %c0_255] : memref<32x256xf32, #tpu.memory_space<vmem>>, vector<16x256xf32>
    tpu.vector_store %arg8[%c16_254, %c0_255], %325 {strides = array<i32>} : memref<32x256xf32, #tpu.memory_space<vmem>>, vector<16x256xf32>,
    return
  }
  func.func @transform_0(%arg0: i32) -> (i32, i32) {
    %c0_i32 = arith.constant 0 : i32
    %c0_i32_0 = arith.constant 0 : i32
    %c0_i32_1 = arith.constant 0 : i32
    return %c0_i32, %c0_i32_0 : i32, i32
  }
  func.func @transform_1(%arg0: i32) -> (i32, i32) {
    %c0_i32 = arith.constant 0 : i32
    %c0_i32_0 = arith.constant 0 : i32
    %c0_i32_1 = arith.constant 0 : i32
    return %c0_i32, %c0_i32_0 : i32, i32
  }
  func.func @transform_2(%arg0: i32) -> (i32, i32) {
    %c0_i32 = arith.constant 0 : i32
    %c0_i32_0 = arith.constant 0 : i32
    %c0_i32_1 = arith.constant 0 : i32
    return %c0_i32, %c0_i32_0 : i32, i32
  }
  func.func @transform_3(%arg0: i32) -> (i32, i32, i32, i32) {
    %c0_i32 = arith.constant 0 : i32
    %c0_i32_0 = arith.constant 0 : i32
    %c0_i32_1 = arith.constant 0 : i32
    %c0_i32_2 = arith.constant 0 : i32
    %c0_i32_3 = arith.constant 0 : i32
    return %c0_i32, %c0_i32_0, %c0_i32_1, %c0_i32_2 : i32, i32, i32, i32
  }
  func.func @transform_4(%arg0: i32) -> (i32, i32, i32) {
    %c0_i32 = arith.constant 0 : i32
    %c0_i32_0 = arith.constant 0 : i32
    %c0_i32_1 = arith.constant 0 : i32
    %c0_i32_2 = arith.constant 0 : i32
    return %c0_i32, %c0_i32_0, %c0_i32_1 : i32, i32, i32
  }
  func.func @transform_5(%arg0: i32) -> (i32, i32) {
    %c0_i32 = arith.constant 0 : i32
    %c0_i32_0 = arith.constant 0 : i32
    %c0_i32_1 = arith.constant 0 : i32
    return %c0_i32, %c0_i32_0 : i32, i32
  }
  func.func @transform_6(%arg0: i32) -> (i32, i32) {
    %c0_i32 = arith.constant 0 : i32
    %c0_i32_0 = arith.constant 0 : i32
    %c0_i32_1 = arith.constant 0 : i32
    return %c0_i32, %c0_i32_0 : i32, i32
  }
  func.func @transform_7(%arg0: i32) -> (i32, i32) {
    %c0_i32 = arith.constant 0 : i32
    %c0_i32_0 = arith.constant 0 : i32
    %c0_i32_1 = arith.constant 0 : i32
    return %c0_i32, %c0_i32_0 : i32, i32
  }
}

</mosaic_0001>

<bundles_post_ra>
// kernel: _forward_parallel.1
= control target key start
LH: loop header
LB: loop body
LE: loop exit
PB: predicated region body
PF: predicated region fallthrough
CT: control target
= control target key end

     0   :  { %v7568_v3 = vmov 0.0   ;;  %s7569_s11 = smov 17   ;;  %s7571_s18 = smov 15   ;;  %v31_v43 = vlaneseq  ;;  %vm126_vm0 = vcmask 138240   ;;  %vm168_vm1 = vcmask 130048   ;;  %s9032_s0 = inlined_call_operand.vmem [shape: f32[32,256], index: 0, kind: input, shape index: {}]   ;;  %s9033_s1 = inlined_call_operand.vmem [shape: f32[32,256], index: 1, kind: input, shape index: {}]   ;;  %s9034_s3 = inlined_call_operand.vmem [shape: f32[3,9,16,16], index: 3, kind: input, shape index: {}]   ;;  %s9035_s2 = inlined_call_operand.vmem [shape: f32[32,256], index: 2, kind: input, shape index: {}]   ;;  %s9036_s4 = inlined_call_operand.vmem [shape: f32[3,16,1], index: 4, kind: input, shape index: {}]   ;;  %s9037_s5 = inlined_call_operand.vmem [shape: f32[32,256], index: 5, kind: output, shape index: {0}]   ;;  %s9038_s6 = inlined_call_operand.vmem [shape: f32[32,256], index: 6, kind: output, shape index: {1}]   ;;  %s9039_s7 = inlined_call_operand.vmem [shape: f32[32,256], index: 7, kind: output, shape index: {2}]  }
   0x1   :  { %v7621_v0 = vld [vmem:[%s9032_s0 + $0x10] sm:$0xff]  ;;  %v7626_v1 = vld [vmem:[%s9032_s0 + $0x18] sm:$0xff]  ;;  %v7631_v2 = vld [vmem:[%s9032_s0] sm:$0xff]  ;;  %247 = vmatprep.mubr.f32.mxu0 %v7568_v3  ;;  %427 = vmatprep.mubr.f32.mxu1 %v7568_v3  ;;  %s7572_s19 = smov 1   ;;  %s7573_s20 = smov 127   ;;  %vm541_vm6 = vcmask 121856  }
   0x2   :  { %v6840_v4 = vpack.i.bf16 %v7626_v1, %v7621_v0  ;;  %v6830_v5 = vpack.i.bf16 %v7631_v2, %v7568_v3  ;;  %v7641_v6 = vld [vmem:[%s9032_s0 + $0x20] sm:$0xff]  ;;  %v7646_v7 = vld [vmem:[%s9032_s0 + $0x8] sm:$0xff]  ;;  %v7658_v10 = vld [vmem:[%s9032_s0 + $0x30] sm:$0xff]  ;;  %v6386_v19 = vpack.c.bf16 %v7621_v0, %v7631_v2  ;;  %v6955_v20 = vpack.i.bf16 %v7621_v0, %v7568_v3  ;;  %s7574_s21 = smov 113   ;;  %s7575_s22 = smov 112  }
   0x3   :  { %v6845_v8 = vpack.i.bf16 %v7641_v6, %v7568_v3  ;;  %v6835_v9 = vpack.i.bf16 %v7568_v3, %v7646_v7  ;;  %v7663_v11 = vld [vmem:[%s9032_s0 + $0x38] sm:$0xff]  ;;  %v7668_v12 = vld [vmem:[%s9032_s0 + $0x28] sm:$0xff]  ;;  %v7010_v15 = vpack.i.bf16 %v7646_v7, %v7631_v2  ;;  %v7065_v17 = vpack.i.bf16 %v7658_v10, %v7641_v6  ;;  %s7570_s0 = smov 16   ;;  %s7576_s23 = smov 111   ;;  %v7749_v29 = vld [vmem:[%s9033_s1 + $0x10] sm:$0xff] }
   0x4   :  { %6841 = vrot.lane.b32.xlu1 %v6840_v4, %s7569_s11  ;;  %6831 = vrot.lane.b32.xlu0 %v6830_v5, %s7569_s11  ;;  %v6855_v13 = vpack.i.bf16 %v7663_v11, %v7658_v10  ;;  %v6850_v14 = vpack.i.bf16 %v7568_v3, %v7668_v12  ;;  %v7025_v16 = vpack.i.bf16 %v7668_v12, %v7641_v6  ;;  %v7754_v30 = vld [vmem:[%s9033_s1 + $0x18] sm:$0xff]  ;;  %v7759_v31 = vld [vmem:[%s9033_s1] sm:$0xff]  ;;  %v7829_v46 = vand.u32 127, %v31_v43 }
   0x5   :  { %v6384_v18 = vpack.c.bf16 %v7626_v1, %v7646_v7  ;;  %v6388_v21 = vpack.c.bf16 %v7663_v11, %v7668_v12  ;;  %v6390_v22 = vpack.c.bf16 %v7658_v10, %v7641_v6  ;;  %v6960_v23 = vpack.i.bf16 %v7568_v3, %v7626_v1  ;;  %v7764_v32 = vld [vmem:[%s9033_s1 + $0x8] sm:$0xff]  ;;  %v7778_v35 = vld [vmem:[%s9033_s1 + $0x30] sm:$0xff]  ;;  %v7783_v36 = vld [vmem:[%s9033_s1 + $0x38] sm:$0xff] }
   0x6   :  { %v6975_v24 = vpack.i.bf16 %v7568_v3, %v7663_v11  ;;  %v6970_v25 = vpack.i.bf16 %v7658_v10, %v7568_v3  ;;  %v7045_v26 = vpack.i.bf16 %v7626_v1, %v7568_v3  ;;  %v7055_v27 = vpack.i.bf16 %v7663_v11, %v7568_v3  ;;  %v7788_v37 = vld [vmem:[%s9033_s1 + $0x20] sm:$0xff]  ;;  %v7793_v38 = vld [vmem:[%s9033_s1 + $0x28] sm:$0xff] }
   0x7   :  { %v7050_v28 = vpack.i.bf16 %v7668_v12, %v7568_v3  ;;  %v7075_v33 = vpack.i.bf16 %v7754_v30, %v7749_v29  ;;  %v7070_v34 = vpack.i.bf16 %v7764_v32, %v7759_v31  ;;  %v7799_v39 = vpack.i.bf16 %v7783_v36, %v7778_v35  ;;  %v6078_v1 = vld [vmem:[%s9034_s3 + $0x40] sm:$0xff] }
   0x8   :  { %6846 = vrot.lane.b32.xlu1 %v6845_v8, %s7569_s11  ;;  %6836 = vrot.lane.b32.xlu0 %v6835_v9, %s7569_s11  ;;  %v7803_v40 = vpack.i.bf16 %v7793_v38, %v7788_v37  ;;  %v7838_v49 = vadd.s32 128, %v7829_v46  ;;  %v38_v50 = vand.u32 15, %v7829_v46  ;;  %vm761_vm11 = vcmask 7168  }
   0x9   :  { %vm1176_vm12 = vcmask 1039360   ;;  %vm1396_vm13 = vcmask 924672   ;;  %vm1607_vm14 = vcmask 916480   ;;  %vm1828_vm15 = vcmask 908288  }
   0xa   :  { %v45_v55 = vand.u32 15, %v7838_v49  ;;  %vm7854_vm2 = vcmp.ge.s32.totalorder %v38_v50, 1  ;;  %v7951_v49 = vpack.i.bf16 %v7568_v3, %v7793_v38  ;;  %vm7955_vm8 = vcmp.le.s32.totalorder %v38_v50, 14 }
   0xb   :  { %vm7907_vm5 = vmpackc.low %vm7854_vm2, %vm7854_vm2 }
   0xc   :  { %6856 = vrot.lane.b32.xlu1 %v6855_v13, %s7569_s11  ;;  %6851 = vrot.lane.b32.xlu0 %v6850_v14, %s7569_s11  ;;  %vm7863_vm3 = vcmp.ge.s32.totalorder %v45_v55, 1  ;;  %vm7936_vm7 = vcmp.le.s32.totalorder %v45_v55, 14  ;;  %vm7981_vm10 = vmpackc.low %vm7955_vm8, %vm7955_vm8 }
   0xd   :  { %vm7887_vm4 = vmpackc.low %vm7863_vm3, %vm7863_vm3 }
   0xe   :  { %vm7970_vm9 = vmpackc.low %vm7936_vm7, %vm7936_vm7 }
  0x10   :  { %6866 = vrot.lane.b32.xlu1 %v6835_v9, %s7570_s0  ;;  %6861 = vrot.lane.b32.xlu0 %v6830_v5, %s7570_s0 }
  0x14   :  { %6876 = vrot.lane.b32.xlu1 %v6845_v8, %s7570_s0  ;;  %6871 = vrot.lane.b32.xlu0 %v6840_v4, %s7570_s0 }
  0x18   :  { %6886 = vrot.lane.b32.xlu1 %v6855_v13, %s7570_s0  ;;  %6881 = vrot.lane.b32.xlu0 %v6850_v14, %s7570_s0 }
  0x1c   :  { %6896 = vrot.lane.b32.xlu1 %v6835_v9, %s7571_s18  ;;  %6891 = vrot.lane.b32.xlu0 %v6830_v5, %s7571_s18 }
  0x20   :  { %6906 = vrot.lane.b32.xlu1 %v6845_v8, %s7571_s18  ;;  %6901 = vrot.lane.b32.xlu0 %v6840_v4, %s7571_s18 }
  0x24   :  { %6916 = vrot.lane.b32.xlu1 %v6855_v13, %s7571_s18  ;;  %6911 = vrot.lane.b32.xlu0 %v6850_v14, %s7571_s18 }
  0x28   :  { %6926 = vrot.lane.b32.xlu1 %v6835_v9, %s7572_s19  ;;  %6921 = vrot.lane.b32.xlu0 %v6830_v5, %s7572_s19 }
  0x2c   :  { %6936 = vrot.lane.b32.xlu1 %v6845_v8, %s7572_s19  ;;  %6931 = vrot.lane.b32.xlu0 %v6840_v4, %s7572_s19 }
  0x30   :  { %6946 = vrot.lane.b32.xlu1 %v6855_v13, %s7572_s19  ;;  %6941 = vrot.lane.b32.xlu0 %v6850_v14, %s7572_s19 }
  0x34   :  { %6956 = vrot.lane.b32.xlu1 %v6955_v20, %s7573_s20  ;;  %6951 = vrot.lane.b32.xlu0 %v7010_v15, %s7573_s20 }
  0x38   :  { %6966 = vrot.lane.b32.xlu1 %v7025_v16, %s7573_s20  ;;  %6961 = vrot.lane.b32.xlu0 %v6960_v23, %s7573_s20 }
  0x3c   :  { %6976 = vrot.lane.b32.xlu1 %v6975_v24, %s7573_s20  ;;  %6971 = vrot.lane.b32.xlu0 %v6970_v25, %s7573_s20 }
  0x40   :  { %6986 = vrot.lane.b32.xlu1 %v6955_v20, %s7574_s21  ;;  %6981 = vrot.lane.b32.xlu0 %v7010_v15, %s7574_s21 }
  0x44   :  { %6996 = vrot.lane.b32.xlu1 %v7025_v16, %s7574_s21  ;;  %6991 = vrot.lane.b32.xlu0 %v6960_v23, %s7574_s21 }
  0x48   :  { %7006 = vrot.lane.b32.xlu1 %v6975_v24, %s7574_s21  ;;  %7001 = vrot.lane.b32.xlu0 %v6970_v25, %s7574_s21 }
  0x4c   :  { %7016 = vrot.lane.b32.xlu1 %v6955_v20, %s7575_s22  ;;  %7011 = vrot.lane.b32.xlu0 %v7010_v15, %s7575_s22 }
  0x50   :  { %7026 = vrot.lane.b32.xlu1 %v7025_v16, %s7575_s22  ;;  %7021 = vrot.lane.b32.xlu0 %v6960_v23, %s7575_s22 }
  0x54   :  { %7036 = vrot.lane.b32.xlu1 %v6975_v24, %s7575_s22  ;;  %7031 = vrot.lane.b32.xlu0 %v6970_v25, %s7575_s22 }
  0x58   :  { %7046 = vrot.lane.b32.xlu1 %v7045_v26, %s7576_s23  ;;  %7041 = vrot.lane.b32.xlu0 %v7010_v15, %s7576_s23 }
  0x5c   :  { %7056 = vrot.lane.b32.xlu1 %v7055_v27, %s7576_s23  ;;  %7051 = vrot.lane.b32.xlu0 %v7050_v28, %s7576_s23 }
  0x60   :  { %7066 = vrot.lane.b32.xlu1 %v7065_v17, %s7576_s23  ;;  %7061 = vrot.lane.b32.xlu0 %v6955_v20, %s7576_s23 }
  0x64   :  { %7076 = vrot.lane.b32.xlu1 %v7075_v33, %s7570_s0  ;;  %7071 = vrot.lane.b32.xlu0 %v7070_v34, %s7570_s0 }
  0x68   :  { %7086 = vrot.lane.b32.xlu1 %v7799_v39, %s7570_s0  ;;  %7081 = vrot.lane.b32.xlu0 %v7803_v40, %s7570_s0 }
  0x6c   :  { %7096 = vrot.lane.b32.xlu1 %v7568_v3, %s7570_s0  ;;  %7091 = vrot.lane.b32.xlu0 %v7568_v3, %s7570_s0 }
  0x70   :  { %7106 = vrot.lane.b32.xlu1 %v7075_v33, %s7569_s11  ;;  %7101 = vrot.lane.b32.xlu0 %v7070_v34, %s7569_s11 }
  0x74   :  { %7116 = vrot.lane.b32.xlu1 %v7799_v39, %s7569_s11  ;;  %7111 = vrot.lane.b32.xlu0 %v7803_v40, %s7569_s11 }
  0x76   :  { %v7819_v41 = vpop.permute.xlu1 %6841  ;;  %v7821_v42 = vpop.permute.xlu0 %6831 }
  0x77   :  { %v6844_v51 = vunpack.i.h.bf16 %v7819_v41  ;;  %v6843_v52 = vunpack.i.l.bf16 %v7819_v41  ;;  %v6834_v62 = vunpack.i.h.bf16 %v7821_v42  ;;  %v6833_v63 = vunpack.i.l.bf16 %v7821_v42 }
  0x78   :  { %7126 = vrot.lane.b32.xlu1 %v7568_v3, %s7569_s11  ;;  %7121 = vrot.lane.b32.xlu0 %v7568_v3, %s7569_s11 }
  0x79   :  { %v130_v61 = vsel %vm126_vm0, %v6843_v52, %v6844_v51 }
  0x7a   :  { %v7827_v44 = vpop.permute.xlu1 %6846  ;;  %v6837_v45 = vpop.permute.xlu0 %6836 }
  0x7b   :  { %v6838_v56 = vunpack.i.l.bf16 %v6837_v45  ;;  %v6839_v9 = vunpack.i.h.bf16 %v6837_v45 }
  0x7c   :  { %7136 = vrot.lane.b32.xlu1 %v7075_v33, %s7571_s18  ;;  %7131 = vrot.lane.b32.xlu0 %v7070_v34, %s7571_s18 }
  0x7d   :  { %v128_v16 = vsel %vm126_vm0, %v6834_v62, %v6838_v56  ;;  %v6849_v56 = vunpack.i.h.bf16 %v7827_v44 }
  0x7e   :  { %v7833_v47 = vpop.permute.xlu1 %6856  ;;  %v7835_v48 = vpop.permute.xlu0 %6851 }
  0x7f   :  { %v6859_v17 = vunpack.i.h.bf16 %v7833_v47  ;;  %v6858_v28 = vunpack.i.l.bf16 %v7833_v47  ;;  %v6853_v41 = vunpack.i.l.bf16 %v7835_v48  ;;  %v6344_v47 = vpack.c.bf16 %v130_v61, %v128_v16 }
  0x80   :  { %7146 = vrot.lane.b32.xlu1 %v7799_v39, %s7571_s18  ;;  %7141 = vrot.lane.b32.xlu0 %v7803_v40, %s7571_s18  ;;  %v6848_v16 = vunpack.i.l.bf16 %v7827_v44  ;;  %v7921_v44 = vpack.i.bf16 %v7568_v3, %v7764_v32  ;;  %v7932_v32 = vpack.i.bf16 %v7568_v3, %v7783_v36 }
  0x82   :  { %v6867_v53 = vpop.permute.xlu1 %6866  ;;  %v6862_v54 = vpop.permute.xlu0 %6861 }
  0x83   :  { %v6868_v57 = vunpack.i.l.bf16 %v6867_v53  ;;  %v6864_v58 = vunpack.i.h.bf16 %v6862_v54  ;;  %v6863_v59 = vunpack.i.l.bf16 %v6862_v54  ;;  %v6869_v13 = vunpack.i.h.bf16 %v6867_v53 }
  0x84   :  { %7156 = vrot.lane.b32.xlu1 %v7568_v3, %s7571_s18  ;;  %7151 = vrot.lane.b32.xlu0 %v7568_v3, %s7571_s18 }
  0x85   :  { %v170_v20 = vsel %vm168_vm1, %v6864_v58, %v6868_v57  ;;  %v169_v23 = vsel %vm168_vm1, %v6863_v59, %v6864_v58  ;;  %v129_v57 = vsel %vm126_vm0, %v6839_v9, %v6843_v52  ;;  %v6854_v58 = vunpack.i.h.bf16 %v7835_v48  ;;  %v6304_v59 = vld [vmem:[%s9034_s3 + $0x180] sm:$0xff] }
  0x86   :  { %v6877_v4 = vpop.permute.xlu1 %6876  ;;  %v6872_v5 = vpop.permute.xlu0 %6871 }
  0x87   :  { %v6874_v14 = vunpack.i.h.bf16 %v6872_v5  ;;  %v6873_v15 = vunpack.i.l.bf16 %v6872_v5  ;;  %v6879_v24 = vunpack.i.h.bf16 %v6877_v4  ;;  %v6878_v25 = vunpack.i.l.bf16 %v6877_v4 }
  0x88   :  { %7166 = vrot.lane.b32.xlu1 %v7075_v33, %s7572_s19  ;;  %7161 = vrot.lane.b32.xlu0 %v7070_v34, %s7572_s19  ;;  %v134_v5 = vsel %vm126_vm0, %v6858_v28, %v6859_v17  ;;  %v133_v60 = vsel %vm126_vm0, %v6854_v58, %v6858_v28  ;;  %v6305_v17 = vld [vmem:[%s9034_s3 + $0x188] sm:$0xff] }
  0x89   :  { %v172_v26 = vsel %vm168_vm1, %v6873_v15, %v6874_v14  ;;  %v171_v27 = vsel %vm168_vm1, %v6869_v13, %v6873_v15  ;;  %v355_v48 = vsel %vm168_vm1, %v6878_v25, %v6879_v24  ;;  %v6032_v13 = vld [vmem:[%s9034_s3 + $0x10] sm:$0xff]  ;;  %v127_v15 = vsel %vm126_vm0, %v6833_v63, %v6834_v62  ;;  %v6325_v58 = vld [vmem:[%s9034_s3 + $0x1a8] sm:$0xff] }
  0x8a   :  { %v6887_v42 = vpop.permute.xlu1 %6886  ;;  %v6882_v43 = vpop.permute.xlu0 %6881  ;;  %v6340_v45 = vpack.c.bf16 %v172_v26, %v170_v20  ;;  %v6342_v33 = vpack.c.bf16 %v171_v27, %v169_v23  ;;  %v7913_v20 = vpack.i.bf16 %v7568_v3, %v7754_v30  ;;  %v6347_v23 = vpack.c.bf16 %v129_v57, %v127_v15  ;;  %v6033_v27 = vld [vmem:[%s9034_s3 + $0x18] sm:$0xff] }
  0x8b   :  { %v6889_v51 = vunpack.i.h.bf16 %v6887_v42  ;;  %v6888_v34 = vunpack.i.l.bf16 %v6887_v42  ;;  %v6884_v53 = vunpack.i.h.bf16 %v6882_v43  ;;  %v6883_v54 = vunpack.i.l.bf16 %v6882_v43 }
  0x8c   :  { %7176 = vrot.lane.b32.xlu1 %v7799_v39, %s7572_s19  ;;  %7171 = vrot.lane.b32.xlu0 %v7803_v40, %s7572_s19  ;;  %v132_v40 = vsel %vm126_vm0, %v6849_v56, %v6853_v41  ;;  %v131_v41 = vsel %vm126_vm0, %v6848_v16, %v6849_v56 }
  0x8d   :  { %6341 = vmatprep.subr.bf16.mxu0 %v6340_v45  ;;  %v356_v4 = vsel %vm168_vm1, %v6879_v24, %v6883_v54  ;;  %v358_v52 = vsel %vm168_vm1, %v6888_v34, %v6889_v51  ;;  %v357_v39 = vsel %vm168_vm1, %v6884_v53, %v6888_v34  ;;  %v6354_v30 = vpack.c.bf16 %v134_v5, %v132_v40 }
  0x8e   :  { %6343 = vmatpush1.bf16.msra.mxu0 %v6342_v33  ;;  %v6897_v61 = vpop.permute.xlu1 %6896  ;;  %v6892_v8 = vpop.permute.xlu0 %6891  ;;  %v6350_v9 = vpack.c.bf16 %v358_v52, %v356_v4  ;;  %v6352_v14 = vpack.c.bf16 %v357_v39, %v355_v48  ;;  %v6357_v33 = vpack.c.bf16 %v133_v60, %v131_v41  ;;  %v7991_v40 = vpack.i.bf16 %v7778_v35, %v7788_v37  ;;  %v152_v37 = vld [vmem:[%s9034_s3 + $0x8] sm:$0xff] }
  0x8f   :  { %6346 = vmatprep.subr.msk.bf16.mxu0 %vm7887_vm4, %v6344_v47  ;;  %v6898_v24 = vunpack.i.l.bf16 %v6897_v61  ;;  %v6894_v25 = vunpack.i.h.bf16 %v6892_v8  ;;  %v6893_v62 = vunpack.i.l.bf16 %v6892_v8  ;;  %v6899_v42 = vunpack.i.h.bf16 %v6897_v61  ;;  %v151_v47 = vld [vmem:[%s9034_s3] sm:$0xff] }
  0x90   :  { %7186 = vrot.lane.b32.xlu1 %v7568_v3, %s7572_s19  ;;  %7181 = vrot.lane.b32.xlu0 %v7568_v3, %s7572_s19  ;;  %v7995_v61 = vpack.i.bf16 %v7749_v29, %v7759_v31 }
  0x91   :  { %6351 = vmatprep.subr.bf16.mxu1 %v6350_v9  ;;  %6034 = vmatmul.mubr.msk.f32.vlgmr.msra.gmra.mrb[0].mxu0 %vm168_vm1, %v6032_v13  ;;  %v543_v36 = vsel %vm541_vm6, %v6894_v25, %v6898_v24  ;;  %v542_v51 = vsel %vm541_vm6, %v6893_v62, %v6894_v25  ;;  %v6050_v62 = vld [vmem:[%s9034_s3 + $0x20] sm:$0xff] }
  0x92   :  { %6349 = vmatpush1.bf16.msk.msra.mxu0 %vm7907_vm5, %v6347_v23  ;;  %6353 = vmatpush1.bf16.msra.mxu1 %v6352_v14  ;;  %v6907_v63 = vpop.permute.xlu1 %6906  ;;  %v6902_v26 = vpop.permute.xlu0 %6901 }
  0x93   :  { %v6904_v43 = vunpack.i.h.bf16 %v6902_v26  ;;  %v6903_v45 = vunpack.i.l.bf16 %v6902_v26  ;;  %6356 = vmatprep.subr.msk.bf16.mxu1 %vm7887_vm4, %v6354_v30  ;;  %253 = vmatprep.mubr.f32.mxu0 %v7568_v3  ;;  %v6909_v54 = vunpack.i.h.bf16 %v6907_v63  ;;  %v6908_v56 = vunpack.i.l.bf16 %v6907_v63 }
  0x94   :  { %7196 = vrot.lane.b32.xlu1 %v7913_v20, %s7573_s20  ;;  %7191 = vrot.lane.b32.xlu0 %v7921_v44, %s7573_s20 }
  0x95   :  { %v544_v34 = vsel %vm541_vm6, %v6899_v42, %v6903_v45  ;;  %v545_v53 = vsel %vm541_vm6, %v6903_v45, %v6904_v43  ;;  %6035 = vmatmul.mubr.msk.f32.gmra.mrb[2].mxu0 %vm168_vm1, %v6033_v27  ;;  %6042 = vmatmul.mubr.msk.f32.vlgmr.msra.gmra.mrb[0].mxu1 %vm168_vm1, %v6032_v13  ;;  %v546_v14 = vsel %vm541_vm6, %v6908_v56, %v6909_v54 }
  0x96   :  { %v6363_v38 = vpack.c.bf16 %v544_v34, %v542_v51  ;;  %6359 = vmatpush1.bf16.msk.msra.mxu1 %vm7907_vm5, %v6357_v33  ;;  %v6917_v46 = vpop.permute.xlu1 %6916  ;;  %v6912_v50 = vpop.permute.xlu0 %6911  ;;  %330 = vmatprep.mubr.f32.mxu0 %v7568_v3  ;;  %v6360_v57 = vpack.c.bf16 %v545_v53, %v543_v36  ;;  %v6051_v34 = vld [vmem:[%s9034_s3 + $0x28] sm:$0xff] }
  0x97   :  { %v6919_v4 = vunpack.i.h.bf16 %v6917_v46  ;;  %v6918_v52 = vunpack.i.l.bf16 %v6917_v46  ;;  %v6914_v48 = vunpack.i.h.bf16 %v6912_v50  ;;  %v6913_v39 = vunpack.i.l.bf16 %v6912_v50  ;;  %433 = vmatprep.mubr.f32.mxu1 %v7568_v3 }
  0x98   :  { %7206 = vrot.lane.b32.xlu1 %v7932_v32, %s7573_s20  ;;  %7201 = vrot.lane.b32.xlu0 %v7951_v49, %s7573_s20 }
  0x99   :  { %v549_v8 = vsel %vm541_vm6, %v6918_v52, %v6919_v4  ;;  %v548_v9 = vsel %vm541_vm6, %v6914_v48, %v6918_v52  ;;  %v547_v13 = vsel %vm541_vm6, %v6909_v54, %v6913_v39  ;;  %6362 = vmatprep.subr.msk.bf16.mxu0 %vm7970_vm9, %v6360_v57  ;;  %6040 = vmatmul.mubr.msk.f32.vlgmr.msra.gmra.mrb[0].mxu0 %vm168_vm1, %v151_v47  ;;  %v6064_v39 = vld [vmem:[%s9034_s3 + $0x30] sm:$0xff] }
  0x9a   :  { %6043 = vmatmul.mubr.msk.f32.gmra.mrb[2].mxu1 %vm168_vm1, %v6033_v27  ;;  %6365 = vmatpush1.bf16.msk.msra.mxu0 %vm7981_vm10, %v6363_v38  ;;  %v6927_v29 = vpop.permute.xlu1 %6926  ;;  %v6922_v31 = vpop.permute.xlu0 %6921  ;;  %v6366_v35 = vpack.c.bf16 %v549_v8, %v547_v13  ;;  %v6369_v15 = vpack.c.bf16 %v548_v9, %v546_v14 }
  0x9b   :  { %336 = vmatprep.mubr.f32.mxu0 %v7568_v3  ;;  %504 = vmatprep.mubr.f32.mxu1 %v7568_v3  ;;  %v6928_v16 = vunpack.i.l.bf16 %v6927_v29  ;;  %v6924_v23 = vunpack.i.h.bf16 %v6922_v31  ;;  %v6923_v24 = vunpack.i.l.bf16 %v6922_v31  ;;  %v6929_v30 = vunpack.i.h.bf16 %v6927_v29 }
  0x9c   :  { %7216 = vrot.lane.b32.xlu1 %v7991_v40, %s7573_s20  ;;  %7211 = vrot.lane.b32.xlu0 %v7995_v61, %s7573_s20 }
  0x9d   :  { %6368 = vmatprep.subr.msk.bf16.mxu1 %vm7970_vm9, %v6366_v35  ;;  %6041 = vmatmul.mubr.msk.f32.gmra.mrb[2].mxu0 %vm168_vm1, %v152_v37  ;;  %v763_v27 = vsel %vm761_vm11, %v6924_v23, %v6928_v16  ;;  %v762_v28 = vsel %vm761_vm11, %v6923_v24, %v6924_v23  ;;  %v6065_v35 = vld [vmem:[%s9034_s3 + $0x38] sm:$0xff] }
  0x9e   :  { %6048 = vmatmul.mubr.msk.f32.vlgmr.msra.gmra.mrb[0].mxu1 %vm168_vm1, %v151_v47  ;;  %v6937_v25 = vpop.permute.xlu1 %6936  ;;  %v6932_v60 = vpop.permute.xlu0 %6931  ;;  %639 = vmatprep.mubr.f32.mxu0 %v7568_v3 }
  0x9f   :  { %6371 = vmatpush1.bf16.msk.msra.mxu1 %vm7981_vm10, %v6369_v15  ;;  %v6934_v63 = vunpack.i.h.bf16 %v6932_v60  ;;  %v6933_v26 = vunpack.i.l.bf16 %v6932_v60  ;;  %510 = vmatprep.mubr.f32.mxu1 %v7568_v3  ;;  %v6939_v43 = vunpack.i.h.bf16 %v6937_v25  ;;  %v6938_v45 = vunpack.i.l.bf16 %v6937_v25 }
  0xa0   :  { %7226 = vrot.lane.b32.xlu1 %v7913_v20, %s7574_s21  ;;  %7221 = vrot.lane.b32.xlu0 %v7921_v44, %s7574_s21 }
  0xa1   :  { %v764_v41 = vsel %vm761_vm11, %v6929_v30, %v6933_v26  ;;  %v765_v42 = vsel %vm761_vm11, %v6933_v26, %v6934_v63  ;;  %6056 = vmatmul.mubr.msk.f32.vlgmr.msra.gmra.mrb[0].mxu0 %vm168_vm1, %v6050_v62  ;;  %v766_v47 = vsel %vm761_vm11, %v6938_v45, %v6939_v43 }
  0xa2   :  { %v6375_v33 = vpack.c.bf16 %v764_v41, %v762_v28  ;;  %6049 = vmatmul.mubr.msk.f32.gmra.mrb[2].mxu1 %vm168_vm1, %v152_v37  ;;  %v6947_v36 = vpop.permute.xlu1 %6946  ;;  %v6942_v55 = vpop.permute.xlu0 %6941  ;;  %645 = vmatprep.mubr.f32.mxu0 %v7568_v3  ;;  %v6372_v51 = vpack.c.bf16 %v765_v42, %v763_v27 }
  0xa3   :  { %v6949_v53 = vunpack.i.h.bf16 %v6947_v36  ;;  %v6948_v54 = vunpack.i.l.bf16 %v6947_v36  ;;  %v6944_v56 = vunpack.i.h.bf16 %v6942_v55  ;;  %v6943_v38 = vunpack.i.l.bf16 %v6942_v55  ;;  %720 = vmatprep.mubr.f32.mxu1 %v7568_v3 }
  0xa4   :  { %7236 = vrot.lane.b32.xlu1 %v7932_v32, %s7574_s21  ;;  %7231 = vrot.lane.b32.xlu0 %v7951_v49, %s7574_s21 }
  0xa5   :  { %v769_v46 = vsel %vm761_vm11, %v6948_v54, %v6949_v53  ;;  %v768_v50 = vsel %vm761_vm11, %v6944_v56, %v6948_v54  ;;  %v767_v57 = vsel %vm761_vm11, %v6939_v43, %v6943_v38  ;;  %6374 = vmatprep.subr.msk.bf16.mxu0 %vm7887_vm4, %v6372_v51  ;;  %6057 = vmatmul.mubr.msk.f32.gmra.mrb[2].mxu0 %vm168_vm1, %v6051_v34 }
  0xa6   :  { %6062 = vmatmul.mubr.msk.f32.vlgmr.msra.gmra.mrb[0].mxu1 %vm168_vm1, %v6050_v62  ;;  %6377 = vmatpush1.bf16.msk.msra.mxu0 %vm7907_vm5, %v6375_v33  ;;  %v6957_v4 = vpop.permute.xlu1 %6956  ;;  %v6952_v52 = vpop.permute.xlu0 %6951  ;;  %v6378_v48 = vpack.c.bf16 %v769_v46, %v767_v57  ;;  %v6381_v8 = vpack.c.bf16 %v768_v50, %v766_v47  ;;  %v6084_v46 = vld [vmem:[%s9034_s3 + $0x50] sm:$0xff] }
  0xa7   :  { %726 = vmatprep.mubr.f32.mxu1 %v7568_v3  ;;  %859 = vmatprep.mubr.f32.mxu0 %v7568_v3  ;;  %v6958_v9 = vunpack.i.l.bf16 %v6957_v4  ;;  %v6954_v13 = vunpack.i.h.bf16 %v6952_v52  ;;  %v6953_v14 = vunpack.i.l.bf16 %v6952_v52  ;;  %v6959_v37 = vunpack.i.h.bf16 %v6957_v4 }
  0xa8   :  { %7246 = vrot.lane.b32.xlu1 %v7991_v40, %s7574_s21  ;;  %7241 = vrot.lane.b32.xlu0 %v7995_v61, %s7574_s21 }
  0xa9   :  { %6380 = vmatprep.subr.msk.bf16.mxu1 %vm7887_vm4, %v6378_v48  ;;  %6070 = vmatmul.mubr.msk.f32.vlgmr.msra.gmra.mrb[0].mxu0 %vm168_vm1, %v6064_v39  ;;  %v1178_v23 = vsel %vm1176_vm12, %v6954_v13, %v6958_v9  ;;  %v1177_v24 = vsel %vm1176_vm12, %v6953_v14, %v6954_v13 }
  0xaa   :  { %6063 = vmatmul.mubr.msk.f32.gmra.mrb[2].mxu1 %vm168_vm1, %v6051_v34  ;;  %v6967_v29 = vpop.permute.xlu1 %6966  ;;  %v6962_v31 = vpop.permute.xlu0 %6961  ;;  %865 = vmatprep.mubr.f32.mxu0 %v7568_v3 }
  0xab   :  { %6383 = vmatpush1.bf16.msk.msra.mxu1 %vm7907_vm5, %v6381_v8  ;;  %v6964_v15 = vunpack.i.h.bf16 %v6962_v31  ;;  %v6963_v16 = vunpack.i.l.bf16 %v6962_v31  ;;  %940 = vmatprep.mubr.f32.mxu1 %v7568_v3  ;;  %v6969_v62 = vunpack.i.h.bf16 %v6967_v29  ;;  %v6968_v30 = vunpack.i.l.bf16 %v6967_v29  ;;  %v8156_v29 = vld [vmem:[%s9035_s2 + $0x10] sm:$0xff]  ;;  %v6085_v31 = vld [vmem:[%s9034_s3 + $0x58] sm:$0xff] }
  0xac   :  { %7256 = vrot.lane.b32.xlu1 %v7913_v20, %s7575_s22  ;;  %7251 = vrot.lane.b32.xlu0 %v7921_v44, %s7575_s22 }
  0xad   :  { %v1179_v25 = vsel %vm1176_vm12, %v6959_v37, %v6963_v16  ;;  %v1180_v60 = vsel %vm1176_vm12, %v6963_v16, %v6964_v15  ;;  %6385 = vmatprep.subr.bf16.mxu0 %v6384_v18  ;;  %6071 = vmatmul.mubr.msk.f32.gmra.mrb[2].mxu0 %vm168_vm1, %v6065_v35  ;;  %v1181_v18 = vsel %vm1176_vm12, %v6968_v30, %v6969_v62  ;;  %v8179_v16 = vld [vmem:[%s9035_s2 + $0x8] sm:$0xff] }
  0xae   :  { %v6395_v63 = vpack.c.bf16 %v1179_v25, %v1177_v24  ;;  %6076 = vmatmul.mubr.msk.f32.vlgmr.msra.gmra.mrb[0].mxu1 %vm168_vm1, %v6064_v39  ;;  %6387 = vmatpush1.bf16.msra.mxu0 %v6386_v19  ;;  %v6977_v26 = vpop.permute.xlu1 %6976  ;;  %v6972_v27 = vpop.permute.xlu0 %6971  ;;  %v6392_v28 = vpack.c.bf16 %v1180_v60, %v1178_v23 }
  0xaf   :  { %v6979_v41 = vunpack.i.h.bf16 %v6977_v26  ;;  %v6978_v42 = vunpack.i.l.bf16 %v6977_v26  ;;  %v6974_v43 = vunpack.i.h.bf16 %v6972_v27  ;;  %v6973_v45 = vunpack.i.l.bf16 %v6972_v27  ;;  %946 = vmatprep.mubr.f32.mxu1 %v7568_v3  ;;  %1030 = vmatprep.mubr.f32.mxu0 %v7568_v3 }
  0xb0   :  { %7266 = vrot.lane.b32.xlu1 %v7932_v32, %s7575_s22  ;;  %7261 = vrot.lane.b32.xlu0 %v7951_v49, %s7575_s22 }
  0xb1   :  { %v1184_v0 = vsel %vm1176_vm12, %v6978_v42, %v6979_v41  ;;  %v1183_v2 = vsel %vm1176_vm12, %v6974_v43, %v6978_v42  ;;  %v1182_v7 = vsel %vm1176_vm12, %v6969_v62, %v6973_v45  ;;  %6389 = vmatprep.subr.bf16.mxu1 %v6388_v21  ;;  %6394 = vmatprep.subr.msk.bf16.mxu0 %vm7970_vm9, %v6392_v28  ;;  %v6079_v21 = vld [vmem:[%s9034_s3 + $0x48] sm:$0xff]  ;;  %v8190_v62 = vld [vmem:[%s9035_s2 + $0x30] sm:$0xff]  ;;  %v8207_v28 = vld [vmem:[%s9035_s2 + $0x38] sm:$0xff] }
  0xb2   :  { %6077 = vmatmul.mubr.msk.f32.gmra.mrb[2].mxu1 %vm168_vm1, %v6065_v35  ;;  %6080 = vmatmul.mubr.msk.f32.vlgmr.msra.gmra.mrb[0].mxu0 %vm168_vm1, %v6078_v1  ;;  %v6987_v19 = vpop.permute.xlu1 %6986  ;;  %v6982_v33 = vpop.permute.xlu0 %6981  ;;  %v6398_v36 = vpack.c.bf16 %v1184_v0, %v1182_v7  ;;  %v6401_v55 = vpack.c.bf16 %v1183_v2, %v1181_v18  ;;  %v8222_v42 = vld [vmem:[%s9035_s2 + $0x28] sm:$0xff]  ;;  %v8229_v7 = vpack.i.bf16 %v8207_v28, %v8190_v62 }
  0xb3   :  { %6391 = vmatpush1.bf16.msra.mxu1 %v6390_v22  ;;  %6397 = vmatpush1.bf16.msk.msra.mxu0 %vm7981_vm10, %v6395_v63  ;;  %v6988_v11 = vunpack.i.l.bf16 %v6987_v19  ;;  %v6984_v12 = vunpack.i.h.bf16 %v6982_v33  ;;  %v6983_v51 = vunpack.i.l.bf16 %v6982_v33  ;;  %v6989_v22 = vunpack.i.h.bf16 %v6987_v19 }
  0xb4   :  { %7276 = vrot.lane.b32.xlu1 %v7991_v40, %s7575_s22  ;;  %7271 = vrot.lane.b32.xlu0 %v7995_v61, %s7575_s22 }
  0xb5   :  { %1111 = vmatprep.mubr.f32.mxu1 %v7568_v3  ;;  %6400 = vmatprep.subr.msk.bf16.mxu1 %vm7970_vm9, %v6398_v36  ;;  %v1398_v54 = vsel %vm1396_vm13, %v6984_v12, %v6988_v11  ;;  %v1397_v50 = vsel %vm1396_vm13, %v6983_v51, %v6984_v12 }
  0xb6   :  { %6082 = vmatmul.mubr.msk.f32.vlgmr.msra.gmra.mrb[0].mxu1 %vm168_vm1, %v6078_v1  ;;  %v6997_v6 = vpop.permute.xlu1 %6996  ;;  %v6992_v10 = vpop.permute.xlu0 %6991  ;;  %1036 = vmatprep.mubr.f32.mxu0 %v7568_v3 }
  0xb7   :  { %6403 = vmatpush1.bf16.msk.msra.mxu1 %vm7981_vm10, %v6401_v55  ;;  %v6994_v34 = vunpack.i.h.bf16 %v6992_v10  ;;  %v6993_v53 = vunpack.i.l.bf16 %v6992_v10  ;;  %6081 = vmatmul.mubr.msk.f32.gmra.mrb[2].mxu0 %vm168_vm1, %v6079_v21  ;;  %v6999_v56 = vunpack.i.h.bf16 %v6997_v6  ;;  %v6998_v38 = vunpack.i.l.bf16 %v6997_v6  ;;  %v6099_v55 = vld [vmem:[%s9034_s3 + $0x68] sm:$0xff] }
  0xb8   :  { %7286 = vrot.lane.b32.xlu1 %v7913_v20, %s7576_s23  ;;  %7281 = vrot.lane.b32.xlu0 %v7921_v44, %s7576_s23  ;;  %v7577_v44 = vmov 0  }
  0xb9   :  { %v1399_v57 = vsel %vm1396_vm13, %v6989_v22, %v6993_v53  ;;  %v1400_v47 = vsel %vm1396_vm13, %v6993_v53, %v6994_v34  ;;  %1117 = vmatprep.mubr.f32.mxu1 %v7568_v3  ;;  %1274 = vmatprep.mubr.f32.mxu0 %v7568_v3  ;;  %v1401_v14 = vsel %vm1396_vm13, %v6998_v38, %v6999_v56 }
  0xba   :  { %v6407_v4 = vpack.c.bf16 %v1399_v57, %v1397_v50  ;;  %v7007_v52 = vpop.permute.xlu1 %7006  ;;  %v7002_v20 = vpop.permute.xlu0 %7001  ;;  %v6404_v48 = vpack.c.bf16 %v1400_v47, %v1398_v54  ;;  %6083 = vmatmul.mubr.msk.f32.gmra.mrb[2].mxu1 %vm168_vm1, %v6079_v21  ;;  %7550 = vset.pattern.permute.xlu0 %v7577_v44 }
  0xbb   :  { %v7009_v39 = vunpack.i.h.bf16 %v7007_v52  ;;  %v7008_v8 = vunpack.i.l.bf16 %v7007_v52  ;;  %v7004_v9 = vunpack.i.h.bf16 %v7002_v20  ;;  %v7003_v13 = vunpack.i.l.bf16 %v7002_v20  ;;  %6090 = vmatmul.mubr.msk.f32.vlgmr.msra.gmra.mrb[0].mxu0 %vm168_vm1, %v6084_v46  ;;  %1355 = vmatprep.mubr.f32.mxu1 %v7568_v3 }
  0xbc   :  { %7296 = vrot.lane.b32.xlu1 %v7932_v32, %s7576_s23  ;;  %7291 = vrot.lane.b32.xlu0 %v7951_v49, %s7576_s23  ;;  %v8169_v32 = vld [vmem:[%s9035_s2 + $0x18] sm:$0xff]  ;;  %v8174_v49 = vld [vmem:[%s9035_s2] sm:$0xff] }
  0xbd   :  { %v1404_v35 = vsel %vm1396_vm13, %v7008_v8, %v7009_v39  ;;  %v1403_v37 = vsel %vm1396_vm13, %v7004_v9, %v7008_v8  ;;  %v1402_v15 = vsel %vm1396_vm13, %v6999_v56, %v7003_v13  ;;  %6406 = vmatprep.subr.msk.bf16.mxu0 %vm7887_vm4, %v6404_v48  ;;  %1280 = vmatprep.mubr.f32.mxu0 %v7568_v3  ;;  %v6112_v48 = vld [vmem:[%s9034_s3 + $0x70] sm:$0xff]  ;;  %v6113_v13 = vld [vmem:[%s9034_s3 + $0x78] sm:$0xff] }
  0xbe   :  { %v6413_v23 = vpack.c.bf16 %v1403_v37, %v1401_v14  ;;  %6409 = vmatpush1.bf16.msk.msra.mxu0 %vm7907_vm5, %v6407_v4  ;;  %v7017_v24 = vpop.permute.xlu1 %7016  ;;  %v7012_v25 = vpop.permute.xlu0 %7011  ;;  %v6410_v60 = vpack.c.bf16 %v1404_v35, %v1402_v15  ;;  %6096 = vmatmul.mubr.msk.f32.vlgmr.msra.gmra.mrb[0].mxu1 %vm168_vm1, %v6084_v46  ;;  %v8198_v26 = vpack.i.bf16 %v8169_v32, %v8156_v29 }
  0xbf   :  { %6091 = vmatmul.mubr.msk.f32.gmra.mrb[2].mxu0 %vm168_vm1, %v6085_v31  ;;  %1361 = vmatprep.mubr.f32.mxu1 %v7568_v3  ;;  %v7014_v30 = vunpack.i.h.bf16 %v7012_v25  ;;  %v7013_v63 = vunpack.i.l.bf16 %v7012_v25  ;;  %v8202_v27 = vpack.i.bf16 %v8179_v16, %v8174_v49  ;;  %v7018_v41 = vunpack.i.l.bf16 %v7017_v24 }
  0xc0   :  { %7306 = vrot.lane.b32.xlu1 %v7991_v40, %s7576_s23  ;;  %7301 = vrot.lane.b32.xlu0 %v7995_v61, %s7576_s23  ;;  %v6098_v40 = vld [vmem:[%s9034_s3 + $0x60] sm:$0xff]  ;;  %v7019_v1 = vunpack.i.h.bf16 %v7017_v24 }
  0xc1   :  { %6412 = vmatprep.subr.msk.bf16.mxu1 %vm7887_vm4, %v6410_v60  ;;  %v8217_v61 = vld [vmem:[%s9035_s2 + $0x20] sm:$0xff]  ;;  %1494 = vmatprep.mubr.f32.mxu0 %v7568_v3  ;;  %v1608_v18 = vsel %vm1607_vm14, %v7013_v63, %v7014_v30  ;;  %v1609_v12 = vsel %vm1607_vm14, %v7014_v30, %v7018_v41 }
  0xc2   :  { %6415 = vmatpush1.bf16.msk.msra.mxu1 %vm7907_vm5, %v6413_v23  ;;  %v7027_v43 = vpop.permute.xlu1 %7026  ;;  %v7022_v45 = vpop.permute.xlu0 %7021  ;;  %7551 = vset.pattern.permute.xlu1 %v7577_v44  ;;  %v8240_v36 = vpack.i.bf16 %v8222_v42, %v8217_v61 }
  0xc3   :  { %v7024_v0 = vunpack.i.h.bf16 %v7022_v45  ;;  %v7023_v2 = vunpack.i.l.bf16 %v7022_v45  ;;  %6097 = vmatmul.mubr.msk.f32.gmra.mrb[2].mxu1 %vm168_vm1, %v6085_v31  ;;  %6104 = vmatmul.mubr.msk.f32.vlgmr.msra.gmra.mrb[0].mxu0 %vm168_vm1, %v6098_v40  ;;  %v7029_v19 = vunpack.i.h.bf16 %v7027_v43  ;;  %v7028_v33 = vunpack.i.l.bf16 %v7027_v43 }
  0xc4   :  { %7316 = vrot.lane.b32.xlu1 %v8198_v26, %s7570_s0  ;;  %7311 = vrot.lane.b32.xlu0 %v8202_v27, %s7570_s0 }
  0xc5   :  { %v1610_v11 = vsel %vm1607_vm14, %v7019_v1, %v7023_v2  ;;  %v1611_v21 = vsel %vm1607_vm14, %v7023_v2, %v7024_v0  ;;  %1575 = vmatprep.mubr.f32.mxu1 %v7568_v3  ;;  %1500 = vmatprep.mubr.f32.mxu0 %v7568_v3  ;;  %v1715_v38 = vsel %vm1607_vm14, %v7028_v33, %v7029_v19 }
  0xc6   :  { %v7037_v51 = vpop.permute.xlu1 %7036  ;;  %v7032_v6 = vpop.permute.xlu0 %7031  ;;  %v6416_v10 = vpack.c.bf16 %v1611_v21, %v1609_v12  ;;  %v6418_v22 = vpack.c.bf16 %v1610_v11, %v1608_v18 }
  0xc7   :  { %v7039_v34 = vunpack.i.h.bf16 %v7037_v51  ;;  %v7038_v53 = vunpack.i.l.bf16 %v7037_v51  ;;  %v7034_v54 = vunpack.i.h.bf16 %v7032_v6  ;;  %v7033_v56 = vunpack.i.l.bf16 %v7032_v6  ;;  %6110 = vmatmul.mubr.msk.f32.vlgmr.msra.gmra.mrb[0].mxu1 %vm168_vm1, %v6098_v40  ;;  %6105 = vmatmul.mubr.msk.f32.gmra.mrb[2].mxu0 %vm168_vm1, %v6099_v55 }
  0xc8   :  { %7326 = vrot.lane.b32.xlu1 %v8229_v7, %s7570_s0  ;;  %7321 = vrot.lane.b32.xlu0 %v8240_v36, %s7570_s0 }
  0xc9   :  { %v1717_v46 = vsel %vm1607_vm14, %v7034_v54, %v7038_v53  ;;  %6417 = vmatprep.subr.bf16.mxu0 %v6416_v10  ;;  %v1716_v50 = vsel %vm1607_vm14, %v7029_v19, %v7033_v56  ;;  %v1718_v57 = vsel %vm1607_vm14, %v7038_v53, %v7039_v34  ;;  %1581 = vmatprep.mubr.f32.mxu1 %v7568_v3  ;;  %v6118_v53 = vld [vmem:[%s9034_s3 + $0x80] sm:$0xff] }
  0xca   :  { %6419 = vmatpush1.bf16.msra.mxu0 %v6418_v22  ;;  %v7047_v47 = vpop.permute.xlu1 %7046  ;;  %v7042_v4 = vpop.permute.xlu0 %7041  ;;  %v6420_v52 = vpack.c.bf16 %v1718_v57, %v1716_v50  ;;  %v6422_v20 = vpack.c.bf16 %v1717_v46, %v1715_v38  ;;  %1686 = vmatprep.mubr.f32.mxu0 %v7568_v3 }
  0xcb   :  { %6111 = vmatmul.mubr.msk.f32.gmra.mrb[2].mxu1 %vm168_vm1, %v6099_v55  ;;  %v7048_v44 = vunpack.i.l.bf16 %v7047_v47  ;;  %v7044_v39 = vunpack.i.h.bf16 %v7042_v4  ;;  %v7049_v14 = vunpack.i.h.bf16 %v7047_v47  ;;  %v7043_v35 = vunpack.i.l.bf16 %v7042_v4 }
  0xcc   :  { %7336 = vrot.lane.b32.xlu1 %v7568_v3, %s7570_s0  ;;  %7331 = vrot.lane.b32.xlu0 %v7568_v3, %s7570_s0 }
  0xcd   :  { %6421 = vmatprep.subr.bf16.mxu1 %v6420_v52  ;;  %6114 = vmatmul.mubr.msk.f32.vlgmr.msra.gmra.mrb[0].mxu0 %vm168_vm1, %v6112_v48  ;;  %v1830_v23 = vsel %vm1828_vm15, %v7044_v39, %v7048_v44  ;;  %v1829_v1 = vsel %vm1828_vm15, %v7043_v35, %v7044_v39 }
  0xce   :  { %6423 = vmatpush1.bf16.msra.mxu1 %v6422_v20  ;;  %v7057_v8 = vpop.permute.xlu1 %7056  ;;  %v7052_v9 = vpop.permute.xlu0 %7051  ;;  %1787 = vmatprep.mubr.f32.mxu1 %v7568_v3  ;;  %v6119_v20 = vld [vmem:[%s9034_s3 + $0x88] sm:$0xff] }
  0xcf   :  { %v7053_v31 = vunpack.i.l.bf16 %v7052_v9  ;;  %1692 = vmatprep.mubr.f32.mxu0 %v7568_v3  ;;  %v7058_v37 = vunpack.i.l.bf16 %v7057_v8  ;;  %v7054_v15 = vunpack.i.h.bf16 %v7052_v9  ;;  %v7059_v25 = vunpack.i.h.bf16 %v7057_v8 }
  0xd0   :  { %7346 = vrot.lane.b32.xlu1 %v8198_v26, %s7569_s11  ;;  %7341 = vrot.lane.b32.xlu0 %v8202_v27, %s7569_s11 }
  0xd1   :  { %v1832_v24 = vsel %vm1828_vm15, %v7049_v14, %v7053_v31  ;;  %6116 = vmatmul.mubr.msk.f32.vlgmr.msra.gmra.mrb[0].mxu1 %vm168_vm1, %v6112_v48  ;;  %6115 = vmatmul.mubr.msk.f32.gmra.mrb[2].mxu0 %vm168_vm1, %v6113_v13  ;;  %v1834_v0 = vsel %vm1828_vm15, %v7054_v15, %v7058_v37 }
  0xd2   :  { %v7067_v60 = vpop.permute.xlu1 %7066  ;;  %v7062_v30 = vpop.permute.xlu0 %7061  ;;  %v6424_v63 = vpack.c.bf16 %v1832_v24, %v1830_v23  ;;  %1793 = vmatprep.mubr.f32.mxu1 %v7568_v3  ;;  %1926 = vmatprep.mubr.f32.mxu0 %v7568_v3 }
  0xd3   :  { %v7069_v40 = vunpack.i.h.bf16 %v7067_v60  ;;  %v7068_v41 = vunpack.i.l.bf16 %v7067_v60  ;;  %v7064_v43 = vunpack.i.h.bf16 %v7062_v30  ;;  %v7063_v45 = vunpack.i.l.bf16 %v7062_v30 }
  0xd4   :  { %7356 = vrot.lane.b32.xlu1 %v8229_v7, %s7569_s11  ;;  %7351 = vrot.lane.b32.xlu0 %v8240_v36, %s7569_s11 }
  0xd5   :  { %v1833_v2 = vsel %vm1828_vm15, %v7068_v41, %v7054_v15  ;;  %v1835_v18 = vsel %vm1828_vm15, %v7069_v40, %v7059_v25  ;;  %v1831_v19 = vsel %vm1828_vm15, %v7064_v43, %v7049_v14  ;;  %v1836_v33 = vsel %vm1828_vm15, %v7059_v25, %v7063_v45  ;;  %6426 = vmatprep.subr.msk.bf16.mxu0 %vm7970_vm9, %v6424_v63 }
  0xd6   :  { %v6433_v55 = vpack.c.bf16 %v1835_v18, %v1833_v2  ;;  %v6427_v11 = vpack.c.bf16 %v1831_v19, %v1829_v1  ;;  %v7077_v12 = vpop.permute.xlu1 %7076  ;;  %v7072_v21 = vpop.permute.xlu0 %7071  ;;  %6117 = vmatmul.mubr.msk.f32.gmra.mrb[2].mxu1 %vm168_vm1, %v6113_v13  ;;  %v6430_v51 = vpack.c.bf16 %v1836_v33, %v1834_v0  ;;  %v6134_v1 = vld [vmem:[%s9034_s3 + $0xa0] sm:$0xff] }
  0xd7   :  { %v7079_v6 = vunpack.i.h.bf16 %v7077_v12  ;;  %v7078_v10 = vunpack.i.l.bf16 %v7077_v12  ;;  %v7074_v22 = vunpack.i.h.bf16 %v7072_v21  ;;  %v7073_v34 = vunpack.i.l.bf16 %v7072_v21  ;;  %2007 = vmatprep.mubr.f32.mxu1 %v7568_v3 }
  0xd8   :  { %7366 = vrot.lane.b32.xlu1 %v7568_v3, %s7569_s11  ;;  %7361 = vrot.lane.b32.xlu0 %v7568_v3, %s7569_s11 }
  0xd9   :  { %6429 = vmatpush1.bf16.msk.msra.mxu0 %vm7981_vm10, %v6427_v11  ;;  %6432 = vmatprep.subr.msk.bf16.mxu1 %vm7970_vm9, %v6430_v51  ;;  %v2159_v54 = vsel %vm168_vm1, %v7073_v34, %v7074_v22  ;;  %v2161_v56 = vsel %vm168_vm1, %v7078_v10, %v7079_v6  ;;  %v6135_v51 = vld [vmem:[%s9034_s3 + $0xa8] sm:$0xff] }
  0xda   :  { %6435 = vmatpush1.bf16.msk.msra.mxu1 %vm7981_vm10, %v6433_v55  ;;  %v7087_v38 = vpop.permute.xlu1 %7086  ;;  %v7082_v46 = vpop.permute.xlu0 %7081  ;;  %v6436_v50 = vpack.c.bf16 %v2161_v56, %v2159_v54 }
  0xdb   :  { %v7089_v57 = vunpack.i.h.bf16 %v7087_v38  ;;  %v7088_v47 = vunpack.i.l.bf16 %v7087_v38  ;;  %v7084_v4 = vunpack.i.h.bf16 %v7082_v46  ;;  %v7083_v52 = vunpack.i.l.bf16 %v7082_v46 }
  0xdc   :  { %6124 = vmatmul.mubr.msk.f32.vlgmr.msra.gmra.mrb[0].mxu0 %vm168_vm1, %v6118_v53  ;;  %7376 = vrot.lane.b32.xlu1 %v8198_v26, %s7571_s18 }
  0xdd   :  { %7371 = vrot.lane.b32.xlu0 %v8202_v27, %s7571_s18  ;;  %6130 = vmatmul.mubr.msk.f32.vlgmr.msra.gmra.mrb[0].mxu1 %vm168_vm1, %v6118_v53  ;;  %v2345_v48 = vsel %vm168_vm1, %v7083_v52, %v7084_v4  ;;  %v2347_v44 = vsel %vm168_vm1, %v7088_v47, %v7089_v57 }
  0xde   :  { %6437 = vmatprep.subr.bf16.mxu0 %v6436_v50  ;;  %v7097_v39 = vpop.permute.xlu1 %7096  ;;  %v7092_v8 = vpop.permute.xlu0 %7091  ;;  %1932 = vmatprep.mubr.f32.mxu0 %v7568_v3  ;;  %v6446_v9 = vpack.c.bf16 %v2347_v44, %v2345_v48 }
  0xdf   :  { %v7099_v13 = vunpack.i.h.bf16 %v7097_v39  ;;  %v7098_v14 = vunpack.i.l.bf16 %v7097_v39  ;;  %v7094_v31 = vunpack.i.h.bf16 %v7092_v8  ;;  %v7093_v35 = vunpack.i.l.bf16 %v7092_v8  ;;  %2013 = vmatprep.mubr.f32.mxu1 %v7568_v3  ;;  %v6132_v8 = vld [vmem:[%s9034_s3 + $0x90] sm:$0xff] }
  0xe0   :  { %6125 = vmatmul.mubr.msk.f32.gmra.mrb[2].mxu0 %vm168_vm1, %v6119_v20  ;;  %7386 = vrot.lane.b32.xlu1 %v8229_v7, %s7571_s18 }
  0xe1   :  { %v2344_v37 = vsel %vm168_vm1, %v7098_v14, %v7083_v52  ;;  %v2346_v15 = vsel %vm168_vm1, %v7099_v13, %v7088_v47  ;;  %v2160_v23 = vsel %vm168_vm1, %v7094_v31, %v7078_v10  ;;  %v2158_v24 = vsel %vm168_vm1, %v7093_v35, %v7073_v34  ;;  %7381 = vrot.lane.b32.xlu0 %v8240_v36, %s7571_s18 }
  0xe2   :  { %v6448_v25 = vpack.c.bf16 %v2346_v15, %v2344_v37  ;;  %v6438_v60 = vpack.c.bf16 %v2160_v23, %v2158_v24  ;;  %6131 = vmatmul.mubr.msk.f32.gmra.mrb[2].mxu1 %vm168_vm1, %v6119_v20  ;;  %6447 = vmatprep.subr.bf16.mxu1 %v6446_v9  ;;  %v7107_v30 = vpop.permute.xlu1 %7106  ;;  %v7102_v63 = vpop.permute.xlu0 %7101  ;;  %v8397_v14 = vpack.i.bf16 %v7568_v3, %v8179_v16  ;;  %v6133_v16 = vld [vmem:[%s9034_s3 + $0x98] sm:$0xff] }
  0xe3   :  { %v7109_v40 = vunpack.i.h.bf16 %v7107_v30  ;;  %v7108_v41 = vunpack.i.l.bf16 %v7107_v30  ;;  %v7104_v43 = vunpack.i.h.bf16 %v7102_v63  ;;  %v7103_v45 = vunpack.i.l.bf16 %v7102_v63  ;;  %2236 = vmatprep.mubr.f32.mxu0 %v7568_v3  ;;  %2416 = vmatprep.mubr.f32.mxu1 %v7568_v3 }
  0xe4   :  { %7396 = vrot.lane.b32.xlu1 %v7568_v3, %s7571_s18  ;;  %6439 = vmatpush1.bf16.msra.mxu0 %v6438_v60  ;;  %v8417_v63 = vpack.i.bf16 %v7568_v3, %v8222_v42  ;;  %v8429_v42 = vpack.i.bf16 %v8190_v62, %v8217_v61 }
  0xe5   :  { %v2119_v0 = vsel %vm126_vm0, %v7108_v41, %v7109_v40  ;;  %v2117_v2 = vsel %vm126_vm0, %v7103_v45, %v7104_v43  ;;  %7391 = vrot.lane.b32.xlu0 %v7568_v3, %s7571_s18  ;;  %6449 = vmatpush1.bf16.msra.mxu1 %v6448_v25  ;;  %v8406_v25 = vpack.i.bf16 %v7568_v3, %v8207_v28 }
  0xe6   :  { %v6440_v18 = vpack.c.bf16 %v2119_v0, %v2117_v2  ;;  %v7117_v19 = vpop.permute.xlu1 %7116  ;;  %v7112_v33 = vpop.permute.xlu0 %7111  ;;  %v8433_v2 = vpack.i.bf16 %v8156_v29, %v8174_v49 }
  0xe7   :  { %v7119_v55 = vunpack.i.h.bf16 %v7117_v19  ;;  %v7118_v11 = vunpack.i.l.bf16 %v7117_v19  ;;  %v7114_v12 = vunpack.i.h.bf16 %v7112_v33  ;;  %v7113_v21 = vunpack.i.l.bf16 %v7112_v33  ;;  %6136 = vmatmul.mubr.msk.f32.vlgmr.msra.gmra.mrb[4].mxu0 %vm168_vm1, %v6134_v1 }
  0xe8   :  { %7406 = vrot.lane.b32.xlu1 %v8198_v26, %s7572_s19  ;;  %6442 = vmatprep.subr.msk.bf16.mxu0 %vm7887_vm4, %v6440_v18 }
  0xe9   :  { %v2123_v6 = vsel %vm126_vm0, %v7118_v11, %v7119_v55  ;;  %v2121_v10 = vsel %vm126_vm0, %v7113_v21, %v7114_v12  ;;  %7401 = vrot.lane.b32.xlu0 %v8202_v27, %s7572_s19  ;;  %6144 = vmatmul.mubr.msk.f32.vlgmr.msra.gmra.mrb[4].mxu1 %vm168_vm1, %v6134_v1 }
  0xea   :  { %v6450_v22 = vpack.c.bf16 %v2123_v6, %v2121_v10  ;;  %v7127_v34 = vpop.permute.xlu1 %7126  ;;  %v7122_v53 = vpop.permute.xlu0 %7121  ;;  %2242 = vmatprep.mubr.f32.mxu0 %v7568_v3  ;;  %2422 = vmatprep.mubr.f32.mxu1 %v7568_v3  ;;  %v6152_v6 = vld [vmem:[%s9034_s3 + $0xb0] sm:$0xff] }
  0xeb   :  { %v7129_v26 = vunpack.i.h.bf16 %v7127_v34  ;;  %v7128_v54 = vunpack.i.l.bf16 %v7127_v34  ;;  %v7124_v56 = vunpack.i.h.bf16 %v7122_v53  ;;  %v7123_v38 = vunpack.i.l.bf16 %v7122_v53  ;;  %6137 = vmatmul.mubr.msk.f32.gmra.mrb[6].mxu0 %vm168_vm1, %v6135_v51 }
  0xec   :  { %7416 = vrot.lane.b32.xlu1 %v8229_v7, %s7572_s19  ;;  %6452 = vmatprep.subr.msk.bf16.mxu1 %vm7887_vm4, %v6450_v22 }
  0xed   :  { %v2120_v27 = vsel %vm126_vm0, %v7128_v54, %v7113_v21  ;;  %v2122_v46 = vsel %vm126_vm0, %v7129_v26, %v7118_v11  ;;  %v2118_v50 = vsel %vm126_vm0, %v7124_v56, %v7108_v41  ;;  %v2116_v57 = vsel %vm126_vm0, %v7123_v38, %v7103_v45  ;;  %7411 = vrot.lane.b32.xlu0 %v8240_v36, %s7572_s19 }
  0xee   :  { %v6453_v47 = vpack.c.bf16 %v2122_v46, %v2120_v27  ;;  %v6443_v4 = vpack.c.bf16 %v2118_v50, %v2116_v57  ;;  %v7137_v52 = vpop.permute.xlu1 %7136  ;;  %v7132_v20 = vpop.permute.xlu0 %7131  ;;  %6145 = vmatmul.mubr.msk.f32.gmra.mrb[6].mxu1 %vm168_vm1, %v6135_v51  ;;  %2319 = vmatprep.mubr.f32.mxu0 %v7568_v3  ;;  %v8384_v36 = vpack.i.bf16 %v7568_v3, %v8169_v32  ;;  %v6153_v46 = vld [vmem:[%s9034_s3 + $0xb8] sm:$0xff] }
  0xef   :  { %v7139_v7 = vunpack.i.h.bf16 %v7137_v52  ;;  %v7138_v48 = vunpack.i.l.bf16 %v7137_v52  ;;  %v7134_v44 = vunpack.i.h.bf16 %v7132_v20  ;;  %v7133_v39 = vunpack.i.l.bf16 %v7132_v20  ;;  %2493 = vmatprep.mubr.f32.mxu1 %v7568_v3 }
  0xf0   :  { %7426 = vrot.lane.b32.xlu1 %v7568_v3, %s7572_s19  ;;  %6445 = vmatpush1.bf16.msk.msra.mxu0 %vm7907_vm5, %v6443_v4 }
  0xf1   :  { %v2533_v9 = vsel %vm541_vm6, %v7138_v48, %v7139_v7  ;;  %v2531_v13 = vsel %vm541_vm6, %v7133_v39, %v7134_v44  ;;  %7421 = vrot.lane.b32.xlu0 %v7568_v3, %s7572_s19  ;;  %6455 = vmatpush1.bf16.msk.msra.mxu1 %vm7907_vm5, %v6453_v47 }
  0xf2   :  { %v6456_v32 = vpack.c.bf16 %v2533_v9, %v2531_v13  ;;  %v7147_v31 = vpop.permute.xlu1 %7146  ;;  %v7142_v35 = vpop.permute.xlu0 %7141 }
  0xf3   :  { %v7149_v37 = vunpack.i.h.bf16 %v7147_v31  ;;  %v7148_v15 = vunpack.i.l.bf16 %v7147_v31  ;;  %v7144_v23 = vunpack.i.h.bf16 %v7142_v35  ;;  %v7143_v24 = vunpack.i.l.bf16 %v7142_v35  ;;  %6142 = vmatmul.mubr.msk.f32.vlgmr.msra.gmra.mrb[4].mxu0 %vm168_vm1, %v6132_v8 }
  0xf4   :  { %7436 = vrot.lane.b32.xlu1 %v8384_v36, %s7573_s20  ;;  %6458 = vmatprep.subr.msk.bf16.mxu0 %vm7970_vm9, %v6456_v32 }
  0xf5   :  { %v2537_v60 = vsel %vm541_vm6, %v7148_v15, %v7149_v37  ;;  %v2535_v30 = vsel %vm541_vm6, %v7143_v24, %v7144_v23  ;;  %7431 = vrot.lane.b32.xlu0 %v8397_v14, %s7573_s20  ;;  %6150 = vmatmul.mubr.msk.f32.vlgmr.msra.gmra.mrb[4].mxu1 %vm168_vm1, %v6132_v8  ;;  %v7553_v8 = vld [vmem:[%s9033_s1 + $0x8] sm:$0xff] }
  0xf6   :  { %v6462_v40 = vpack.c.bf16 %v2537_v60, %v2535_v30  ;;  %v7157_v28 = vpop.permute.xlu1 %7156  ;;  %v7152_v41 = vpop.permute.xlu0 %7151  ;;  %2325 = vmatprep.mubr.f32.mxu0 %v7568_v3  ;;  %2499 = vmatprep.mubr.f32.mxu1 %v7568_v3  ;;  %v7555_v60 = vld [vmem:[%s9033_s1 + $0x28] sm:$0xff] }
  0xf7   :  { %v7159_v43 = vunpack.i.h.bf16 %v7157_v28  ;;  %v7158_v45 = vunpack.i.l.bf16 %v7157_v28  ;;  %v7154_v1 = vunpack.i.h.bf16 %v7152_v41  ;;  %v7153_v0 = vunpack.i.l.bf16 %v7152_v41  ;;  %6143 = vmatmul.mubr.msk.f32.gmra.mrb[6].mxu0 %vm168_vm1, %v6133_v16 }
  0xf8   :  { %7446 = vrot.lane.b32.xlu1 %v8406_v25, %s7573_s20  ;;  %6464 = vmatprep.subr.msk.bf16.mxu1 %vm7970_vm9, %v6462_v40 }
  0xf9   :  { %v2534_v18 = vsel %vm541_vm6, %v7158_v45, %v7143_v24  ;;  %v2536_v19 = vsel %vm541_vm6, %v7159_v43, %v7148_v15  ;;  %v2532_v33 = vsel %vm541_vm6, %v7154_v1, %v7138_v48  ;;  %v2530_v55 = vsel %vm541_vm6, %v7153_v0, %v7133_v39  ;;  %7441 = vrot.lane.b32.xlu0 %v8417_v63, %s7573_s20  ;;  %v7552_v39 = vld [vmem:[%s9033_s1 + $0x18] sm:$0xff]  ;;  %v6166_v45 = vld [vmem:[%s9034_s3 + $0xc0] sm:$0xff] }
  0xfa   :  { %v6465_v11 = vpack.c.bf16 %v2536_v19, %v2534_v18  ;;  %v6459_v12 = vpack.c.bf16 %v2532_v33, %v2530_v55  ;;  %v7167_v21 = vpop.permute.xlu1 %7166  ;;  %v7162_v62 = vpop.permute.xlu0 %7161  ;;  %6151 = vmatmul.mubr.msk.f32.gmra.mrb[6].mxu1 %vm168_vm1, %v6133_v16  ;;  %2627 = vmatprep.mubr.f32.mxu0 %v7568_v3  ;;  %v6480_v9 = vpack.c.bf16 %v7552_v39, %v7553_v8  ;;  %v7554_v16 = vld [vmem:[%s9033_s1 + $0x38] sm:$0xff]  ;;  %v7556_v18 = vld [vmem:[%s9033_s1 + $0x10] sm:$0xff]  ;;  %v7557_v19 = vld [vmem:[%s9033_s1] sm:$0xff] }
  0xfb   :  { %v7169_v29 = vunpack.i.h.bf16 %v7167_v21  ;;  %v7168_v49 = vunpack.i.l.bf16 %v7167_v21  ;;  %v7164_v61 = vunpack.i.h.bf16 %v7162_v62  ;;  %v7163_v51 = vunpack.i.l.bf16 %v7162_v62  ;;  %2708 = vmatprep.mubr.f32.mxu1 %v7568_v3  ;;  %v7558_v21 = vld [vmem:[%s9033_s1 + $0x30] sm:$0xff]  ;;  %v7559_v62 = vld [vmem:[%s9033_s1 + $0x20] sm:$0xff] }
  0xfc   :  { %7456 = vrot.lane.b32.xlu1 %v8429_v42, %s7573_s20  ;;  %6461 = vmatpush1.bf16.msk.msra.mxu0 %vm7981_vm10, %v6459_v12  ;;  %v6484_v30 = vpack.c.bf16 %v7554_v16, %v7555_v60  ;;  %v6482_v33 = vpack.c.bf16 %v7556_v18, %v7557_v19  ;;  %v6186_v19 = vld [vmem:[%s9034_s3 + $0xe0] sm:$0xff] }
  0xfd   :  { %v2752_v10 = vsel %vm761_vm11, %v7168_v49, %v7169_v29  ;;  %v2750_v22 = vsel %vm761_vm11, %v7163_v51, %v7164_v61  ;;  %7451 = vrot.lane.b32.xlu0 %v8433_v2, %s7573_s20  ;;  %6467 = vmatpush1.bf16.msk.msra.mxu1 %vm7981_vm10, %v6465_v11  ;;  %v6486_v29 = vpack.c.bf16 %v7558_v21, %v7559_v62 }
  0xfe   :  { %v6468_v34 = vpack.c.bf16 %v2752_v10, %v2750_v22  ;;  %v7177_v53 = vpop.permute.xlu1 %7176  ;;  %v7172_v26 = vpop.permute.xlu0 %7171 }
  0xff   :  { %v7179_v54 = vunpack.i.h.bf16 %v7177_v53  ;;  %v7178_v56 = vunpack.i.l.bf16 %v7177_v53  ;;  %v7174_v38 = vunpack.i.h.bf16 %v7172_v26  ;;  %v7173_v27 = vunpack.i.l.bf16 %v7172_v26  ;;  %6158 = vmatmul.mubr.msk.f32.vlgmr.msra.gmra.mrb[4].mxu0 %vm168_vm1, %v6152_v6 }
 0x100   :  { %7466 = vrot.lane.b32.xlu1 %v8384_v36, %s7574_s21  ;;  %6470 = vmatprep.subr.msk.bf16.mxu0 %vm7887_vm4, %v6468_v34  ;;  %v6167_v34 = vld [vmem:[%s9034_s3 + $0xc8] sm:$0xff] }
 0x101   :  { %v2756_v50 = vsel %vm761_vm11, %v7178_v56, %v7179_v54  ;;  %v2754_v57 = vsel %vm761_vm11, %v7173_v27, %v7174_v38  ;;  %7461 = vrot.lane.b32.xlu0 %v8397_v14, %s7574_s21  ;;  %6164 = vmatmul.mubr.msk.f32.vlgmr.msra.gmra.mrb[4].mxu1 %vm168_vm1, %v6152_v6 }
 0x102   :  { %v6474_v47 = vpack.c.bf16 %v2756_v50, %v2754_v57  ;;  %v7187_v4 = vpop.permute.xlu1 %7186  ;;  %v7182_v52 = vpop.permute.xlu0 %7181  ;;  %2633 = vmatprep.mubr.f32.mxu0 %v7568_v3  ;;  %2714 = vmatprep.mubr.f32.mxu1 %v7568_v3 }
 0x103   :  { %v7189_v20 = vunpack.i.h.bf16 %v7187_v4  ;;  %v7188_v7 = vunpack.i.l.bf16 %v7187_v4  ;;  %v7184_v48 = vunpack.i.h.bf16 %v7182_v52  ;;  %v7183_v44 = vunpack.i.l.bf16 %v7182_v52  ;;  %6159 = vmatmul.mubr.msk.f32.gmra.mrb[6].mxu0 %vm168_vm1, %v6153_v46  ;;  %v6180_v52 = vld [vmem:[%s9034_s3 + $0xd0] sm:$0xff] }
 0x104   :  { %7476 = vrot.lane.b32.xlu1 %v8406_v25, %s7574_s21  ;;  %6476 = vmatprep.subr.msk.bf16.mxu1 %vm7887_vm4, %v6474_v47 }
 0x105   :  { %v2753_v13 = vsel %vm761_vm11, %v7188_v7, %v7173_v27  ;;  %v2755_v32 = vsel %vm761_vm11, %v7189_v20, %v7178_v56  ;;  %v2751_v31 = vsel %vm761_vm11, %v7184_v48, %v7168_v49  ;;  %v2749_v35 = vsel %vm761_vm11, %v7183_v44, %v7163_v51  ;;  %7471 = vrot.lane.b32.xlu0 %v8417_v63, %s7574_s21 }
 0x106   :  { %v6477_v37 = vpack.c.bf16 %v2755_v32, %v2753_v13  ;;  %v6471_v15 = vpack.c.bf16 %v2751_v31, %v2749_v35  ;;  %v7197_v23 = vpop.permute.xlu1 %7196  ;;  %v7192_v24 = vpop.permute.xlu0 %7191  ;;  %6165 = vmatmul.mubr.msk.f32.gmra.mrb[6].mxu1 %vm168_vm1, %v6153_v46  ;;  %2846 = vmatprep.mubr.f32.mxu0 %v7568_v3 }
 0x107   :  { %v7199_v40 = vunpack.i.h.bf16 %v7197_v23  ;;  %v7198_v28 = vunpack.i.l.bf16 %v7197_v23  ;;  %v7194_v41 = vunpack.i.h.bf16 %v7192_v24  ;;  %v7193_v43 = vunpack.i.l.bf16 %v7192_v24  ;;  %2927 = vmatprep.mubr.f32.mxu1 %v7568_v3  ;;  %v6181_v23 = vld [vmem:[%s9034_s3 + $0xd8] sm:$0xff] }
 0x108   :  { %7486 = vrot.lane.b32.xlu1 %v8429_v42, %s7574_s21  ;;  %6473 = vmatpush1.bf16.msk.msra.mxu0 %vm7907_vm5, %v6471_v15 }
 0x109   :  { %v3166_v1 = vsel %vm1176_vm12, %v7198_v28, %v7199_v40  ;;  %v3164_v0 = vsel %vm1176_vm12, %v7193_v43, %v7194_v41  ;;  %7481 = vrot.lane.b32.xlu0 %v8433_v2, %s7574_s21  ;;  %6479 = vmatpush1.bf16.msk.msra.mxu1 %vm7907_vm5, %v6477_v37 }
 0x10a   :  { %v6488_v55 = vpack.c.bf16 %v3166_v1, %v3164_v0  ;;  %v7207_v11 = vpop.permute.xlu1 %7206  ;;  %v7202_v12 = vpop.permute.xlu0 %7201  ;;  %6481 = vmatprep.subr.bf16.mxu0 %v6480_v9  ;;  %6485 = vmatprep.subr.bf16.mxu1 %v6484_v30 }
 0x10b   :  { %v7209_v49 = vunpack.i.h.bf16 %v7207_v11  ;;  %v7208_v61 = vunpack.i.l.bf16 %v7207_v11  ;;  %v7204_v51 = vunpack.i.h.bf16 %v7202_v12  ;;  %v7203_v6 = vunpack.i.l.bf16 %v7202_v12  ;;  %6172 = vmatmul.mubr.msk.f32.vlgmr.msra.gmra.mrb[4].mxu0 %vm168_vm1, %v6166_v45 }
 0x10c   :  { %7496 = vrot.lane.b32.xlu1 %v8384_v36, %s7575_s22  ;;  %6178 = vmatmul.mubr.msk.f32.vlgmr.msra.gmra.mrb[4].mxu1 %vm168_vm1, %v6166_v45 }
 0x10d   :  { %v3170_v10 = vsel %vm1176_vm12, %v7208_v61, %v7209_v49  ;;  %v3168_v22 = vsel %vm1176_vm12, %v7203_v6, %v7204_v51  ;;  %7491 = vrot.lane.b32.xlu0 %v8397_v14, %s7575_s22  ;;  %6483 = vmatpush1.bf16.msra.mxu0 %v6482_v33 }
 0x10e   :  { %v6494_v53 = vpack.c.bf16 %v3170_v10, %v3168_v22  ;;  %6490 = vmatprep.subr.msk.bf16.mxu0 %vm7970_vm9, %v6488_v55  ;;  %v7217_v26 = vpop.permute.xlu1 %7216  ;;  %v7212_v54 = vpop.permute.xlu0 %7211  ;;  %2852 = vmatprep.mubr.f32.mxu0 %v7568_v3  ;;  %v2025_v22 = vld [vmem:[%s9036_s4 + $0x8] sm:$0xff] }
 0x10f   :  { %v7219_v56 = vunpack.i.h.bf16 %v7217_v26  ;;  %v7218_v38 = vunpack.i.l.bf16 %v7217_v26  ;;  %v7214_v27 = vunpack.i.h.bf16 %v7212_v54  ;;  %v7213_v46 = vunpack.i.l.bf16 %v7212_v54  ;;  %2933 = vmatprep.mubr.f32.mxu1 %v7568_v3  ;;  %6487 = vmatpush1.bf16.msra.mxu1 %v6486_v29 }
 0x110   :  { %7506 = vrot.lane.b32.xlu1 %v8406_v25, %s7575_s22  ;;  %6173 = vmatmul.mubr.msk.f32.gmra.mrb[6].mxu0 %vm168_vm1, %v6167_v34 }
 0x111   :  { %v3167_v50 = vsel %vm1176_vm12, %v7218_v38, %v7203_v6  ;;  %v3169_v57 = vsel %vm1176_vm12, %v7219_v56, %v7208_v61  ;;  %v3165_v47 = vsel %vm1176_vm12, %v7214_v27, %v7198_v28  ;;  %v3163_v4 = vsel %vm1176_vm12, %v7213_v46, %v7193_v43  ;;  %7501 = vrot.lane.b32.xlu0 %v8417_v63, %s7575_s22  ;;  %v6200_v27 = vld [vmem:[%s9034_s3 + $0xf0] sm:$0xff] }
 0x112   :  { %v6497_v20 = vpack.c.bf16 %v3169_v57, %v3167_v50  ;;  %v6491_v7 = vpack.c.bf16 %v3165_v47, %v3163_v4  ;;  %6179 = vmatmul.mubr.msk.f32.gmra.mrb[6].mxu1 %vm168_vm1, %v6167_v34  ;;  %6496 = vmatprep.subr.msk.bf16.mxu1 %vm7970_vm9, %v6494_v53  ;;  %v7227_v48 = vpop.permute.xlu1 %7226  ;;  %v7222_v44 = vpop.permute.xlu0 %7221  ;;  %v6234_v57 = vld [vmem:[%s9036_s4 + $0x10] sm:$0xff] }
 0x113   :  { %v7229_v39 = vunpack.i.h.bf16 %v7227_v48  ;;  %v7228_v8 = vunpack.i.l.bf16 %v7227_v48  ;;  %v7224_v9 = vunpack.i.h.bf16 %v7222_v44  ;;  %v7223_v13 = vunpack.i.l.bf16 %v7222_v44  ;;  %3017 = vmatprep.mubr.f32.mxu0 %v7568_v3  ;;  %3098 = vmatprep.mubr.f32.mxu1 %v7568_v3 }
 0x114   :  { %7516 = vrot.lane.b32.xlu1 %v8429_v42, %s7575_s22  ;;  %6182 = vmatmul.mubr.msk.f32.vlgmr.msra.gmra.mrb[4].mxu0 %vm168_vm1, %v6180_v52 }
 0x115   :  { %v3385_v32 = vsel %vm1396_vm13, %v7228_v8, %v7229_v39  ;;  %v3383_v31 = vsel %vm1396_vm13, %v7223_v13, %v7224_v9  ;;  %7511 = vrot.lane.b32.xlu0 %v8433_v2, %s7575_s22  ;;  %6493 = vmatpush1.bf16.msk.msra.mxu0 %vm7981_vm10, %v6491_v7 }
 0x116   :  { %v6500_v35 = vpack.c.bf16 %v3385_v32, %v3383_v31  ;;  %6184 = vmatmul.mubr.msk.f32.vlgmr.msra.gmra.mrb[4].mxu1 %vm168_vm1, %v6180_v52  ;;  %v7237_v37 = vpop.permute.xlu1 %7236  ;;  %v7232_v15 = vpop.permute.xlu0 %7231  ;;  %3023 = vmatprep.mubr.f32.mxu0 %v7568_v3 }
 0x117   :  { %6499 = vmatpush1.bf16.msk.msra.mxu1 %vm7981_vm10, %v6497_v20  ;;  %v7239_v24 = vunpack.i.h.bf16 %v7237_v37  ;;  %v7238_v16 = vunpack.i.l.bf16 %v7237_v37  ;;  %v7234_v60 = vunpack.i.h.bf16 %v7232_v15  ;;  %v7233_v30 = vunpack.i.l.bf16 %v7232_v15  ;;  %3104 = vmatprep.mubr.f32.mxu1 %v7568_v3  ;;  %v6235_v20 = vld [vmem:[%s9036_s4 + $0x18] sm:$0xff] }
 0x118   :  { %7526 = vrot.lane.b32.xlu1 %v8384_v36, %s7576_s23  ;;  %6502 = vmatprep.subr.msk.bf16.mxu0 %vm7887_vm4, %v6500_v35 }
 0x119   :  { %v3389_v40 = vsel %vm1396_vm13, %v7238_v16, %v7239_v24  ;;  %v3387_v28 = vsel %vm1396_vm13, %v7233_v30, %v7234_v60  ;;  %7521 = vrot.lane.b32.xlu0 %v8397_v14, %s7576_s23  ;;  %6183 = vmatmul.mubr.msk.f32.gmra.mrb[6].mxu0 %vm168_vm1, %v6181_v23 }
 0x11a   :  { %v6506_v41 = vpack.c.bf16 %v3389_v40, %v3387_v28  ;;  %v7247_v43 = vpop.permute.xlu1 %7246  ;;  %v7242_v45 = vpop.permute.xlu0 %7241  ;;  %6185 = vmatmul.mubr.msk.f32.gmra.mrb[6].mxu1 %vm168_vm1, %v6181_v23  ;;  %3260 = vmatprep.mubr.f32.mxu0 %v7568_v3  ;;  %v6214_v40 = vld [vmem:[%s9034_s3 + $0x100] sm:$0xff] }
 0x11b   :  { %v7249_v36 = vunpack.i.h.bf16 %v7247_v43  ;;  %v7248_v1 = vunpack.i.l.bf16 %v7247_v43  ;;  %v7244_v0 = vunpack.i.h.bf16 %v7242_v45  ;;  %v7243_v18 = vunpack.i.l.bf16 %v7242_v45  ;;  %3341 = vmatprep.mubr.f32.mxu1 %v7568_v3 }
 0x11c   :  { %7536 = vrot.lane.b32.xlu1 %v8406_v25, %s7576_s23  ;;  %6508 = vmatprep.subr.msk.bf16.mxu1 %vm7887_vm4, %v6506_v41 }
 0x11d   :  { %v3386_v14 = vsel %vm1396_vm13, %v7248_v1, %v7233_v30  ;;  %v3388_v33 = vsel %vm1396_vm13, %v7249_v36, %v7238_v16  ;;  %v3384_v55 = vsel %vm1396_vm13, %v7244_v0, %v7228_v8  ;;  %v3382_v11 = vsel %vm1396_vm13, %v7243_v18, %v7223_v13  ;;  %7531 = vrot.lane.b32.xlu0 %v8417_v63, %s7576_s23  ;;  %v6187_v63 = vld [vmem:[%s9034_s3 + $0xe8] sm:$0xff]  ;;  %v6201_v8 = vld [vmem:[%s9034_s3 + $0xf8] sm:$0xff] }
 0x11e   :  { %v6509_v12 = vpack.c.bf16 %v3388_v33, %v3386_v14  ;;  %v6503_v21 = vpack.c.bf16 %v3384_v55, %v3382_v11  ;;  %v7257_v62 = vpop.permute.xlu1 %7256  ;;  %v7252_v29 = vpop.permute.xlu0 %7251  ;;  %6192 = vmatmul.mubr.msk.f32.vlgmr.msra.gmra.mrb[4].mxu0 %vm168_vm1, %v6186_v19  ;;  %6198 = vmatmul.mubr.msk.f32.vlgmr.msra.gmra.mrb[4].mxu1 %vm168_vm1, %v6186_v19  ;;  %v6215_v14 = vld [vmem:[%s9034_s3 + $0x108] sm:$0xff] }
 0x11f   :  { %v7259_v25 = vunpack.i.h.bf16 %v7257_v62  ;;  %v7258_v49 = vunpack.i.l.bf16 %v7257_v62  ;;  %v7254_v61 = vunpack.i.h.bf16 %v7252_v29  ;;  %v7253_v51 = vunpack.i.l.bf16 %v7252_v29  ;;  %3266 = vmatprep.mubr.f32.mxu0 %v7568_v3  ;;  %3347 = vmatprep.mubr.f32.mxu1 %v7568_v3 }
 0x120   :  { %7546 = vrot.lane.b32.xlu1 %v8429_v42, %s7576_s23  ;;  %6505 = vmatpush1.bf16.msk.msra.mxu0 %vm7907_vm5, %v6503_v21 }
 0x121   :  { %7541 = vrot.lane.b32.xlu0 %v8433_v2, %s7576_s23  ;;  %6511 = vmatpush1.bf16.msk.msra.mxu1 %vm7907_vm5, %v6509_v12  ;;  %v3593_v6 = vsel %vm1607_vm14, %v7253_v51, %v7254_v61  ;;  %v3595_v10 = vsel %vm1607_vm14, %v7258_v49, %v7259_v25  ;;  %v2024_v2 = vld [vmem:[%s9036_s4] sm:$0xff] }
 0x122   :  { %v7267_v34 = vpop.permute.xlu1 %7266  ;;  %v7262_v53 = vpop.permute.xlu0 %7261  ;;  %v6512_v42 = vpack.c.bf16 %v3595_v10, %v3593_v6  ;;  %6193 = vmatmul.mubr.msk.f32.gmra.mrb[6].mxu0 %vm168_vm1, %v6187_v63  ;;  %6199 = vmatmul.mubr.msk.f32.gmra.mrb[6].mxu1 %vm168_vm1, %v6187_v63 }
 0x123   :  { %v7269_v26 = vunpack.i.h.bf16 %v7267_v34  ;;  %v7268_v54 = vunpack.i.l.bf16 %v7267_v34  ;;  %v7264_v56 = vunpack.i.h.bf16 %v7262_v53  ;;  %v7263_v38 = vunpack.i.l.bf16 %v7262_v53  ;;  %3479 = vmatprep.mubr.f32.mxu0 %v7568_v3  ;;  %3560 = vmatprep.mubr.f32.mxu1 %v7568_v3 }
 0x124   :  { %6513 = vmatprep.subr.bf16.mxu0 %v6512_v42  ;;  %2033 = vperm.xlu1 %7551, %v2025_v22  }
 0x125   :  { %v3700_v46 = vsel %vm1607_vm14, %v7263_v38, %v7264_v56  ;;  %v3702_v50 = vsel %vm1607_vm14, %v7268_v54, %v7269_v26  ;;  %2028 = vperm.xlu0 %7550, %v2024_v2   ;;  %v6220_v56 = vld [vmem:[%s9034_s3 + $0x110] sm:$0xff] }
 0x126   :  { %v7277_v47 = vpop.permute.xlu1 %7276  ;;  %v7272_v4 = vpop.permute.xlu0 %7271  ;;  %v6516_v52 = vpack.c.bf16 %v3702_v50, %v3700_v46  ;;  %6206 = vmatmul.mubr.msk.f32.vlgmr.msra.gmra.mrb[4].mxu0 %vm168_vm1, %v6200_v27  ;;  %6212 = vmatmul.mubr.msk.f32.vlgmr.msra.gmra.mrb[4].mxu1 %vm168_vm1, %v6200_v27  ;;  %v6338_v46 = vld [vmem:[%s9036_s4 + $0x20] sm:$0xff]  ;;  %v6339_v50 = vld [vmem:[%s9036_s4 + $0x28] sm:$0xff] }
 0x127   :  { %v7279_v7 = vunpack.i.h.bf16 %v7277_v47  ;;  %v7278_v48 = vunpack.i.l.bf16 %v7277_v47  ;;  %v7274_v44 = vunpack.i.h.bf16 %v7272_v4  ;;  %v7273_v39 = vunpack.i.l.bf16 %v7272_v4  ;;  %3485 = vmatprep.mubr.f32.mxu0 %v7568_v3  ;;  %3566 = vmatprep.mubr.f32.mxu1 %v7568_v3 }
 0x128   :  { %6517 = vmatprep.subr.bf16.mxu1 %v6516_v52  ;;  %4012 = vperm.xlu1 %7551, %v6234_v57  }
 0x129   :  { %v3699_v9 = vsel %vm1607_vm14, %v7278_v48, %v7263_v38  ;;  %v3701_v13 = vsel %vm1607_vm14, %v7279_v7, %v7268_v54  ;;  %v3594_v32 = vsel %vm1607_vm14, %v7274_v44, %v7258_v49  ;;  %v3592_v31 = vsel %vm1607_vm14, %v7273_v39, %v7253_v51  ;;  %4017 = vperm.xlu0 %7550, %v6235_v20   ;;  %v6221_v44 = vld [vmem:[%s9034_s3 + $0x118] sm:$0xff] }
 0x12a   :  { %v6518_v35 = vpack.c.bf16 %v3701_v13, %v3699_v9  ;;  %v6514_v37 = vpack.c.bf16 %v3594_v32, %v3592_v31  ;;  %v7287_v15 = vpop.permute.xlu1 %7286  ;;  %v7282_v23 = vpop.permute.xlu0 %7281  ;;  %6207 = vmatmul.mubr.msk.f32.gmra.mrb[6].mxu0 %vm168_vm1, %v6201_v8  ;;  %6213 = vmatmul.mubr.msk.f32.gmra.mrb[6].mxu1 %vm168_vm1, %v6201_v8 }
 0x12b   :  { %v7289_v24 = vunpack.i.h.bf16 %v7287_v15  ;;  %v7288_v16 = vunpack.i.l.bf16 %v7287_v15  ;;  %v7284_v60 = vunpack.i.h.bf16 %v7282_v23  ;;  %v7283_v30 = vunpack.i.l.bf16 %v7282_v23  ;;  %3670 = vmatprep.mubr.f32.mxu0 %v7568_v3  ;;  %3771 = vmatprep.mubr.f32.mxu1 %v7568_v3 }
 0x12c   :  { %6515 = vmatpush1.bf16.msra.mxu0 %v6514_v37  ;;  %6519 = vmatpush1.bf16.msra.mxu1 %v6518_v35 }
 0x12d   :  { %v3815_v28 = vsel %vm1828_vm15, %v7288_v16, %v7289_v24  ;;  %v3813_v41 = vsel %vm1828_vm15, %v7283_v30, %v7284_v60  ;;  %5996 = vperm.xlu1 %7551, %v6338_v46   ;;  %6001 = vperm.xlu0 %7550, %v6339_v50  }
 0x12e   :  { %v6520_v43 = vpack.c.bf16 %v3815_v28, %v3813_v41  ;;  %v7297_v45 = vpop.permute.xlu1 %7296  ;;  %v7292_v36 = vpop.permute.xlu0 %7291 }
 0x12f   :  { %v7299_v1 = vunpack.i.h.bf16 %v7297_v45  ;;  %v7298_v0 = vunpack.i.l.bf16 %v7297_v45  ;;  %v7294_v18 = vunpack.i.h.bf16 %v7292_v36  ;;  %v7293_v19 = vunpack.i.l.bf16 %v7292_v36  ;;  %6216 = vmatmul.mubr.msk.f32.vlgmr.msra.gmra.mrb[4].mxu0 %vm168_vm1, %v6214_v40  ;;  %6218 = vmatmul.mubr.msk.f32.vlgmr.msra.gmra.mrb[4].mxu1 %vm168_vm1, %v6214_v40 }
 0x130   :  { %6522 = vmatprep.subr.msk.bf16.mxu0 %vm7970_vm9, %v6520_v43  ;;  %3676 = vmatprep.mubr.f32.mxu0 %v7568_v3 }
 0x131   :  { %v3819_v33 = vsel %vm1828_vm15, %v7298_v0, %v7299_v1  ;;  %v3817_v55 = vsel %vm1828_vm15, %v7293_v19, %v7294_v18  ;;  %3777 = vmatprep.mubr.f32.mxu1 %v7568_v3 }
 0x132   :  { %v6526_v11 = vpack.c.bf16 %v3819_v33, %v3817_v55  ;;  %v7307_v12 = vpop.permute.xlu1 %7306  ;;  %v7302_v21 = vpop.permute.xlu0 %7301 }
 0x133   :  { %v7309_v62 = vunpack.i.h.bf16 %v7307_v12  ;;  %v7308_v29 = vunpack.i.l.bf16 %v7307_v12  ;;  %v7304_v25 = vunpack.i.h.bf16 %v7302_v21  ;;  %v7303_v49 = vunpack.i.l.bf16 %v7302_v21  ;;  %6217 = vmatmul.mubr.msk.f32.gmra.mrb[6].mxu0 %vm168_vm1, %v6215_v14  ;;  %6219 = vmatmul.mubr.msk.f32.gmra.mrb[6].mxu1 %vm168_vm1, %v6215_v14 }
 0x134   :  { %6528 = vmatprep.subr.msk.bf16.mxu1 %vm7970_vm9, %v6526_v11  ;;  %3909 = vmatprep.mubr.f32.mxu0 %v7568_v3 }
 0x135   :  { %v3816_v61 = vsel %vm1828_vm15, %v7308_v29, %v7293_v19  ;;  %v3818_v51 = vsel %vm1828_vm15, %v7309_v62, %v7298_v0  ;;  %v3814_v63 = vsel %vm1828_vm15, %v7304_v25, %v7288_v16  ;;  %v3812_v6 = vsel %vm1828_vm15, %v7303_v49, %v7283_v30  ;;  %3990 = vmatprep.mubr.f32.mxu1 %v7568_v3  ;;  %v6238_v0 = vld [vmem:[%s9034_s3 + $0x130] sm:$0xff]  ;;  %v6239_v29 = vld [vmem:[%s9034_s3 + $0x138] sm:$0xff] }
 0x136   :  { %v6529_v10 = vpack.c.bf16 %v3818_v51, %v3816_v61  ;;  %v6523_v22 = vpack.c.bf16 %v3814_v63, %v3812_v6  ;;  %v7317_v34 = vpop.permute.xlu1 %7316  ;;  %v7312_v53 = vpop.permute.xlu0 %7311 }
 0x137   :  { %v7319_v42 = vunpack.i.h.bf16 %v7317_v34  ;;  %v7318_v2 = vunpack.i.l.bf16 %v7317_v34  ;;  %v7314_v26 = vunpack.i.h.bf16 %v7312_v53  ;;  %v7313_v54 = vunpack.i.l.bf16 %v7312_v53 }
 0x138   :  { %6525 = vmatpush1.bf16.msk.msra.mxu0 %vm7981_vm10, %v6523_v22  ;;  %6531 = vmatpush1.bf16.msk.msra.mxu1 %vm7981_vm10, %v6529_v10 }
 0x139   :  { %v4143_v38 = vsel %vm168_vm1, %v7313_v54, %v7314_v26  ;;  %v4145_v27 = vsel %vm168_vm1, %v7318_v2, %v7319_v42 }
 0x13a   :  { %v7327_v57 = vpop.permute.xlu1 %7326  ;;  %v7322_v47 = vpop.permute.xlu0 %7321  ;;  %v6532_v4 = vpack.c.bf16 %v4145_v27, %v4143_v38 }
 0x13b   :  { %v7329_v52 = vunpack.i.h.bf16 %v7327_v57  ;;  %v7328_v20 = vunpack.i.l.bf16 %v7327_v57  ;;  %v7324_v7 = vunpack.i.h.bf16 %v7322_v47  ;;  %v7323_v48 = vunpack.i.l.bf16 %v7322_v47  ;;  %6226 = vmatmul.mubr.msk.f32.vlgmr.msra.gmra.mrb[4].mxu0 %vm168_vm1, %v6220_v56  ;;  %6232 = vmatmul.mubr.msk.f32.vlgmr.msra.gmra.mrb[4].mxu1 %vm168_vm1, %v6220_v56 }
 0x13c   :  { %6533 = vmatprep.subr.bf16.mxu0 %v6532_v4  ;;  %3915 = vmatprep.mubr.f32.mxu0 %v7568_v3  ;;  %v6236_v4 = vld [vmem:[%s9034_s3 + $0x120] sm:$0xff] }
 0x13d   :  { %3996 = vmatprep.mubr.f32.mxu1 %v7568_v3  ;;  %v4329_v39 = vsel %vm168_vm1, %v7323_v48, %v7324_v7  ;;  %v4331_v8 = vsel %vm168_vm1, %v7328_v20, %v7329_v52 }
 0x13e   :  { %v7337_v9 = vpop.permute.xlu1 %7336  ;;  %v7332_v13 = vpop.permute.xlu0 %7331  ;;  %v6542_v32 = vpack.c.bf16 %v4331_v8, %v4329_v39 }
 0x13f   :  { %v7339_v31 = vunpack.i.h.bf16 %v7337_v9  ;;  %v7338_v35 = vunpack.i.l.bf16 %v7337_v9  ;;  %v7334_v37 = vunpack.i.h.bf16 %v7332_v13  ;;  %v7333_v15 = vunpack.i.l.bf16 %v7332_v13  ;;  %6227 = vmatmul.mubr.msk.f32.gmra.mrb[6].mxu0 %vm168_vm1, %v6221_v44  ;;  %6233 = vmatmul.mubr.msk.f32.gmra.mrb[6].mxu1 %vm168_vm1, %v6221_v44 }
 0x140   :  { %6543 = vmatprep.subr.bf16.mxu1 %v6542_v32  ;;  %4220 = vmatprep.mubr.f32.mxu0 %v7568_v3  ;;  %v6237_v32 = vld [vmem:[%s9034_s3 + $0x128] sm:$0xff] }
 0x141   :  { %v4328_v23 = vsel %vm168_vm1, %v7338_v35, %v7323_v48  ;;  %v4330_v24 = vsel %vm168_vm1, %v7339_v31, %v7328_v20  ;;  %v4144_v16 = vsel %vm168_vm1, %v7334_v37, %v7318_v2  ;;  %v4142_v60 = vsel %vm168_vm1, %v7333_v15, %v7313_v54  ;;  %4400 = vmatprep.mubr.f32.mxu1 %v7568_v3 }
 0x142   :  { %v6544_v30 = vpack.c.bf16 %v4330_v24, %v4328_v23  ;;  %v6534_v40 = vpack.c.bf16 %v4144_v16, %v4142_v60  ;;  %v7347_v28 = vpop.permute.xlu1 %7346  ;;  %v7342_v41 = vpop.permute.xlu0 %7341 }
 0x143   :  { %v7349_v43 = vunpack.i.h.bf16 %v7347_v28  ;;  %v7348_v45 = vunpack.i.l.bf16 %v7347_v28  ;;  %v7344_v36 = vunpack.i.h.bf16 %v7342_v41  ;;  %v7343_v1 = vunpack.i.l.bf16 %v7342_v41 }
 0x144   :  { %6535 = vmatpush1.bf16.msra.mxu0 %v6534_v40  ;;  %6545 = vmatpush1.bf16.msra.mxu1 %v6544_v30 }
 0x145   :  { %v4103_v18 = vsel %vm126_vm0, %v7348_v45, %v7349_v43  ;;  %v4101_v19 = vsel %vm126_vm0, %v7343_v1, %v7344_v36 }
 0x146   :  { %v6536_v14 = vpack.c.bf16 %v4103_v18, %v4101_v19  ;;  %v7357_v33 = vpop.permute.xlu1 %7356  ;;  %v7352_v55 = vpop.permute.xlu0 %7351 }
 0x147   :  { %v7359_v11 = vunpack.i.h.bf16 %v7357_v33  ;;  %v7358_v12 = vunpack.i.l.bf16 %v7357_v33  ;;  %v7354_v21 = vunpack.i.h.bf16 %v7352_v55  ;;  %v7353_v62 = vunpack.i.l.bf16 %v7352_v55  ;;  %6240 = vmatmul.mubr.msk.f32.vlgmr.msra.gmra.mrb[8].mxu0 %vm168_vm1, %v6238_v0  ;;  %6248 = vmatmul.mubr.msk.f32.vlgmr.msra.gmra.mrb[8].mxu1 %vm168_vm1, %v6238_v0  ;;  %v6256_v55 = vld [vmem:[%s9034_s3 + $0x140] sm:$0xff] }
 0x148   :  { %6538 = vmatprep.subr.msk.bf16.mxu0 %vm7887_vm4, %v6536_v14  ;;  %4226 = vmatprep.mubr.f32.mxu0 %v7568_v3 }
 0x149   :  { %v4107_v25 = vsel %vm126_vm0, %v7358_v12, %v7359_v11  ;;  %v4105_v49 = vsel %vm126_vm0, %v7353_v62, %v7354_v21  ;;  %4406 = vmatprep.mubr.f32.mxu1 %v7568_v3 }
 0x14a   :  { %v6546_v61 = vpack.c.bf16 %v4107_v25, %v4105_v49  ;;  %v7367_v51 = vpop.permute.xlu1 %7366  ;;  %v7362_v63 = vpop.permute.xlu0 %7361 }
 0x14b   :  { %v7369_v6 = vunpack.i.h.bf16 %v7367_v51  ;;  %v7368_v10 = vunpack.i.l.bf16 %v7367_v51  ;;  %v7364_v22 = vunpack.i.h.bf16 %v7362_v63  ;;  %v7363_v34 = vunpack.i.l.bf16 %v7362_v63  ;;  %6241 = vmatmul.mubr.msk.f32.gmra.mrb[10].mxu0 %vm168_vm1, %v6239_v29  ;;  %6249 = vmatmul.mubr.msk.f32.gmra.mrb[10].mxu1 %vm168_vm1, %v6239_v29  ;;  %v6257_v63 = vld [vmem:[%s9034_s3 + $0x148] sm:$0xff] }
 0x14c   :  { %6548 = vmatprep.subr.msk.bf16.mxu1 %vm7887_vm4, %v6546_v61  ;;  %4303 = vmatprep.mubr.f32.mxu0 %v7568_v3 }
 0x14d   :  { %v4104_v53 = vsel %vm126_vm0, %v7368_v10, %v7353_v62  ;;  %v4106_v42 = vsel %vm126_vm0, %v7369_v6, %v7358_v12  ;;  %v4102_v2 = vsel %vm126_vm0, %v7364_v22, %v7348_v45  ;;  %v4100_v26 = vsel %vm126_vm0, %v7363_v34, %v7343_v1  ;;  %4477 = vmatprep.mubr.f32.mxu1 %v7568_v3 }
 0x14e   :  { %v6549_v54 = vpack.c.bf16 %v4106_v42, %v4104_v53  ;;  %v6539_v56 = vpack.c.bf16 %v4102_v2, %v4100_v26  ;;  %v7377_v38 = vpop.permute.xlu1 %7376 }
 0x14f   :  { %v7379_v27 = vunpack.i.h.bf16 %v7377_v38  ;;  %v7378_v46 = vunpack.i.l.bf16 %v7377_v38  ;;  %v7372_v50 = vpop.permute.xlu0 %7371 }
 0x150   :  { %v7374_v57 = vunpack.i.h.bf16 %v7372_v50  ;;  %v7373_v47 = vunpack.i.l.bf16 %v7372_v50  ;;  %6541 = vmatpush1.bf16.msk.msra.mxu0 %vm7907_vm5, %v6539_v56  ;;  %6551 = vmatpush1.bf16.msk.msra.mxu1 %vm7907_vm5, %v6549_v54 }
 0x151   :  { %v4517_v52 = vsel %vm541_vm6, %v7378_v46, %v7379_v27  ;;  %v7560_v27 = vld [vmem:[%s9035_s2 + $0x38] sm:$0xff] }
 0x152   :  { %v4515_v20 = vsel %vm541_vm6, %v7373_v47, %v7374_v57  ;;  %v7387_v7 = vpop.permute.xlu1 %7386 }
 0x153   :  { %v6552_v48 = vpack.c.bf16 %v4517_v52, %v4515_v20  ;;  %v7389_v44 = vunpack.i.h.bf16 %v7387_v7  ;;  %v7388_v39 = vunpack.i.l.bf16 %v7387_v7  ;;  %v7382_v8 = vpop.permute.xlu0 %7381  ;;  %6246 = vmatmul.mubr.msk.f32.vlgmr.msra.gmra.mrb[8].mxu0 %vm168_vm1, %v6236_v4  ;;  %6254 = vmatmul.mubr.msk.f32.vlgmr.msra.gmra.mrb[8].mxu1 %vm168_vm1, %v6236_v4  ;;  %v7562_v20 = vld [vmem:[%s9035_s2 + $0x18] sm:$0xff]  ;;  %v7563_v7 = vld [vmem:[%s9035_s2 + $0x8] sm:$0xff] }
 0x154   :  { %v7384_v9 = vunpack.i.h.bf16 %v7382_v8  ;;  %v7383_v13 = vunpack.i.l.bf16 %v7382_v8  ;;  %4309 = vmatprep.mubr.f32.mxu0 %v7568_v3  ;;  %4483 = vmatprep.mubr.f32.mxu1 %v7568_v3 }
 0x155   :  { %v4521_v31 = vsel %vm541_vm6, %v7388_v39, %v7389_v44  ;;  %6554 = vmatprep.subr.msk.bf16.mxu0 %vm7970_vm9, %v6552_v48  ;;  %v6576_v48 = vpack.c.bf16 %v7562_v20, %v7563_v7 }
 0x156   :  { %v4519_v35 = vsel %vm541_vm6, %v7383_v13, %v7384_v9  ;;  %v7397_v37 = vpop.permute.xlu1 %7396 }
 0x157   :  { %v6558_v15 = vpack.c.bf16 %v4521_v31, %v4519_v35  ;;  %v7399_v23 = vunpack.i.h.bf16 %v7397_v37  ;;  %v7398_v24 = vunpack.i.l.bf16 %v7397_v37  ;;  %v7392_v16 = vpop.permute.xlu0 %7391  ;;  %6247 = vmatmul.mubr.msk.f32.gmra.mrb[10].mxu0 %vm168_vm1, %v6237_v32  ;;  %6255 = vmatmul.mubr.msk.f32.gmra.mrb[10].mxu1 %vm168_vm1, %v6237_v32  ;;  %v6270_v31 = vld [vmem:[%s9034_s3 + $0x150] sm:$0xff] }
 0x158   :  { %v7394_v60 = vunpack.i.h.bf16 %v7392_v16  ;;  %v7393_v30 = vunpack.i.l.bf16 %v7392_v16  ;;  %4611 = vmatprep.mubr.f32.mxu0 %v7568_v3  ;;  %4692 = vmatprep.mubr.f32.mxu1 %v7568_v3  ;;  %v7564_v37 = vld [vmem:[%s9035_s2 + $0x10] sm:$0xff] }
 0x159   :  { %v4518_v40 = vsel %vm541_vm6, %v7398_v24, %v7383_v13  ;;  %v4520_v28 = vsel %vm541_vm6, %v7399_v23, %v7388_v39  ;;  %6560 = vmatprep.subr.msk.bf16.mxu1 %vm7970_vm9, %v6558_v15  ;;  %v7565_v15 = vld [vmem:[%s9035_s2] sm:$0xff] }
 0x15a   :  { %v6561_v41 = vpack.c.bf16 %v4520_v28, %v4518_v40  ;;  %v4516_v43 = vsel %vm541_vm6, %v7394_v60, %v7378_v46  ;;  %v4514_v45 = vsel %vm541_vm6, %v7393_v30, %v7373_v47  ;;  %v7407_v36 = vpop.permute.xlu1 %7406  ;;  %v7561_v46 = vld [vmem:[%s9035_s2 + $0x28] sm:$0xff]  ;;  %v6578_v23 = vpack.c.bf16 %v7564_v37, %v7565_v15  ;;  %v7566_v60 = vld [vmem:[%s9035_s2 + $0x30] sm:$0xff]  ;;  %v7567_v30 = vld [vmem:[%s9035_s2 + $0x20] sm:$0xff] }
 0x15b   :  { %v6555_v1 = vpack.c.bf16 %v4516_v43, %v4514_v45  ;;  %v7409_v0 = vunpack.i.h.bf16 %v7407_v36  ;;  %v7408_v18 = vunpack.i.l.bf16 %v7407_v36  ;;  %v7402_v19 = vpop.permute.xlu0 %7401  ;;  %v6580_v50 = vpack.c.bf16 %v7560_v27, %v7561_v46 }
 0x15c   :  { %v7404_v14 = vunpack.i.h.bf16 %v7402_v19  ;;  %v7403_v33 = vunpack.i.l.bf16 %v7402_v19  ;;  %6563 = vmatpush1.bf16.msk.msra.mxu1 %vm7981_vm10, %v6561_v41  ;;  %v6582_v40 = vpack.c.bf16 %v7566_v60, %v7567_v30 }
 0x15d   :  { %v4736_v11 = vsel %vm761_vm11, %v7408_v18, %v7409_v0  ;;  %6557 = vmatpush1.bf16.msk.msra.mxu0 %vm7981_vm10, %v6555_v1  ;;  %v6271_v0 = vld [vmem:[%s9034_s3 + $0x158] sm:$0xff] }
 0x15e   :  { %v4734_v12 = vsel %vm761_vm11, %v7403_v33, %v7404_v14  ;;  %v7417_v21 = vpop.permute.xlu1 %7416 }
 0x15f   :  { %v6564_v62 = vpack.c.bf16 %v4736_v11, %v4734_v12  ;;  %v7419_v29 = vunpack.i.h.bf16 %v7417_v21  ;;  %v7418_v25 = vunpack.i.l.bf16 %v7417_v21  ;;  %v7412_v49 = vpop.permute.xlu0 %7411  ;;  %6268 = vmatmul.mubr.msk.f32.vlgmr.msra.gmra.mrb[8].mxu1 %vm168_vm1, %v6256_v55 }
 0x160   :  { %v7414_v61 = vunpack.i.h.bf16 %v7412_v49  ;;  %v7413_v51 = vunpack.i.l.bf16 %v7412_v49  ;;  %6262 = vmatmul.mubr.msk.f32.vlgmr.msra.gmra.mrb[8].mxu0 %vm168_vm1, %v6256_v55  ;;  %4698 = vmatprep.mubr.f32.mxu1 %v7568_v3 }
 0x161   :  { %v4740_v6 = vsel %vm761_vm11, %v7418_v25, %v7419_v29  ;;  %6566 = vmatprep.subr.msk.bf16.mxu0 %vm7887_vm4, %v6564_v62  ;;  %4617 = vmatprep.mubr.f32.mxu0 %v7568_v3  ;;  %v6284_v29 = vld [vmem:[%s9034_s3 + $0x160] sm:$0xff] }
 0x162   :  { %v4738_v10 = vsel %vm761_vm11, %v7413_v51, %v7414_v61  ;;  %v7427_v22 = vpop.permute.xlu1 %7426 }
 0x163   :  { %v6570_v34 = vpack.c.bf16 %v4740_v6, %v4738_v10  ;;  %v7429_v53 = vunpack.i.h.bf16 %v7427_v22  ;;  %v7428_v42 = vunpack.i.l.bf16 %v7427_v22  ;;  %v7422_v2 = vpop.permute.xlu0 %7421  ;;  %6269 = vmatmul.mubr.msk.f32.gmra.mrb[10].mxu1 %vm168_vm1, %v6257_v63 }
 0x164   :  { %v7424_v26 = vunpack.i.h.bf16 %v7422_v2  ;;  %v7423_v54 = vunpack.i.l.bf16 %v7422_v2  ;;  %6263 = vmatmul.mubr.msk.f32.gmra.mrb[10].mxu0 %vm168_vm1, %v6257_v63  ;;  %4911 = vmatprep.mubr.f32.mxu1 %v7568_v3 }
 0x165   :  { %v4737_v56 = vsel %vm761_vm11, %v7428_v42, %v7413_v51  ;;  %v4739_v38 = vsel %vm761_vm11, %v7429_v53, %v7418_v25  ;;  %6572 = vmatprep.subr.msk.bf16.mxu1 %vm7887_vm4, %v6570_v34  ;;  %4830 = vmatprep.mubr.f32.mxu0 %v7568_v3 }
 0x166   :  { %v6573_v57 = vpack.c.bf16 %v4739_v38, %v4737_v56  ;;  %v4735_v47 = vsel %vm761_vm11, %v7424_v26, %v7408_v18  ;;  %v4733_v4 = vsel %vm761_vm11, %v7423_v54, %v7403_v33  ;;  %v7437_v52 = vpop.permute.xlu1 %7436  ;;  %v6285_v26 = vld [vmem:[%s9034_s3 + $0x168] sm:$0xff] }
 0x167   :  { %v6567_v44 = vpack.c.bf16 %v4735_v47, %v4733_v4  ;;  %v7439_v39 = vunpack.i.h.bf16 %v7437_v52  ;;  %v7438_v8 = vunpack.i.l.bf16 %v7437_v52  ;;  %v7432_v9 = vpop.permute.xlu0 %7431  ;;  %v6290_v52 = vld [vmem:[%s9034_s3 + $0x170] sm:$0xff] }
 0x168   :  { %v7434_v13 = vunpack.i.h.bf16 %v7432_v9  ;;  %v7433_v32 = vunpack.i.l.bf16 %v7432_v9  ;;  %6575 = vmatpush1.bf16.msk.msra.mxu1 %vm7907_vm5, %v6573_v57 }
 0x169   :  { %v5150_v35 = vsel %vm1176_vm12, %v7438_v8, %v7439_v39  ;;  %6569 = vmatpush1.bf16.msk.msra.mxu0 %vm7907_vm5, %v6567_v44  ;;  %6581 = vmatprep.subr.bf16.mxu1 %v6580_v50 }
 0x16a   :  { %v5148_v24 = vsel %vm1176_vm12, %v7433_v32, %v7434_v13  ;;  %v7447_v16 = vpop.permute.xlu1 %7446  ;;  %6577 = vmatprep.subr.bf16.mxu0 %v6576_v48 }
 0x16b   :  { %v6584_v28 = vpack.c.bf16 %v5150_v35, %v5148_v24  ;;  %v7449_v41 = vunpack.i.h.bf16 %v7447_v16  ;;  %v7448_v43 = vunpack.i.l.bf16 %v7447_v16  ;;  %v7442_v45 = vpop.permute.xlu0 %7441  ;;  %6282 = vmatmul.mubr.msk.f32.vlgmr.msra.gmra.mrb[8].mxu1 %vm168_vm1, %v6270_v31 }
 0x16c   :  { %v7444_v36 = vunpack.i.h.bf16 %v7442_v45  ;;  %v7443_v1 = vunpack.i.l.bf16 %v7442_v45  ;;  %6276 = vmatmul.mubr.msk.f32.vlgmr.msra.gmra.mrb[8].mxu0 %vm168_vm1, %v6270_v31  ;;  %4917 = vmatprep.mubr.f32.mxu1 %v7568_v3  ;;  %v6291_v31 = vld [vmem:[%s9034_s3 + $0x178] sm:$0xff] }
 0x16d   :  { %v5154_v18 = vsel %vm1176_vm12, %v7448_v43, %v7449_v41  ;;  %6579 = vmatpush1.bf16.msra.mxu0 %v6578_v23  ;;  %4836 = vmatprep.mubr.f32.mxu0 %v7568_v3 }
 0x16e   :  { %v5152_v19 = vsel %vm1176_vm12, %v7443_v1, %v7444_v36  ;;  %6586 = vmatprep.subr.msk.bf16.mxu0 %vm7970_vm9, %v6584_v28  ;;  %v7457_v14 = vpop.permute.xlu1 %7456  ;;  %6583 = vmatpush1.bf16.msra.mxu1 %v6582_v40 }
 0x16f   :  { %v6590_v33 = vpack.c.bf16 %v5154_v18, %v5152_v19  ;;  %v7459_v55 = vunpack.i.h.bf16 %v7457_v14  ;;  %v7458_v11 = vunpack.i.l.bf16 %v7457_v14  ;;  %v7452_v12 = vpop.permute.xlu0 %7451  ;;  %6283 = vmatmul.mubr.msk.f32.gmra.mrb[10].mxu1 %vm168_vm1, %v6271_v0 }
 0x170   :  { %v7454_v21 = vunpack.i.h.bf16 %v7452_v12  ;;  %v7453_v62 = vunpack.i.l.bf16 %v7452_v12  ;;  %6277 = vmatmul.mubr.msk.f32.gmra.mrb[10].mxu0 %vm168_vm1, %v6271_v0  ;;  %5082 = vmatprep.mubr.f32.mxu1 %v7568_v3 }
 0x171   :  { %v5151_v25 = vsel %vm1176_vm12, %v7458_v11, %v7443_v1  ;;  %v5153_v49 = vsel %vm1176_vm12, %v7459_v55, %v7448_v43  ;;  %6592 = vmatprep.subr.msk.bf16.mxu1 %vm7970_vm9, %v6590_v33  ;;  %5001 = vmatprep.mubr.f32.mxu0 %v7568_v3 }
 0x172   :  { %v6593_v61 = vpack.c.bf16 %v5153_v49, %v5151_v25  ;;  %v5149_v51 = vsel %vm1176_vm12, %v7454_v21, %v7438_v8  ;;  %v5147_v63 = vsel %vm1176_vm12, %v7453_v62, %v7433_v32  ;;  %v7467_v6 = vpop.permute.xlu1 %7466 }
 0x173   :  { %v6587_v10 = vpack.c.bf16 %v5149_v51, %v5147_v63  ;;  %v7469_v22 = vunpack.i.h.bf16 %v7467_v6  ;;  %v7468_v34 = vunpack.i.l.bf16 %v7467_v6  ;;  %v7462_v53 = vpop.permute.xlu0 %7461  ;;  %6288 = vmatmul.mubr.msk.f32.vlgmr.msra.gmra.mrb[8].mxu1 %vm168_vm1, %v6284_v29 }
 0x174   :  { %v7464_v42 = vunpack.i.h.bf16 %v7462_v53  ;;  %v7463_v2 = vunpack.i.l.bf16 %v7462_v53  ;;  %6286 = vmatmul.mubr.msk.f32.vlgmr.msra.gmra.mrb[8].mxu0 %vm168_vm1, %v6284_v29  ;;  %6595 = vmatpush1.bf16.msk.msra.mxu1 %vm7981_vm10, %v6593_v61 }
 0x175   :  { %v5369_v54 = vsel %vm1396_vm13, %v7468_v34, %v7469_v22  ;;  %6589 = vmatpush1.bf16.msk.msra.mxu0 %vm7981_vm10, %v6587_v10  ;;  %5007 = vmatprep.mubr.f32.mxu0 %v7568_v3 }
 0x176   :  { %v5367_v56 = vsel %vm1396_vm13, %v7463_v2, %v7464_v42  ;;  %v7477_v38 = vpop.permute.xlu1 %7476  ;;  %5088 = vmatprep.mubr.f32.mxu1 %v7568_v3 }
 0x177   :  { %v6596_v27 = vpack.c.bf16 %v5369_v54, %v5367_v56  ;;  %v7479_v46 = vunpack.i.h.bf16 %v7477_v38  ;;  %v7478_v50 = vunpack.i.l.bf16 %v7477_v38  ;;  %v7472_v57 = vpop.permute.xlu0 %7471  ;;  %6289 = vmatmul.mubr.msk.f32.gmra.mrb[10].mxu1 %vm168_vm1, %v6285_v26 }
 0x178   :  { %v7474_v47 = vunpack.i.h.bf16 %v7472_v57  ;;  %v7473_v4 = vunpack.i.l.bf16 %v7472_v57  ;;  %6287 = vmatmul.mubr.msk.f32.gmra.mrb[10].mxu0 %vm168_vm1, %v6285_v26  ;;  %5325 = vmatprep.mubr.f32.mxu1 %v7568_v3 }
 0x179   :  { %v5373_v20 = vsel %vm1396_vm13, %v7478_v50, %v7479_v46  ;;  %6598 = vmatprep.subr.msk.bf16.mxu0 %vm7887_vm4, %v6596_v27  ;;  %5244 = vmatprep.mubr.f32.mxu0 %v7568_v3  ;;  %v6318_v27 = vld [vmem:[%s9034_s3 + $0x190] sm:$0xff] }
 0x17a   :  { %v5371_v7 = vsel %vm1396_vm13, %v7473_v4, %v7474_v47  ;;  %v7487_v48 = vpop.permute.xlu1 %7486 }
 0x17b   :  { %v6602_v44 = vpack.c.bf16 %v5373_v20, %v5371_v7  ;;  %v7489_v39 = vunpack.i.h.bf16 %v7487_v48  ;;  %v7488_v8 = vunpack.i.l.bf16 %v7487_v48  ;;  %v7482_v9 = vpop.permute.xlu0 %7481  ;;  %6302 = vmatmul.mubr.msk.f32.vlgmr.msra.gmra.mrb[8].mxu1 %vm168_vm1, %v6290_v52 }
 0x17c   :  { %v7484_v13 = vunpack.i.h.bf16 %v7482_v9  ;;  %v7483_v32 = vunpack.i.l.bf16 %v7482_v9  ;;  %6296 = vmatmul.mubr.msk.f32.vlgmr.msra.gmra.mrb[8].mxu0 %vm168_vm1, %v6290_v52  ;;  %5331 = vmatprep.mubr.f32.mxu1 %v7568_v3 }
 0x17d   :  { %v5370_v35 = vsel %vm1396_vm13, %v7488_v8, %v7473_v4  ;;  %v5372_v37 = vsel %vm1396_vm13, %v7489_v39, %v7478_v50  ;;  %6604 = vmatprep.subr.msk.bf16.mxu1 %vm7887_vm4, %v6602_v44  ;;  %5250 = vmatprep.mubr.f32.mxu0 %v7568_v3  ;;  %v6319_v44 = vld [vmem:[%s9034_s3 + $0x198] sm:$0xff] }
 0x17e   :  { %v6605_v15 = vpack.c.bf16 %v5372_v37, %v5370_v35  ;;  %v5368_v23 = vsel %vm1396_vm13, %v7484_v13, %v7468_v34  ;;  %v5366_v24 = vsel %vm1396_vm13, %v7483_v32, %v7463_v2  ;;  %v7497_v16 = vpop.permute.xlu1 %7496 }
 0x17f   :  { %v6599_v60 = vpack.c.bf16 %v5368_v23, %v5366_v24  ;;  %v7499_v30 = vunpack.i.h.bf16 %v7497_v16  ;;  %v7498_v40 = vunpack.i.l.bf16 %v7497_v16  ;;  %v7492_v28 = vpop.permute.xlu0 %7491  ;;  %6303 = vmatmul.mubr.msk.f32.gmra.mrb[10].mxu1 %vm168_vm1, %v6291_v31 }
 0x180   :  { %v7494_v41 = vunpack.i.h.bf16 %v7492_v28  ;;  %v7493_v43 = vunpack.i.l.bf16 %v7492_v28  ;;  %6607 = vmatpush1.bf16.msk.msra.mxu1 %vm7907_vm5, %v6605_v15  ;;  %6297 = vmatmul.mubr.msk.f32.gmra.mrb[10].mxu0 %vm168_vm1, %v6291_v31  ;;  %v6324_v28 = vld [vmem:[%s9034_s3 + $0x1a0] sm:$0xff] }
 0x181   :  { %6601 = vmatpush1.bf16.msk.msra.mxu0 %vm7907_vm5, %v6599_v60  ;;  %v5579_v45 = vsel %vm1607_vm14, %v7498_v40, %v7499_v30  ;;  %5463 = vmatprep.mubr.f32.mxu0 %v7568_v3 }
 0x182   :  { %v7507_v36 = vpop.permute.xlu1 %7506  ;;  %v5577_v1 = vsel %vm1607_vm14, %v7493_v43, %v7494_v41  ;;  %5544 = vmatprep.mubr.f32.mxu1 %v7568_v3 }
 0x183   :  { %v7509_v0 = vunpack.i.h.bf16 %v7507_v36  ;;  %v7508_v18 = vunpack.i.l.bf16 %v7507_v36  ;;  %v7502_v19 = vpop.permute.xlu0 %7501  ;;  %v6608_v14 = vpack.c.bf16 %v5579_v45, %v5577_v1  ;;  %6316 = vmatmul.mubr.msk.f32.vlgmr.msra.gmra.mrb[8].mxu1 %vm168_vm1, %v6304_v59 }
 0x184   :  { %v7504_v33 = vunpack.i.h.bf16 %v7502_v19  ;;  %v7503_v55 = vunpack.i.l.bf16 %v7502_v19  ;;  %6310 = vmatmul.mubr.msk.f32.vlgmr.msra.gmra.mrb[8].mxu0 %vm168_vm1, %v6304_v59  ;;  %5550 = vmatprep.mubr.f32.mxu1 %v7568_v3 }
 0x185   :  { %6609 = vmatprep.subr.bf16.mxu0 %v6608_v14  ;;  %v5686_v11 = vsel %vm1607_vm14, %v7508_v18, %v7509_v0  ;;  %5469 = vmatprep.mubr.f32.mxu0 %v7568_v3 }
 0x186   :  { %v7517_v12 = vpop.permute.xlu1 %7516  ;;  %v5684_v21 = vsel %vm1607_vm14, %v7503_v55, %v7504_v33 }
 0x187   :  { %v7519_v62 = vunpack.i.h.bf16 %v7517_v12  ;;  %v7518_v29 = vunpack.i.l.bf16 %v7517_v12  ;;  %v7512_v25 = vpop.permute.xlu0 %7511  ;;  %v6612_v49 = vpack.c.bf16 %v5686_v11, %v5684_v21  ;;  %6317 = vmatmul.mubr.msk.f32.gmra.mrb[10].mxu1 %vm168_vm1, %v6305_v17 }
 0x188   :  { %v7514_v61 = vunpack.i.h.bf16 %v7512_v25  ;;  %v7513_v51 = vunpack.i.l.bf16 %v7512_v25  ;;  %6311 = vmatmul.mubr.msk.f32.gmra.mrb[10].mxu0 %vm168_vm1, %v6305_v17  ;;  %5755 = vmatprep.mubr.f32.mxu1 %v7568_v3 }
 0x189   :  { %v5683_v63 = vsel %vm1607_vm14, %v7518_v29, %v7503_v55  ;;  %v5685_v6 = vsel %vm1607_vm14, %v7519_v62, %v7508_v18  ;;  %6613 = vmatprep.subr.bf16.mxu1 %v6612_v49  ;;  %5654 = vmatprep.mubr.f32.mxu0 %v7568_v3 }
 0x18a   :  { %v6614_v10 = vpack.c.bf16 %v5685_v6, %v5683_v63  ;;  %v5578_v22 = vsel %vm1607_vm14, %v7514_v61, %v7498_v40  ;;  %v5576_v34 = vsel %vm1607_vm14, %v7513_v51, %v7493_v43  ;;  %v7527_v53 = vpop.permute.xlu1 %7526 }
 0x18b   :  { %v6610_v42 = vpack.c.bf16 %v5578_v22, %v5576_v34  ;;  %v7529_v2 = vunpack.i.h.bf16 %v7527_v53  ;;  %v7528_v26 = vunpack.i.l.bf16 %v7527_v53  ;;  %v7522_v54 = vpop.permute.xlu0 %7521 }
 0x18c   :  { %v7524_v56 = vunpack.i.h.bf16 %v7522_v54  ;;  %v7523_v38 = vunpack.i.l.bf16 %v7522_v54  ;;  %6615 = vmatpush1.bf16.msra.mxu1 %v6614_v10 }
 0x18d   :  { %v5799_v46 = vsel %vm1828_vm15, %v7528_v26, %v7529_v2  ;;  %6611 = vmatpush1.bf16.msra.mxu0 %v6610_v42 }
 0x18e   :  { %v5797_v50 = vsel %vm1828_vm15, %v7523_v38, %v7524_v56  ;;  %v7537_v57 = vpop.permute.xlu1 %7536 }
 0x18f   :  { %v6616_v47 = vpack.c.bf16 %v5799_v46, %v5797_v50  ;;  %v7539_v4 = vunpack.i.h.bf16 %v7537_v57  ;;  %v7538_v52 = vunpack.i.l.bf16 %v7537_v57  ;;  %v7532_v20 = vpop.permute.xlu0 %7531  ;;  %6322 = vmatmul.mubr.msk.f32.vlgmr.msra.gmra.mrb[8].mxu1 %vm168_vm1, %v6318_v27 }
 0x190   :  { %v7534_v7 = vunpack.i.h.bf16 %v7532_v20  ;;  %v7533_v48 = vunpack.i.l.bf16 %v7532_v20  ;;  %6320 = vmatmul.mubr.msk.f32.vlgmr.msra.gmra.mrb[8].mxu0 %vm168_vm1, %v6318_v27  ;;  %5761 = vmatprep.mubr.f32.mxu1 %v7568_v3 }
 0x191   :  { %v5803_v39 = vsel %vm1828_vm15, %v7538_v52, %v7539_v4  ;;  %6618 = vmatprep.subr.msk.bf16.mxu0 %vm7970_vm9, %v6616_v47  ;;  %5660 = vmatprep.mubr.f32.mxu0 %v7568_v3 }
 0x192   :  { %v5801_v8 = vsel %vm1828_vm15, %v7533_v48, %v7534_v7  ;;  %v7547_v9 = vpop.permute.xlu1 %7546 }
 0x193   :  { %v6622_v13 = vpack.c.bf16 %v5803_v39, %v5801_v8  ;;  %v7549_v32 = vunpack.i.h.bf16 %v7547_v9  ;;  %v7548_v31 = vunpack.i.l.bf16 %v7547_v9  ;;  %v7542_v35 = vpop.permute.xlu0 %7541  ;;  %6323 = vmatmul.mubr.msk.f32.gmra.mrb[10].mxu1 %vm168_vm1, %v6319_v44 }
 0x194   :  { %v7544_v37 = vunpack.i.h.bf16 %v7542_v35  ;;  %v7543_v15 = vunpack.i.l.bf16 %v7542_v35  ;;  %6321 = vmatmul.mubr.msk.f32.gmra.mrb[10].mxu0 %vm168_vm1, %v6319_v44  ;;  %5974 = vmatprep.mubr.f32.mxu1 %v7568_v3 }
 0x195   :  { %v5800_v23 = vsel %vm1828_vm15, %v7548_v31, %v7533_v48  ;;  %v5802_v24 = vsel %vm1828_vm15, %v7549_v32, %v7538_v52  ;;  %6624 = vmatprep.subr.msk.bf16.mxu1 %vm7970_vm9, %v6622_v13  ;;  %5893 = vmatprep.mubr.f32.mxu0 %v7568_v3 }
 0x196   :  { %v6625_v16 = vpack.c.bf16 %v5802_v24, %v5800_v23  ;;  %v5798_v60 = vsel %vm1828_vm15, %v7544_v37, %v7528_v26  ;;  %v5796_v30 = vsel %vm1828_vm15, %v7543_v15, %v7523_v38 }
 0x197   :  { %v6619_v40 = vpack.c.bf16 %v5798_v60, %v5796_v30 }
 0x198   :  { %6627 = vmatpush1.bf16.msk.msra.mxu1 %vm7981_vm10, %v6625_v16 }
 0x199   :  { %6621 = vmatpush1.bf16.msk.msra.mxu0 %vm7981_vm10, %v6619_v40 }
 0x19b   :  { %6336 = vmatmul.mubr.msk.f32.vlgmr.msra.gmra.mrb[8].mxu1 %vm168_vm1, %v6324_v28 }
 0x19c   :  { %6330 = vmatmul.mubr.msk.f32.vlgmr.msra.gmra.mrb[8].mxu0 %vm168_vm1, %v6324_v28  ;;  %5980 = vmatprep.mubr.f32.mxu1 %v7568_v3 }
 0x19d   :  { %5899 = vmatprep.mubr.f32.mxu0 %v7568_v3 }
 0x19f   :  { %6337 = vmatmul.mubr.msk.f32.gmra.mrb[10].mxu1 %vm168_vm1, %v6325_v58 }
 0x1a0   :  { %6331 = vmatmul.mubr.msk.f32.gmra.mrb[10].mxu0 %vm168_vm1, %v6325_v58 }
 0x1a3   :  { %v2034_v18 = vpop.permute.xlu1 %2033 }
 0x1a4   :  { %v2029_v41 = vpop.permute.xlu0 %2028 }
 0x1a7   :  { %v4013_v62 = vpop.permute.xlu1 %4012 }
 0x1a8   :  { %v4018_v22 = vpop.permute.xlu0 %4017 }
 0x1ac   :  { %v5997_v27 = vpop.permute.xlu1 %5996  ;;  %v6002_v48 = vpop.permute.xlu0 %6001 }
 0x1af   :  { %v1928_v43 = vpop.f32.mrb[0].mxu0 }
 0x1b0   :  { %v2036_v5 = vadd.f32 %v2029_v41, %v1928_v43  ;;  %v1930_v59 = vpop.f32.mrb[1].mxu0  ;;  %v2009_v45 = vpop.f32.mrb[0].mxu1 }
 0x1b1   :  { %v2037_v36 = vadd.f32 %v2029_v41, %v1930_v59  ;;  %v2040_v1 = vadd.f32 %v2029_v41, %v2009_v45  ;;  %v2011_v0 = vpop.f32.mrb[1].mxu1 }
 0x1b2   :  { %2044 = vst [vmem:[%s9037_s5] sm:$0xff] %v2036_v5  ;;  %v2041_v19 = vadd.f32 %v2029_v41, %v2011_v0 }
 0x1b3   :  { %2045 = vst [vmem:[%s9037_s5 + $0x8] sm:$0xff] %v2037_v36  ;;  %2048 = vst [vmem:[%s9037_s5 + $0x20] sm:$0xff] %v2040_v1  ;;  %v1934_v3 = vpop.f32.mrb[2].mxu0 }
 0x1b4   :  { %2049 = vst [vmem:[%s9037_s5 + $0x28] sm:$0xff] %v2041_v19  ;;  %v2038_v14 = vadd.f32 %v2034_v18, %v1934_v3  ;;  %v1936_v33 = vpop.f32.mrb[3].mxu0 }
 0x1b5   :  { %v2039_v55 = vadd.f32 %v2034_v18, %v1936_v33  ;;  %v2015_v17 = vpop.f32.mrb[2].mxu1 }
 0x1b6   :  { %2046 = vst [vmem:[%s9037_s5 + $0x10] sm:$0xff] %v2038_v14  ;;  %v2042_v11 = vadd.f32 %v2034_v18, %v2015_v17  ;;  %v2017_v12 = vpop.f32.mrb[3].mxu1 }
 0x1b7   :  { %2047 = vst [vmem:[%s9037_s5 + $0x18] sm:$0xff] %v2039_v55  ;;  %v2043_v21 = vadd.f32 %v2034_v18, %v2017_v12 }
 0x1b8   :  { %2050 = vst [vmem:[%s9037_s5 + $0x30] sm:$0xff] %v2042_v11 }
 0x1b9   :  { %2051 = vst [vmem:[%s9037_s5 + $0x38] sm:$0xff] %v2043_v21 }
 0x20e   :  { %v3911_v29 = vpop.f32.mrb[4].mxu0  ;;  %v3992_v25 = vpop.f32.mrb[4].mxu1 }
 0x20f   :  { %v4020_v49 = vadd.f32 %v4013_v62, %v3911_v29  ;;  %v4024_v61 = vadd.f32 %v4013_v62, %v3992_v25  ;;  %v3913_v51 = vpop.f32.mrb[5].mxu0  ;;  %v3994_v63 = vpop.f32.mrb[5].mxu1 }
 0x210   :  { %v4021_v6 = vadd.f32 %v4013_v62, %v3913_v51  ;;  %v4025_v10 = vadd.f32 %v4013_v62, %v3994_v63 }
 0x211   :  { %4028 = vst [vmem:[%s9038_s6] sm:$0xff] %v4020_v49  ;;  %4032 = vst [vmem:[%s9038_s6 + $0x20] sm:$0xff] %v4024_v61 }
 0x212   :  { %4029 = vst [vmem:[%s9038_s6 + $0x8] sm:$0xff] %v4021_v6  ;;  %4033 = vst [vmem:[%s9038_s6 + $0x28] sm:$0xff] %v4025_v10  ;;  %v3917_v34 = vpop.f32.mrb[6].mxu0  ;;  %v3998_v53 = vpop.f32.mrb[6].mxu1 }
 0x213   :  { %v4022_v42 = vadd.f32 %v4018_v22, %v3917_v34  ;;  %v4026_v2 = vadd.f32 %v4018_v22, %v3998_v53  ;;  %v3919_v26 = vpop.f32.mrb[7].mxu0  ;;  %v4000_v54 = vpop.f32.mrb[7].mxu1 }
 0x214   :  { %v4023_v56 = vadd.f32 %v4018_v22, %v3919_v26  ;;  %v4027_v38 = vadd.f32 %v4018_v22, %v4000_v54 }
 0x215   :  { %4030 = vst [vmem:[%s9038_s6 + $0x10] sm:$0xff] %v4022_v42  ;;  %4034 = vst [vmem:[%s9038_s6 + $0x30] sm:$0xff] %v4026_v2 }
 0x216   :  { %4031 = vst [vmem:[%s9038_s6 + $0x18] sm:$0xff] %v4023_v56  ;;  %4035 = vst [vmem:[%s9038_s6 + $0x38] sm:$0xff] %v4027_v38 }
 0x26e   :  { %v5976_v46 = vpop.f32.mrb[8].mxu1 }
 0x26f   :  { %v5895_v50 = vpop.f32.mrb[8].mxu0  ;;  %v6008_v57 = vadd.f32 %v5997_v27, %v5976_v46  ;;  %v5978_v47 = vpop.f32.mrb[9].mxu1 }
 0x270   :  { %v6004_v4 = vadd.f32 %v5997_v27, %v5895_v50  ;;  %v5897_v52 = vpop.f32.mrb[9].mxu0  ;;  %v6009_v20 = vadd.f32 %v5997_v27, %v5978_v47 }
 0x271   :  { %6016 = vst [vmem:[%s9039_s7 + $0x20] sm:$0xff] %v6008_v57  ;;  %v6005_v7 = vadd.f32 %v5997_v27, %v5897_v52 }
 0x272   :  { %6012 = vst [vmem:[%s9039_s7] sm:$0xff] %v6004_v4  ;;  %6017 = vst [vmem:[%s9039_s7 + $0x28] sm:$0xff] %v6009_v20  ;;  %v5982_v44 = vpop.f32.mrb[10].mxu1 }
 0x273   :  { %6013 = vst [vmem:[%s9039_s7 + $0x8] sm:$0xff] %v6005_v7  ;;  %v5901_v39 = vpop.f32.mrb[10].mxu0  ;;  %v6010_v8 = vadd.f32 %v6002_v48, %v5982_v44  ;;  %v5984_v9 = vpop.f32.mrb[11].mxu1 }
 0x274   :  { %v6006_v13 = vadd.f32 %v6002_v48, %v5901_v39  ;;  %v5903_v32 = vpop.f32.mrb[11].mxu0  ;;  %v6011_v31 = vadd.f32 %v6002_v48, %v5984_v9 }
 0x275   :  { %6018 = vst [vmem:[%s9039_s7 + $0x30] sm:$0xff] %v6010_v8  ;;  %v6007_v35 = vadd.f32 %v6002_v48, %v5903_v32 }
 0x276   :  { %6014 = vst [vmem:[%s9039_s7 + $0x10] sm:$0xff] %v6006_v13  ;;  %6019 = vst [vmem:[%s9039_s7 + $0x38] sm:$0xff] %v6011_v31 }
 0x277   :  { %6015 = vst [vmem:[%s9039_s7 + $0x18] sm:$0xff] %v6007_v35 }

</bundles_post_ra>
